<compile_context>
chip_gen: v5e
topology: v5e:2x2
jax: 0.10.0
libtpu: 0.0.40
codegen_flags: <defaults>
</compile_context>

<pallas_src>
import functools
import math

import jax
import jax.numpy as jnp
from jax.experimental import pallas as pl
from jax.experimental.pallas import tpu as pltpu


# ----------------------------------------------------------------------------
# Pallas kernels
# ----------------------------------------------------------------------------

def _round_up(x, m):
    return ((x + m - 1) // m) * m


def _choose_tile(dim, target, align, split=False):
    """Pick a tile size for one matmul dim. Returns (tile, padded_dim).

    Prefers the full dim (no padding). Optionally splits an aligned full dim in
    two so a "parallel" grid axis has >= 2 blocks (v7x megacore sharding)."""
    if dim <= target:
        if split and dim >= 2 * align and dim % (2 * align) == 0:
            return dim // 2, dim
        return dim, dim
    if dim % target == 0:
        return target, dim
    return target, _round_up(dim, target)      # rare fallback: pad this dim


def _mm_kernel(*refs, fuse_residual, fuse_ln, activation, use_floor, ln_eps,
               acc_in_out):
    """Tiled matmul (bf16 operands, f32 accumulate) with fused epilogue:
         y = acc * scale + shift          (bias already folded into shift)
         y = y + residual                 (optional)
         y = max(y, floor) | relu(y)      (optional; per-column floor or plain relu)
         y = LN(y) * gamma + beta         (optional; requires tn == full N)
    """
    x_ref, w_ref, s_ref, t_ref = refs[0], refs[1], refs[2], refs[3]
    pos = 4
    f_ref = r_ref = g_ref = b_ref = None
    if use_floor:
        f_ref = refs[pos]; pos += 1
    if fuse_residual:
        r_ref = refs[pos]; pos += 1
    if fuse_ln:
        g_ref, b_ref = refs[pos], refs[pos + 1]; pos += 2
    o_ref = refs[pos]; pos += 1
    acc_ref = o_ref if acc_in_out else refs[pos]

    k = pl.program_id(2)

    @pl.when(k == 0)
    def _init():
        acc_ref[...] = jnp.zeros(acc_ref.shape, acc_ref.dtype)

    acc_ref[...] += jnp.dot(x_ref[...], w_ref[...],
                            preferred_element_type=jnp.float32)

    @pl.when(k == pl.num_programs(2) - 1)
    def _finalize():
        y = acc_ref[...] * s_ref[...] + t_ref[...]
        if fuse_residual:
            y = y + r_ref[...].astype(jnp.float32)
        if use_floor:
            y = jnp.maximum(y, f_ref[...])
        elif activation == "relu":
            y = jnp.maximum(y, 0.0)
        if fuse_ln:
            mean = jnp.mean(y, axis=-1, keepdims=True)
            var = jnp.mean((y - mean) ** 2, axis=-1, keepdims=True)
            y = (y - mean) * jax.lax.rsqrt(var + ln_eps)
            y = y * g_ref[...] + b_ref[...]
        o_ref[...] = y.astype(o_ref.dtype)


def pallas_matmul(x, w, bias=None, scale=None, shift=None, activation=None,
                  act_floor=None, residual=None, ln_gamma=None, ln_beta=None,
                  ln_eps=1e-5, out_dtype=jnp.float32,
                  tm_target=256, tn_target=512, tk_target=512):
    """y = epilogue(x @ w); see _mm_kernel. bf16 MXU operands, f32 accumulate."""
    M, K = x.shape
    K2, N = w.shape
    assert K == K2
    f32, bf16 = jnp.float32, jnp.bfloat16

    # Fold bias into the affine shift:  (y + b) * s + t  ==  y * s + (b * s + t)
    s = jnp.ones((N,), f32) if scale is None else scale.astype(f32)
    t = jnp.zeros((N,), f32) if shift is None else shift.astype(f32)
    if bias is not None:
        t = t + bias.astype(f32) * s

    fuse_ln = ln_gamma is not None
    fuse_res = residual is not None
    use_floor = act_floor is not None

    # bf16 operands for the MXU (the cast fuses into the producer where possible).
    xc = x if x.dtype == bf16 else x.astype(bf16)
    wc = w if w.dtype == bf16 else w.astype(bf16)

    # --- tiling: exact-divisor tiles, no activation-side padding at these shapes ---
    tm, Mp = _choose_tile(M, tm_target, align=16, split=True)
    tk, Kp = _choose_tile(K, tk_target, align=128, split=False)
    if fuse_ln:
        # LayerNorm needs the full row in one tile (N should be a multiple of 128
        # for lane-dense stores; correctness holds either way).
        tn, Np = N, N
        if tm > 128 and Mp % 128 == 0:   # cap VMEM footprint of the tn == N path (v7x)
            tm = 128
    else:
        tn, Np = _choose_tile(N, tn_target, align=128, split=True)

    # Rare fallback padding (never triggered at the shapes in __main__).
    if Mp != M or Kp != K:
        xc = jnp.pad(xc, ((0, Mp - M), (0, Kp - K)))
    if Kp != K or Np != N:
        wc = jnp.pad(wc, ((0, Kp - K), (0, Np - N)))
    sp = (jnp.pad(s, (0, Np - N)) if Np != N else s).reshape(1, Np)
    tp = (jnp.pad(t, (0, Np - N)) if Np != N else t).reshape(1, Np)

    operands = [xc, wc, sp, tp]
    in_specs = [
        pl.BlockSpec((tm, tk), lambda i, j, k: (i, k)),
        pl.BlockSpec((tk, tn), lambda i, j, k: (k, j)),
        pl.BlockSpec((1, tn), lambda i, j, k: (0, j)),
        pl.BlockSpec((1, tn), lambda i, j, k: (0, j)),
    ]
    if use_floor:
        fp = (jnp.pad(act_floor.astype(f32), (0, Np - N)) if Np != N
              else act_floor.astype(f32)).reshape(1, Np)
        operands.append(fp)
        in_specs.append(pl.BlockSpec((1, tn), lambda i, j, k: (0, j)))
    if fuse_res:
        rp = residual
        if Mp != M or Np != N:
            rp = jnp.pad(rp, ((0, Mp - M), (0, Np - N)))
        operands.append(rp)
        in_specs.append(pl.BlockSpec((tm, tn), lambda i, j, k: (i, j)))
    if fuse_ln:
        operands.append(ln_gamma.astype(f32).reshape(1, N))
        operands.append(ln_beta.astype(f32).reshape(1, N))
        in_specs.append(pl.BlockSpec((1, N), lambda i, j, k: (0, j)))
        in_specs.append(pl.BlockSpec((1, N), lambda i, j, k: (0, j)))

    acc_in_out = (out_dtype == jnp.float32)
    scratch_shapes = [] if acc_in_out else [pltpu.VMEM((tm, tn), jnp.float32)]

    # Rough VMEM footprint; only raise the scoped limit when it would trip the
    # conservative (v5e, 16 MiB) default.
    est = 2 * (tm * tk * 2 + tk * tn * 2) + 2 * tm * tn * 4
    if not acc_in_out:
        est += tm * tn * 4
    if fuse_res:
        est += 2 * tm * tn * residual.dtype.itemsize
    vmem_limit = min(2 * est, 64 * 1024 * 1024) if est > 12 * 1024 * 1024 else None

    kernel = functools.partial(_mm_kernel, fuse_residual=fuse_res, fuse_ln=fuse_ln,
                               activation=activation, use_floor=use_floor,
                               ln_eps=ln_eps, acc_in_out=acc_in_out)
    out = pl.pallas_call(
        kernel,
        grid=(Mp // tm, Np // tn, Kp // tk),
        out_shape=jax.ShapeDtypeStruct((Mp, Np), out_dtype),
        in_specs=in_specs,
        out_specs=pl.BlockSpec((tm, tn), lambda i, j, k: (i, j)),
        scratch_shapes=scratch_shapes,
        compiler_params=pltpu.CompilerParams(
            dimension_semantics=("parallel", "parallel", "arbitrary"),
            vmem_limit_bytes=vmem_limit),
    )(*operands)

    if Mp != M or Np != N:
        out = out[:M, :N]
    return out


def _attn_kernel(x_ref, w_ref, b_ref, o_ref, *, n_heads):
    """Fused QKV projection + per-batch multi-head attention.

    The 1/sqrt(head_dim) softmax scale is pre-folded into the Q columns of
    w_ref / b_ref (parameter-prep transform), so no per-element scaling here.
    """
    D = o_ref.shape[-1]
    hd = D // n_heads
    x = x_ref[0].astype(jnp.bfloat16)                               # (S, D)
    qkv = jnp.dot(x, w_ref[...], preferred_element_type=jnp.float32)
    qkv = (qkv + b_ref[...]).astype(jnp.bfloat16)                   # (S, 3D)
    for h in range(n_heads):
        q = qkv[:, h * hd:(h + 1) * hd]                             # (S, hd)
        k = qkv[:, D + h * hd:D + (h + 1) * hd]
        v = qkv[:, 2 * D + h * hd:2 * D + (h + 1) * hd]
        # scores: contract hd directly, no explicit transpose
        s = jax.lax.dot_general(q, k, (((1,), (1,)), ((), ())),
                                preferred_element_type=jnp.float32)  # (S, S)
        s = s - jnp.max(s, axis=-1, keepdims=True)
        p = jnp.exp(s)
        l = jnp.sum(p, axis=-1, keepdims=True)
        o_h = jax.lax.dot_general(p.astype(jnp.bfloat16), v, (((1,), (0,)), ((), ())),
                                  preferred_element_type=jnp.float32)  # (S, hd)
        r = pl.reciprocal(l, approx=True)
        r = r * (2.0 - l * r)                 # one Newton step -> near-exact 1/l
        # write each head directly into its output columns (no concat)
        o_ref[0, :, h * hd:(h + 1) * hd] = (o_h * r).astype(o_ref.dtype)
    # TODO(synk): for large S, tile the KV axis flash-style instead of full-row softmax.


def pallas_attention(x, wqkv, bqkv, n_heads):
    """x: (B, S, D); wqkv: (D, 3D) packed [q | k | v] (Q columns pre-scaled).
    Returns (B, S, D) bf16 with heads concatenated."""
    B, S, D = x.shape
    wc = wqkv.astype(jnp.bfloat16)
    bq = bqkv.astype(jnp.float32).reshape(1, 3 * D)
    kernel = functools.partial(_attn_kernel, n_heads=n_heads)
    return pl.pallas_call(
        kernel,
        grid=(B,),
        out_shape=jax.ShapeDtypeStruct((B, S, D), jnp.bfloat16),
        in_specs=[pl.BlockSpec((1, S, D), lambda b: (b, 0, 0)),
                  pl.BlockSpec((D, 3 * D), lambda b: (0, 0)),
                  pl.BlockSpec((1, 3 * D), lambda b: (0, 0))],
        out_specs=pl.BlockSpec((1, S, D), lambda b: (b, 0, 0)),
        compiler_params=pltpu.CompilerParams(dimension_semantics=("parallel",)),
    )(x, wc, bq)


# ----------------------------------------------------------------------------
# Model glue (layout conversion / im2col / parameter bookkeeping in plain JAX)
# ----------------------------------------------------------------------------

def bn_fold(bn, eps=1e-5):
    scale = bn["gamma"] * jax.lax.rsqrt(bn["var"] + eps)
    shift = bn["beta"] - bn["mean"] * scale
    return scale, shift


def nchw_to_flat(x_nchw):
    B, C, H, W = x_nchw.shape
    return x_nchw.transpose(0, 2, 3, 1).reshape(B * H * W, C)


def flat_to_nchw(x_flat, B, H, W, C):
    return x_flat.reshape(B, H, W, C).transpose(0, 3, 1, 2)


def _im2col_nhwc(x_flat, B, H, W, C, kh, kw, stride, padding):
    # TODO(synk): patches are still materialized in HBM (now consumed as bf16, unpadded);
    #             fusing the 3x3 taps into the matmul K loop is left for a future revision.
    x = x_flat.reshape(B, H, W, C)
    xp = jnp.pad(x, ((0, 0), (padding, padding), (padding, padding), (0, 0)))
    Ho = (H + 2 * padding - kh) // stride + 1
    Wo = (W + 2 * padding - kw) // stride + 1
    cols = [xp[:, ki:ki + stride * Ho:stride, kj:kj + stride * Wo:stride, :]
            for ki in range(kh) for kj in range(kw)]
    patches = jnp.concatenate(cols, axis=-1)           # (B, Ho, Wo, kh*kw*C)
    return patches.reshape(B * Ho * Wo, kh * kw * C), Ho, Wo


def conv2d_flat(x_flat, B, H, W, C, weight, bias=None, stride=1, padding=0,
                scale=None, shift=None, activation=None, residual=None,
                out_dtype=jnp.float32):
    """Conv on a flattened-NHWC input via im2col + fused Pallas matmul.
    Returns ((B*Ho*Wo, Cout), Ho, Wo)."""
    Cout, Cin, kh, kw = weight.shape
    assert Cin == C
    if kh == 1 and kw == 1 and padding == 0:
        if stride != 1:
            x4 = x_flat.reshape(B, H, W, C)[:, ::stride, ::stride, :]
            Ho, Wo = x4.shape[1], x4.shape[2]
            patches = x4.reshape(B * Ho * Wo, C)
        else:
            patches, Ho, Wo = x_flat, H, W
        w_mat = weight.reshape(Cout, Cin).T
    else:
        patches, Ho, Wo = _im2col_nhwc(x_flat, B, H, W, C, kh, kw, stride, padding)
        w_mat = weight.transpose(2, 3, 1, 0).reshape(kh * kw * Cin, Cout)
    y = pallas_matmul(patches, w_mat, bias=bias, scale=scale, shift=shift,
                      activation=activation, residual=residual, out_dtype=out_dtype)
    return y, Ho, Wo


def basic_block_forward(x_nchw, p, stride, padding):
    """relu(bn2(conv2(relu(bn1(conv1(x))))) + shortcut); shortcut add fused into conv2.
    conv1 and the 1x1 shortcut conv share the same im2col patches and run as one matmul."""
    B, Cin, H, W = x_nchw.shape
    x_flat = nchw_to_flat(x_nchw)
    Cout = p["conv1_w"].shape[0]
    s1, t1 = bn_fold(p["bn1"])
    has_short = "short_w" in p
    kh, kw = p["conv1_w"].shape[2], p["conv1_w"].shape[3]
    can_fuse_short = (has_short and kh == 3 and kw == 3 and padding == 1
                      and p["short_w"].shape[2] == 1 and p["short_w"].shape[3] == 1)

    if can_fuse_short:
        # conv1 + shortcut over shared patches; shortcut weight lives on the center tap.
        patches, Ho, Wo = _im2col_nhwc(x_flat, B, H, W, Cin, 3, 3, stride, padding)
        w1_mat = p["conv1_w"].transpose(2, 3, 1, 0).reshape(9 * Cin, Cout)
        ws = jnp.zeros((9 * Cin, Cout), jnp.float32)
        center = 4 * Cin                                  # tap (ki=1, kj=1)
        ws = ws.at[center:center + Cin, :].set(p["short_w"].reshape(Cout, Cin).T)
        w_comb = jnp.concatenate([w1_mat, ws], axis=1)    # (9*Cin, 2*Cout)
        ss, ts = bn_fold(p["bn_s"])
        scale = jnp.concatenate([s1, ss])
        shift = jnp.concatenate([t1, ts])
        bias = None
        if p.get("conv1_b") is not None:
            bias = jnp.concatenate([p["conv1_b"], jnp.zeros((Cout,), jnp.float32)])
        # per-column ReLU floor: 0 for conv1 columns, -inf (identity) for shortcut columns
        floor = jnp.concatenate([jnp.zeros((Cout,), jnp.float32),
                                 jnp.full((Cout,), -jnp.inf, jnp.float32)])
        fused = pallas_matmul(patches, w_comb, bias=bias, scale=scale, shift=shift,
                              act_floor=floor)
        out1 = fused[:, :Cout]
        shortcut = fused[:, Cout:]
    else:
        out1, Ho, Wo = conv2d_flat(x_flat, B, H, W, Cin, p["conv1_w"], p.get("conv1_b"),
                                   stride, padding, s1, t1, "relu")
        if has_short:
            ss, ts = bn_fold(p["bn_s"])
            shortcut, _, _ = conv2d_flat(x_flat, B, H, W, Cin, p["short_w"], None,
                                         stride, 0, ss, ts, None)
        else:
            shortcut = x_flat                             # identity (Cin==Cout, stride==1)

    s2, t2 = bn_fold(p["bn2"])
    out2, Ho2, Wo2 = conv2d_flat(out1, B, Ho, Wo, Cout, p["conv2_w"], p.get("conv2_b"),
                                 1, padding, s2, t2, "relu", residual=shortcut)
    return flat_to_nchw(out2, B, Ho2, Wo2, Cout)


def transformer_layer_forward(x, p, n_heads):
    """Post-LN encoder layer; QKV projection fused into the attention kernel,
    residual-add + LayerNorm fused into the matmul epilogues."""
    B, N, D = x.shape
    x2 = x.reshape(B * N, D)

    attn = pallas_attention(x, p["wqkv"], p["bqkv"], n_heads)       # (B, N, D) bf16

    # out-projection + residual + post-LN #1 (fused epilogue)
    x1 = pallas_matmul(attn.reshape(B * N, D), p["wo"], bias=p["bo"],
                       residual=x2, ln_gamma=p["ln1_g"], ln_beta=p["ln1_b"])

    # FFN: relu(x1 @ w1 + b1) @ w2 + b2, then residual + post-LN #2 (fused)
    ff = pallas_matmul(x1, p["w1"], bias=p["b1"], activation="relu",
                       out_dtype=jnp.bfloat16)
    x_out = pallas_matmul(ff, p["w2"], bias=p["b2"],
                          residual=x1, ln_gamma=p["ln2_g"], ln_beta=p["ln2_b"])
    return x_out.reshape(B, N, D)


def trans_encoder_block_forward(x, params, patch_p, n_heads, stride, padding):
    x = basic_block_forward(x, params["resnet"], stride, padding)
    resO = x
    b, c, h, w = x.shape
    xt = x.reshape(b, c * patch_p, h * w // patch_p).transpose(0, 2, 1)   # (B, N, D)
    for lp in params["transformer"]:
        xt = transformer_layer_forward(xt, lp, n_heads)
    tranO = xt
    x = xt.transpose(0, 2, 1).reshape(b, c, h, w)
    # Downsample: 3x3 conv, stride 2, pad 1 (channels preserved)
    x_flat = nchw_to_flat(x)
    y, Ho, Wo = conv2d_flat(x_flat, b, h, w, c, params["down_w"], params["down_b"],
                            stride=2, padding=1)
    x = flat_to_nchw(y, b, Ho, Wo, c)
    return x, resO, tranO


def trans_encoder_forward(params, x, p_list, n_heads, stride, padding):
    skips = []
    for i, block in enumerate(params):
        x, resO, tranO = trans_encoder_block_forward(
            x, block, p_list[i], n_heads, stride, padding)
        skips.append((resO, tranO))
    return x, skips


# ----------------------------------------------------------------------------
# Deterministic parameter init
# ----------------------------------------------------------------------------

def _winit(key, shape, scale=0.05):
    return scale * jax.random.normal(key, shape, jnp.float32)


def _bn_init(key, c):
    k1, k2 = jax.random.split(key)
    return {
        "gamma": 1.0 + 0.1 * jax.random.normal(k1, (c,), jnp.float32),
        "beta": 0.1 * jax.random.normal(k2, (c,), jnp.float32),
        "mean": jnp.zeros((c,), jnp.float32),
        "var": jnp.ones((c,), jnp.float32),
    }


def init_params(key, in_channels, out_channels, patch_dim, n_heads,
                stride, padding, resnet_bias, dim_ff, t_layers, num_layers):
    assert len(in_channels) == num_layers and len(out_channels) == num_layers
    params, p_list = [], []
    for i in range(num_layers):
        p_dim = patch_dim // (2 ** i) if 2 ** i <= patch_dim else 1
        p = p_dim * p_dim
        p_list.append(p)
        cin, cout = in_channels[i], out_channels[i]
        d_model = p * cout
        assert d_model % n_heads == 0
        key, *ks = jax.random.split(key, 9)
        rn = {
            "conv1_w": _winit(ks[0], (cout, cin, 3, 3)),
            "bn1": _bn_init(ks[1], cout),
            "conv2_w": _winit(ks[2], (cout, cout, 3, 3)),
            "bn2": _bn_init(ks[3], cout),
        }
        if resnet_bias:
            key, kb1, kb2 = jax.random.split(key, 3)
            rn["conv1_b"] = _winit(kb1, (cout,))
            rn["conv2_b"] = _winit(kb2, (cout,))
        if cin != cout or stride != 1:
            rn["short_w"] = _winit(ks[4], (cout, cin, 1, 1))
            rn["bn_s"] = _bn_init(ks[5], cout)
        hd = d_model // n_heads
        qscale = 1.0 / math.sqrt(hd)
        tls = []
        for _ in range(t_layers):
            key, *kt = jax.random.split(key, 7)
            wqkv = _winit(kt[0], (d_model, 3 * d_model))
            bqkv = jnp.zeros((3 * d_model,), jnp.float32)
            # Pre-fold the 1/sqrt(head_dim) softmax scale into the Q projection
            # (weight-prep transform; forward-pass equivalent to scaling q in-kernel).
            wqkv = wqkv.at[:, :d_model].multiply(qscale)
            bqkv = bqkv.at[:d_model].multiply(qscale)
            tls.append({
                "wqkv": wqkv,
                "bqkv": bqkv,
                "wo": _winit(kt[1], (d_model, d_model)),
                "bo": jnp.zeros((d_model,), jnp.float32),
                "ln1_g": jnp.ones((d_model,), jnp.float32),
                "ln1_b": jnp.zeros((d_model,), jnp.float32),
                "w1": _winit(kt[2], (d_model, dim_ff)),
                "b1": _winit(kt[3], (dim_ff,)),
                "w2": _winit(kt[4], (dim_ff, d_model)),
                "b2": _winit(kt[5], (d_model,)),
                "ln2_g": jnp.ones((d_model,), jnp.float32),
                "ln2_b": jnp.zeros((d_model,), jnp.float32),
            })
        params.append({
            "resnet": rn,
            "transformer": tls,
            "down_w": _winit(ks[6], (cout, cout, 3, 3)),
            "down_b": _winit(ks[7], (cout,)),
        })
    return params, p_list


# ----------------------------------------------------------------------------
# Main
# ----------------------------------------------------------------------------

if __name__ == "__main__":
    key = jax.random.PRNGKey(0)
    # Small config: TransEncoder(in_channels=[4], out_channels=[8], patch_dim=4,
    #                            n_heads=4, stride=1, padding=1, resnet_bias=False,
    #                            dim_ff=64, t_layers=1, num_layers=1)
    in_channels = [4]
    out_channels = [8]
    patch_dim = 4
    n_heads = 4
    stride, padding = 1, 1
    resnet_bias = False
    dim_ff = 64
    t_layers = 1
    num_layers = 1

    pkey, xkey = jax.random.split(key)
    params, p_list = init_params(pkey, in_channels, out_channels, patch_dim, n_heads,
                                 stride, padding, resnet_bias, dim_ff, t_layers,
                                 num_layers)
    x = jax.random.normal(xkey, (2, 4, 16, 16), jnp.float32)  # NCHW

    @jax.jit
    def forward(params, x):
        return trans_encoder_forward(params, x, p_list, n_heads, stride, padding)

    out, skips = forward(params, x)
    jax.block_until_ready(out)
    for resO, tranO in skips:
        jax.block_until_ready(resO)
        jax.block_until_ready(tranO)

    assert out.shape == (2, 8, 8, 8)
    assert skips[0][0].shape == (2, 8, 16, 16)
    assert skips[0][1].shape == (2, 16, 128)
    print("KERNEL_OK")
</pallas_src>

<mosaic_0001>
module attributes {stable_mosaic.version = 11 : i64} {
  func.func @_mm_kernel(%arg0: i32, %arg1: i32, %arg2: i32, %arg3: memref<256x36xbf16, #tpu.memory_space<vmem>>, %arg4: memref<36x16xbf16, #tpu.memory_space<vmem>>, %arg5: memref<1x16xf32, #tpu.memory_space<vmem>>, %arg6: memref<1x16xf32, #tpu.memory_space<vmem>>, %arg7: memref<1x16xf32, #tpu.memory_space<vmem>>, %arg8: memref<256x16xf32, #tpu.memory_space<vmem>>) attributes {dimension_semantics = [#tpu.dimension_semantics<parallel>, #tpu.dimension_semantics<parallel>, #tpu.dimension_semantics<arbitrary>], iteration_bounds = array<i64: 2, 1, 1>, scalar_prefetch = 0 : i64, scratch_operands = 0 : i64, tpu.core_type = #tpu.core_type<tc>, window_params = [{transform_indices = @transform_0, window_bounds = array<i64: 256, 36>}, {transform_indices = @transform_1, window_bounds = array<i64: 36, 16>}, {transform_indices = @transform_2, window_bounds = array<i64: 1, 16>}, {transform_indices = @transform_3, window_bounds = array<i64: 1, 16>}, {transform_indices = @transform_4, window_bounds = array<i64: 1, 16>}, {transform_indices = @transform_5, window_bounds = array<i64: 256, 16>}]} {
    %c0_i32 = arith.constant 0 : i32
    %0 = arith.cmpi eq, %arg2, %c0_i32 : i32
    %1 = arith.extui %0 : i1 to i32
    %c0_i32_0 = arith.constant 0 : i32
    %2 = arith.cmpi ne, %1, %c0_i32_0 : i32
    scf.if %2 {
      %cst_10 = arith.constant 0.000000e+00 : f32
      %12 = vector.broadcast %cst_10 : f32 to vector<256x16xf32>
      %c0_11 = arith.constant 0 : index
      %c0_12 = arith.constant 0 : index
      %13 = vector.load %arg8[%c0_11, %c0_12] : memref<256x16xf32, #tpu.memory_space<vmem>>, vector<256x16xf32>
      tpu.vector_store %arg8[%c0_11, %c0_12], %12 {strides = array<i32>} : memref<256x16xf32, #tpu.memory_space<vmem>>, vector<256x16xf32>,
    } else {
    }
    %c0 = arith.constant 0 : index
    %c0_1 = arith.constant 0 : index
    %3 = vector.load %arg8[%c0, %c0_1] : memref<256x16xf32, #tpu.memory_space<vmem>>, vector<256x16xf32>
    %c0_2 = arith.constant 0 : index
    %c0_3 = arith.constant 0 : index
    %4 = vector.load %arg3[%c0_2, %c0_3] : memref<256x36xbf16, #tpu.memory_space<vmem>>, vector<256x36xbf16>
    %c0_4 = arith.constant 0 : index
    %c0_5 = arith.constant 0 : index
    %5 = vector.load %arg4[%c0_4, %c0_5] : memref<36x16xbf16, #tpu.memory_space<vmem>>, vector<36x16xbf16>
    %cst = arith.constant dense<0.000000e+00> : vector<256x16xf32>
    %6 = tpu.matmul %4, %5, %cst {dimension_numbers = #tpu.dot_dimension_numbers<[1], [0], [0], [1], [0, 0, 1, 1], [], []>} : vector<256x36xbf16>, vector<36x16xbf16>, vector<256x16xf32> -> vector<256x16xf32>
    %7 = arith.addf %3, %6 : vector<256x16xf32>
    %c0_6 = arith.constant 0 : index
    %c0_7 = arith.constant 0 : index
    %8 = vector.load %arg8[%c0_6, %c0_7] : memref<256x16xf32, #tpu.memory_space<vmem>>, vector<256x16xf32>
    tpu.vector_store %arg8[%c0_6, %c0_7], %7 {strides = array<i32>} : memref<256x16xf32, #tpu.memory_space<vmem>>, vector<256x16xf32>,
    %c0_i32_8 = arith.constant 0 : i32
    %9 = arith.cmpi eq, %arg2, %c0_i32_8 : i32
    %10 = arith.extui %9 : i1 to i32
    %c0_i32_9 = arith.constant 0 : i32
    %11 = arith.cmpi ne, %10, %c0_i32_9 : i32
    scf.if %11 {
      %c0_10 = arith.constant 0 : index
      %c0_11 = arith.constant 0 : index
      %12 = vector.load %arg8[%c0_10, %c0_11] : memref<256x16xf32, #tpu.memory_space<vmem>>, vector<256x16xf32>
      %c0_12 = arith.constant 0 : index
      %c0_13 = arith.constant 0 : index
      %13 = vector.load %arg5[%c0_12, %c0_13] : memref<1x16xf32, #tpu.memory_space<vmem>>, vector<1x16xf32>
      %14 = vector.broadcast %13 : vector<1x16xf32> to vector<256x16xf32>
      %15 = arith.mulf %12, %14 : vector<256x16xf32>
      %c0_14 = arith.constant 0 : index
      %c0_15 = arith.constant 0 : index
      %16 = vector.load %arg6[%c0_14, %c0_15] : memref<1x16xf32, #tpu.memory_space<vmem>>, vector<1x16xf32>
      %17 = vector.broadcast %16 : vector<1x16xf32> to vector<256x16xf32>
      %18 = arith.addf %15, %17 : vector<256x16xf32>
      %c0_16 = arith.constant 0 : index
      %c0_17 = arith.constant 0 : index
      %19 = vector.load %arg7[%c0_16, %c0_17] : memref<1x16xf32, #tpu.memory_space<vmem>>, vector<1x16xf32>
      %20 = vector.broadcast %19 : vector<1x16xf32> to vector<256x16xf32>
      %21 = arith.maximumf %18, %20 : vector<256x16xf32>
      %c0_18 = arith.constant 0 : index
      %c0_19 = arith.constant 0 : index
      %22 = vector.load %arg8[%c0_18, %c0_19] : memref<256x16xf32, #tpu.memory_space<vmem>>, vector<256x16xf32>
      tpu.vector_store %arg8[%c0_18, %c0_19], %21 {strides = array<i32>} : memref<256x16xf32, #tpu.memory_space<vmem>>, vector<256x16xf32>,
    } else {
    }
    return
  }
  func.func @transform_0(%arg0: i32, %arg1: i32, %arg2: i32) -> (i32, i32) {
    %c0_i32 = arith.constant 0 : i32
    return %arg0, %arg2 : i32, i32
  }
  func.func @transform_1(%arg0: i32, %arg1: i32, %arg2: i32) -> (i32, i32) {
    %c0_i32 = arith.constant 0 : i32
    return %arg2, %arg1 : i32, i32
  }
  func.func @transform_2(%arg0: i32, %arg1: i32, %arg2: i32) -> (i32, i32) {
    %c0_i32 = arith.constant 0 : i32
    %c0_i32_0 = arith.constant 0 : i32
    return %c0_i32, %arg1 : i32, i32
  }
  func.func @transform_3(%arg0: i32, %arg1: i32, %arg2: i32) -> (i32, i32) {
    %c0_i32 = arith.constant 0 : i32
    %c0_i32_0 = arith.constant 0 : i32
    return %c0_i32, %arg1 : i32, i32
  }
  func.func @transform_4(%arg0: i32, %arg1: i32, %arg2: i32) -> (i32, i32) {
    %c0_i32 = arith.constant 0 : i32
    %c0_i32_0 = arith.constant 0 : i32
    return %c0_i32, %arg1 : i32, i32
  }
  func.func @transform_5(%arg0: i32, %arg1: i32, %arg2: i32) -> (i32, i32) {
    %c0_i32 = arith.constant 0 : i32
    return %arg0, %arg1 : i32, i32
  }
}

module attributes {stable_mosaic.version = 11 : i64} {
  func.func @_mm_kernel(%arg0: i32, %arg1: i32, %arg2: i32, %arg3: memref<256x72xbf16, #tpu.memory_space<vmem>>, %arg4: memref<72x8xbf16, #tpu.memory_space<vmem>>, %arg5: memref<1x8xf32, #tpu.memory_space<vmem>>, %arg6: memref<1x8xf32, #tpu.memory_space<vmem>>, %arg7: memref<256x8xf32, #tpu.memory_space<vmem>>, %arg8: memref<256x8xf32, #tpu.memory_space<vmem>>) attributes {dimension_semantics = [#tpu.dimension_semantics<parallel>, #tpu.dimension_semantics<parallel>, #tpu.dimension_semantics<arbitrary>], iteration_bounds = array<i64: 2, 1, 1>, scalar_prefetch = 0 : i64, scratch_operands = 0 : i64, tpu.core_type = #tpu.core_type<tc>, window_params = [{transform_indices = @transform_0, window_bounds = array<i64: 256, 72>}, {transform_indices = @transform_1, window_bounds = array<i64: 72, 8>}, {transform_indices = @transform_2, window_bounds = array<i64: 1, 8>}, {transform_indices = @transform_3, window_bounds = array<i64: 1, 8>}, {transform_indices = @transform_4, window_bounds = array<i64: 256, 8>}, {transform_indices = @transform_5, window_bounds = array<i64: 256, 8>}]} {
    %c0_i32 = arith.constant 0 : i32
    %0 = arith.cmpi eq, %arg2, %c0_i32 : i32
    %1 = arith.extui %0 : i1 to i32
    %c0_i32_0 = arith.constant 0 : i32
    %2 = arith.cmpi ne, %1, %c0_i32_0 : i32
    scf.if %2 {
      %cst_10 = arith.constant 0.000000e+00 : f32
      %12 = vector.broadcast %cst_10 : f32 to vector<256x8xf32>
      %c0_11 = arith.constant 0 : index
      %c0_12 = arith.constant 0 : index
      %13 = vector.load %arg8[%c0_11, %c0_12] : memref<256x8xf32, #tpu.memory_space<vmem>>, vector<256x8xf32>
      tpu.vector_store %arg8[%c0_11, %c0_12], %12 {strides = array<i32>} : memref<256x8xf32, #tpu.memory_space<vmem>>, vector<256x8xf32>,
    } else {
    }
    %c0 = arith.constant 0 : index
    %c0_1 = arith.constant 0 : index
    %3 = vector.load %arg8[%c0, %c0_1] : memref<256x8xf32, #tpu.memory_space<vmem>>, vector<256x8xf32>
    %c0_2 = arith.constant 0 : index
    %c0_3 = arith.constant 0 : index
    %4 = vector.load %arg3[%c0_2, %c0_3] : memref<256x72xbf16, #tpu.memory_space<vmem>>, vector<256x72xbf16>
    %c0_4 = arith.constant 0 : index
    %c0_5 = arith.constant 0 : index
    %5 = vector.load %arg4[%c0_4, %c0_5] : memref<72x8xbf16, #tpu.memory_space<vmem>>, vector<72x8xbf16>
    %cst = arith.constant dense<0.000000e+00> : vector<256x8xf32>
    %6 = tpu.matmul %4, %5, %cst {dimension_numbers = #tpu.dot_dimension_numbers<[1], [0], [0], [1], [0, 0, 1, 1], [], []>} : vector<256x72xbf16>, vector<72x8xbf16>, vector<256x8xf32> -> vector<256x8xf32>
    %7 = arith.addf %3, %6 : vector<256x8xf32>
    %c0_6 = arith.constant 0 : index
    %c0_7 = arith.constant 0 : index
    %8 = vector.load %arg8[%c0_6, %c0_7] : memref<256x8xf32, #tpu.memory_space<vmem>>, vector<256x8xf32>
    tpu.vector_store %arg8[%c0_6, %c0_7], %7 {strides = array<i32>} : memref<256x8xf32, #tpu.memory_space<vmem>>, vector<256x8xf32>,
    %c0_i32_8 = arith.constant 0 : i32
    %9 = arith.cmpi eq, %arg2, %c0_i32_8 : i32
    %10 = arith.extui %9 : i1 to i32
    %c0_i32_9 = arith.constant 0 : i32
    %11 = arith.cmpi ne, %10, %c0_i32_9 : i32
    scf.if %11 {
      %c0_10 = arith.constant 0 : index
      %c0_11 = arith.constant 0 : index
      %12 = vector.load %arg8[%c0_10, %c0_11] : memref<256x8xf32, #tpu.memory_space<vmem>>, vector<256x8xf32>
      %c0_12 = arith.constant 0 : index
      %c0_13 = arith.constant 0 : index
      %13 = vector.load %arg5[%c0_12, %c0_13] : memref<1x8xf32, #tpu.memory_space<vmem>>, vector<1x8xf32>
      %14 = vector.broadcast %13 : vector<1x8xf32> to vector<256x8xf32>
      %15 = arith.mulf %12, %14 : vector<256x8xf32>
      %c0_14 = arith.constant 0 : index
      %c0_15 = arith.constant 0 : index
      %16 = vector.load %arg6[%c0_14, %c0_15] : memref<1x8xf32, #tpu.memory_space<vmem>>, vector<1x8xf32>
      %17 = vector.broadcast %16 : vector<1x8xf32> to vector<256x8xf32>
      %18 = arith.addf %15, %17 : vector<256x8xf32>
      %c0_16 = arith.constant 0 : index
      %c0_17 = arith.constant 0 : index
      %19 = vector.load %arg7[%c0_16, %c0_17] : memref<256x8xf32, #tpu.memory_space<vmem>>, vector<256x8xf32>
      %20 = arith.addf %18, %19 : vector<256x8xf32>
      %cst_18 = arith.constant 0.000000e+00 : f32
      %21 = vector.broadcast %cst_18 : f32 to vector<256x8xf32>
      %22 = arith.maximumf %20, %21 : vector<256x8xf32>
      %c0_19 = arith.constant 0 : index
      %c0_20 = arith.constant 0 : index
      %23 = vector.load %arg8[%c0_19, %c0_20] : memref<256x8xf32, #tpu.memory_space<vmem>>, vector<256x8xf32>
      tpu.vector_store %arg8[%c0_19, %c0_20], %22 {strides = array<i32>} : memref<256x8xf32, #tpu.memory_space<vmem>>, vector<256x8xf32>,
    } else {
    }
    return
  }
  func.func @transform_0(%arg0: i32, %arg1: i32, %arg2: i32) -> (i32, i32) {
    %c0_i32 = arith.constant 0 : i32
    return %arg0, %arg2 : i32, i32
  }
  func.func @transform_1(%arg0: i32, %arg1: i32, %arg2: i32) -> (i32, i32) {
    %c0_i32 = arith.constant 0 : i32
    return %arg2, %arg1 : i32, i32
  }
  func.func @transform_2(%arg0: i32, %arg1: i32, %arg2: i32) -> (i32, i32) {
    %c0_i32 = arith.constant 0 : i32
    %c0_i32_0 = arith.constant 0 : i32
    return %c0_i32, %arg1 : i32, i32
  }
  func.func @transform_3(%arg0: i32, %arg1: i32, %arg2: i32) -> (i32, i32) {
    %c0_i32 = arith.constant 0 : i32
    %c0_i32_0 = arith.constant 0 : i32
    return %c0_i32, %arg1 : i32, i32
  }
  func.func @transform_4(%arg0: i32, %arg1: i32, %arg2: i32) -> (i32, i32) {
    %c0_i32 = arith.constant 0 : i32
    return %arg0, %arg1 : i32, i32
  }
  func.func @transform_5(%arg0: i32, %arg1: i32, %arg2: i32) -> (i32, i32) {
    %c0_i32 = arith.constant 0 : i32
    return %arg0, %arg1 : i32, i32
  }
}

module attributes {stable_mosaic.version = 11 : i64} {
  func.func @_attn_kernel(%arg0: i32, %arg1: memref<1x16x128xf32, #tpu.memory_space<vmem>>, %arg2: memref<128x384xbf16, #tpu.memory_space<vmem>>, %arg3: memref<1x384xf32, #tpu.memory_space<vmem>>, %arg4: memref<1x16x128xbf16, #tpu.memory_space<vmem>>) attributes {dimension_semantics = [#tpu.dimension_semantics<parallel>], iteration_bounds = array<i64: 2>, scalar_prefetch = 0 : i64, scratch_operands = 0 : i64, tpu.core_type = #tpu.core_type<tc>, window_params = [{transform_indices = @transform_0, window_bounds = array<i64: 1, 16, 128>}, {pipeline_mode = #tpu.pipeline_mode<synchronous>, transform_indices = @transform_1, window_bounds = array<i64: 128, 384>}, {pipeline_mode = #tpu.pipeline_mode<synchronous>, transform_indices = @transform_2, window_bounds = array<i64: 1, 384>}, {transform_indices = @transform_3, window_bounds = array<i64: 1, 16, 128>}]} {
    %c0 = arith.constant 0 : index
    %c0_0 = arith.constant 0 : index
    %c0_1 = arith.constant 0 : index
    %0 = vector.load %arg1[%c0, %c0_0, %c0_1] : memref<1x16x128xf32, #tpu.memory_space<vmem>>, vector<1x16x128xf32>
    %1 = vector.shape_cast %0 : vector<1x16x128xf32> to vector<16x128xf32>
    %2 = arith.truncf %1 : vector<16x128xf32> to vector<16x128xbf16>
    %c0_2 = arith.constant 0 : index
    %c0_3 = arith.constant 0 : index
    %3 = vector.load %arg2[%c0_2, %c0_3] : memref<128x384xbf16, #tpu.memory_space<vmem>>, vector<128x384xbf16>
    %cst = arith.constant dense<0.000000e+00> : vector<16x384xf32>
    %4 = tpu.matmul %2, %3, %cst {dimension_numbers = #tpu.dot_dimension_numbers<[1], [0], [0], [1], [0, 0, 1, 1], [], []>} : vector<16x128xbf16>, vector<128x384xbf16>, vector<16x384xf32> -> vector<16x384xf32>
    %c0_4 = arith.constant 0 : index
    %c0_5 = arith.constant 0 : index
    %5 = vector.load %arg3[%c0_4, %c0_5] : memref<1x384xf32, #tpu.memory_space<vmem>>, vector<1x384xf32>
    %6 = vector.broadcast %5 : vector<1x384xf32> to vector<16x384xf32>
    %7 = arith.addf %4, %6 : vector<16x384xf32>
    %8 = arith.truncf %7 : vector<16x384xf32> to vector<16x384xbf16>
    %9 = vector.extract_strided_slice %8 {offsets = [0, 0], sizes = [16, 32], strides = [1, 1]} : vector<16x384xbf16> to vector<16x32xbf16>
    %10 = vector.extract_strided_slice %8 {offsets = [0, 128], sizes = [16, 32], strides = [1, 1]} : vector<16x384xbf16> to vector<16x32xbf16>
    %11 = vector.extract_strided_slice %8 {offsets = [0, 256], sizes = [16, 32], strides = [1, 1]} : vector<16x384xbf16> to vector<16x32xbf16>
    %cst_6 = arith.constant dense<0.000000e+00> : vector<16x16xf32>
    %12 = tpu.matmul %9, %10, %cst_6 {dimension_numbers = #tpu.dot_dimension_numbers<[1], [1], [0], [0], [0, 0, 1, 0], [], []>} : vector<16x32xbf16>, vector<16x32xbf16>, vector<16x16xf32> -> vector<16x16xf32>
    %cst_7 = arith.constant dense<0xFF800000> : vector<16xf32>
    %13 = vector.multi_reduction <maximumf>, %12, %cst_7 [1] : vector<16x16xf32> to vector<16xf32>
    %14 = vector.shape_cast %13 : vector<16xf32> to vector<16x1xf32>
    %15 = vector.broadcast %14 : vector<16x1xf32> to vector<16x16xf32>
    %16 = arith.subf %12, %15 : vector<16x16xf32>
    %17 = math.exp %16 : vector<16x16xf32>
    %cst_8 = arith.constant dense<0.000000e+00> : vector<16xf32>
    %18 = vector.multi_reduction <add>, %17, %cst_8 [1] : vector<16x16xf32> to vector<16xf32>
    %19 = vector.shape_cast %18 : vector<16xf32> to vector<16x1xf32>
    %20 = arith.truncf %17 : vector<16x16xf32> to vector<16x16xbf16>
    %cst_9 = arith.constant dense<0.000000e+00> : vector<16x32xf32>
    %21 = tpu.matmul %20, %11, %cst_9 {dimension_numbers = #tpu.dot_dimension_numbers<[1], [0], [0], [1], [0, 0, 1, 1], [], []>} : vector<16x16xbf16>, vector<16x32xbf16>, vector<16x32xf32> -> vector<16x32xf32>
    %22 = tpu.reciprocal %19 {approx = true} : vector<16x1xf32> -> vector<16x1xf32>
    %23 = arith.mulf %19, %22 : vector<16x1xf32>
    %cst_10 = arith.constant 2.000000e+00 : f32
    %24 = vector.broadcast %cst_10 : f32 to vector<16x1xf32>
    %25 = arith.subf %24, %23 : vector<16x1xf32>
    %26 = arith.mulf %22, %25 : vector<16x1xf32>
    %27 = vector.broadcast %26 : vector<16x1xf32> to vector<16x32xf32>
    %28 = arith.mulf %21, %27 : vector<16x32xf32>
    %29 = arith.truncf %28 : vector<16x32xf32> to vector<16x32xbf16>
    %c0_11 = arith.constant 0 : index
    %c0_12 = arith.constant 0 : index
    %c0_13 = arith.constant 0 : index
    %30 = vector.load %arg4[%c0_11, %c0_12, %c0_13] : memref<1x16x128xbf16, #tpu.memory_space<vmem>>, vector<1x16x32xbf16>
    %31 = vector.shape_cast %30 : vector<1x16x32xbf16> to vector<16x32xbf16>
    %32 = vector.shape_cast %29 : vector<16x32xbf16> to vector<1x16x32xbf16>
    tpu.vector_store %arg4[%c0_11, %c0_12, %c0_13], %32 {strides = array<i32>} : memref<1x16x128xbf16, #tpu.memory_space<vmem>>, vector<1x16x32xbf16>,
    %33 = vector.extract_strided_slice %8 {offsets = [0, 32], sizes = [16, 32], strides = [1, 1]} : vector<16x384xbf16> to vector<16x32xbf16>
    %34 = vector.extract_strided_slice %8 {offsets = [0, 160], sizes = [16, 32], strides = [1, 1]} : vector<16x384xbf16> to vector<16x32xbf16>
    %35 = vector.extract_strided_slice %8 {offsets = [0, 288], sizes = [16, 32], strides = [1, 1]} : vector<16x384xbf16> to vector<16x32xbf16>
    %cst_14 = arith.constant dense<0.000000e+00> : vector<16x16xf32>
    %36 = tpu.matmul %33, %34, %cst_14 {dimension_numbers = #tpu.dot_dimension_numbers<[1], [1], [0], [0], [0, 0, 1, 0], [], []>} : vector<16x32xbf16>, vector<16x32xbf16>, vector<16x16xf32> -> vector<16x16xf32>
    %cst_15 = arith.constant dense<0xFF800000> : vector<16xf32>
    %37 = vector.multi_reduction <maximumf>, %36, %cst_15 [1] : vector<16x16xf32> to vector<16xf32>
    %38 = vector.shape_cast %37 : vector<16xf32> to vector<16x1xf32>
    %39 = vector.broadcast %38 : vector<16x1xf32> to vector<16x16xf32>
    %40 = arith.subf %36, %39 : vector<16x16xf32>
    %41 = math.exp %40 : vector<16x16xf32>
    %cst_16 = arith.constant dense<0.000000e+00> : vector<16xf32>
    %42 = vector.multi_reduction <add>, %41, %cst_16 [1] : vector<16x16xf32> to vector<16xf32>
    %43 = vector.shape_cast %42 : vector<16xf32> to vector<16x1xf32>
    %44 = arith.truncf %41 : vector<16x16xf32> to vector<16x16xbf16>
    %cst_17 = arith.constant dense<0.000000e+00> : vector<16x32xf32>
    %45 = tpu.matmul %44, %35, %cst_17 {dimension_numbers = #tpu.dot_dimension_numbers<[1], [0], [0], [1], [0, 0, 1, 1], [], []>} : vector<16x16xbf16>, vector<16x32xbf16>, vector<16x32xf32> -> vector<16x32xf32>
    %46 = tpu.reciprocal %43 {approx = true} : vector<16x1xf32> -> vector<16x1xf32>
    %47 = arith.mulf %43, %46 : vector<16x1xf32>
    %cst_18 = arith.constant 2.000000e+00 : f32
    %48 = vector.broadcast %cst_18 : f32 to vector<16x1xf32>
    %49 = arith.subf %48, %47 : vector<16x1xf32>
    %50 = arith.mulf %46, %49 : vector<16x1xf32>
    %51 = vector.broadcast %50 : vector<16x1xf32> to vector<16x32xf32>
    %52 = arith.mulf %45, %51 : vector<16x32xf32>
    %53 = arith.truncf %52 : vector<16x32xf32> to vector<16x32xbf16>
    %c0_19 = arith.constant 0 : index
    %c0_20 = arith.constant 0 : index
    %c32 = arith.constant 32 : index
    %54 = vector.load %arg4[%c0_19, %c0_20, %c32] : memref<1x16x128xbf16, #tpu.memory_space<vmem>>, vector<1x16x32xbf16>
    %55 = vector.shape_cast %54 : vector<1x16x32xbf16> to vector<16x32xbf16>
    %56 = vector.shape_cast %53 : vector<16x32xbf16> to vector<1x16x32xbf16>
    tpu.vector_store %arg4[%c0_19, %c0_20, %c32], %56 {strides = array<i32>} : memref<1x16x128xbf16, #tpu.memory_space<vmem>>, vector<1x16x32xbf16>,
    %57 = vector.extract_strided_slice %8 {offsets = [0, 64], sizes = [16, 32], strides = [1, 1]} : vector<16x384xbf16> to vector<16x32xbf16>
    %58 = vector.extract_strided_slice %8 {offsets = [0, 192], sizes = [16, 32], strides = [1, 1]} : vector<16x384xbf16> to vector<16x32xbf16>
    %59 = vector.extract_strided_slice %8 {offsets = [0, 320], sizes = [16, 32], strides = [1, 1]} : vector<16x384xbf16> to vector<16x32xbf16>
    %cst_21 = arith.constant dense<0.000000e+00> : vector<16x16xf32>
    %60 = tpu.matmul %57, %58, %cst_21 {dimension_numbers = #tpu.dot_dimension_numbers<[1], [1], [0], [0], [0, 0, 1, 0], [], []>} : vector<16x32xbf16>, vector<16x32xbf16>, vector<16x16xf32> -> vector<16x16xf32>
    %cst_22 = arith.constant dense<0xFF800000> : vector<16xf32>
    %61 = vector.multi_reduction <maximumf>, %60, %cst_22 [1] : vector<16x16xf32> to vector<16xf32>
    %62 = vector.shape_cast %61 : vector<16xf32> to vector<16x1xf32>
    %63 = vector.broadcast %62 : vector<16x1xf32> to vector<16x16xf32>
    %64 = arith.subf %60, %63 : vector<16x16xf32>
    %65 = math.exp %64 : vector<16x16xf32>
    %cst_23 = arith.constant dense<0.000000e+00> : vector<16xf32>
    %66 = vector.multi_reduction <add>, %65, %cst_23 [1] : vector<16x16xf32> to vector<16xf32>
    %67 = vector.shape_cast %66 : vector<16xf32> to vector<16x1xf32>
    %68 = arith.truncf %65 : vector<16x16xf32> to vector<16x16xbf16>
    %cst_24 = arith.constant dense<0.000000e+00> : vector<16x32xf32>
    %69 = tpu.matmul %68, %59, %cst_24 {dimension_numbers = #tpu.dot_dimension_numbers<[1], [0], [0], [1], [0, 0, 1, 1], [], []>} : vector<16x16xbf16>, vector<16x32xbf16>, vector<16x32xf32> -> vector<16x32xf32>
    %70 = tpu.reciprocal %67 {approx = true} : vector<16x1xf32> -> vector<16x1xf32>
    %71 = arith.mulf %67, %70 : vector<16x1xf32>
    %cst_25 = arith.constant 2.000000e+00 : f32
    %72 = vector.broadcast %cst_25 : f32 to vector<16x1xf32>
    %73 = arith.subf %72, %71 : vector<16x1xf32>
    %74 = arith.mulf %70, %73 : vector<16x1xf32>
    %75 = vector.broadcast %74 : vector<16x1xf32> to vector<16x32xf32>
    %76 = arith.mulf %69, %75 : vector<16x32xf32>
    %77 = arith.truncf %76 : vector<16x32xf32> to vector<16x32xbf16>
    %c0_26 = arith.constant 0 : index
    %c0_27 = arith.constant 0 : index
    %c64 = arith.constant 64 : index
    %78 = vector.load %arg4[%c0_26, %c0_27, %c64] : memref<1x16x128xbf16, #tpu.memory_space<vmem>>, vector<1x16x32xbf16>
    %79 = vector.shape_cast %78 : vector<1x16x32xbf16> to vector<16x32xbf16>
    %80 = vector.shape_cast %77 : vector<16x32xbf16> to vector<1x16x32xbf16>
    tpu.vector_store %arg4[%c0_26, %c0_27, %c64], %80 {strides = array<i32>} : memref<1x16x128xbf16, #tpu.memory_space<vmem>>, vector<1x16x32xbf16>,
    %81 = vector.extract_strided_slice %8 {offsets = [0, 96], sizes = [16, 32], strides = [1, 1]} : vector<16x384xbf16> to vector<16x32xbf16>
    %82 = vector.extract_strided_slice %8 {offsets = [0, 224], sizes = [16, 32], strides = [1, 1]} : vector<16x384xbf16> to vector<16x32xbf16>
    %83 = vector.extract_strided_slice %8 {offsets = [0, 352], sizes = [16, 32], strides = [1, 1]} : vector<16x384xbf16> to vector<16x32xbf16>
    %cst_28 = arith.constant dense<0.000000e+00> : vector<16x16xf32>
    %84 = tpu.matmul %81, %82, %cst_28 {dimension_numbers = #tpu.dot_dimension_numbers<[1], [1], [0], [0], [0, 0, 1, 0], [], []>} : vector<16x32xbf16>, vector<16x32xbf16>, vector<16x16xf32> -> vector<16x16xf32>
    %cst_29 = arith.constant dense<0xFF800000> : vector<16xf32>
    %85 = vector.multi_reduction <maximumf>, %84, %cst_29 [1] : vector<16x16xf32> to vector<16xf32>
    %86 = vector.shape_cast %85 : vector<16xf32> to vector<16x1xf32>
    %87 = vector.broadcast %86 : vector<16x1xf32> to vector<16x16xf32>
    %88 = arith.subf %84, %87 : vector<16x16xf32>
    %89 = math.exp %88 : vector<16x16xf32>
    %cst_30 = arith.constant dense<0.000000e+00> : vector<16xf32>
    %90 = vector.multi_reduction <add>, %89, %cst_30 [1] : vector<16x16xf32> to vector<16xf32>
    %91 = vector.shape_cast %90 : vector<16xf32> to vector<16x1xf32>
    %92 = arith.truncf %89 : vector<16x16xf32> to vector<16x16xbf16>
    %cst_31 = arith.constant dense<0.000000e+00> : vector<16x32xf32>
    %93 = tpu.matmul %92, %83, %cst_31 {dimension_numbers = #tpu.dot_dimension_numbers<[1], [0], [0], [1], [0, 0, 1, 1], [], []>} : vector<16x16xbf16>, vector<16x32xbf16>, vector<16x32xf32> -> vector<16x32xf32>
    %94 = tpu.reciprocal %91 {approx = true} : vector<16x1xf32> -> vector<16x1xf32>
    %95 = arith.mulf %91, %94 : vector<16x1xf32>
    %cst_32 = arith.constant 2.000000e+00 : f32
    %96 = vector.broadcast %cst_32 : f32 to vector<16x1xf32>
    %97 = arith.subf %96, %95 : vector<16x1xf32>
    %98 = arith.mulf %94, %97 : vector<16x1xf32>
    %99 = vector.broadcast %98 : vector<16x1xf32> to vector<16x32xf32>
    %100 = arith.mulf %93, %99 : vector<16x32xf32>
    %101 = arith.truncf %100 : vector<16x32xf32> to vector<16x32xbf16>
    %c0_33 = arith.constant 0 : index
    %c0_34 = arith.constant 0 : index
    %c96 = arith.constant 96 : index
    %102 = vector.load %arg4[%c0_33, %c0_34, %c96] : memref<1x16x128xbf16, #tpu.memory_space<vmem>>, vector<1x16x32xbf16>
    %103 = vector.shape_cast %102 : vector<1x16x32xbf16> to vector<16x32xbf16>
    %104 = vector.shape_cast %101 : vector<16x32xbf16> to vector<1x16x32xbf16>
    tpu.vector_store %arg4[%c0_33, %c0_34, %c96], %104 {strides = array<i32>} : memref<1x16x128xbf16, #tpu.memory_space<vmem>>, vector<1x16x32xbf16>,
    return
  }
  func.func @transform_0(%arg0: i32) -> (i32, i32, i32) {
    %c0_i32 = arith.constant 0 : i32
    %c0_i32_0 = arith.constant 0 : i32
    %c0_i32_1 = arith.constant 0 : i32
    return %arg0, %c0_i32, %c0_i32_0 : i32, i32, i32
  }
  func.func @transform_1(%arg0: i32) -> (i32, i32) {
    %c0_i32 = arith.constant 0 : i32
    %c0_i32_0 = arith.constant 0 : i32
    %c0_i32_1 = arith.constant 0 : i32
    return %c0_i32, %c0_i32_0 : i32, i32
  }
  func.func @transform_2(%arg0: i32) -> (i32, i32) {
    %c0_i32 = arith.constant 0 : i32
    %c0_i32_0 = arith.constant 0 : i32
    %c0_i32_1 = arith.constant 0 : i32
    return %c0_i32, %c0_i32_0 : i32, i32
  }
  func.func @transform_3(%arg0: i32) -> (i32, i32, i32) {
    %c0_i32 = arith.constant 0 : i32
    %c0_i32_0 = arith.constant 0 : i32
    %c0_i32_1 = arith.constant 0 : i32
    return %arg0, %c0_i32, %c0_i32_0 : i32, i32, i32
  }
}

module attributes {stable_mosaic.version = 11 : i64} {
  func.func @_mm_kernel(%arg0: i32, %arg1: i32, %arg2: i32, %arg3: memref<16x128xbf16, #tpu.memory_space<vmem>>, %arg4: memref<128x128xbf16, #tpu.memory_space<vmem>>, %arg5: memref<1x128xf32, #tpu.memory_space<vmem>>, %arg6: memref<1x128xf32, #tpu.memory_space<vmem>>, %arg7: memref<16x128xf32, #tpu.memory_space<vmem>>, %arg8: memref<1x128xf32, #tpu.memory_space<vmem>>, %arg9: memref<1x128xf32, #tpu.memory_space<vmem>>, %arg10: memref<16x128xf32, #tpu.memory_space<vmem>>) attributes {dimension_semantics = [#tpu.dimension_semantics<parallel>, #tpu.dimension_semantics<parallel>, #tpu.dimension_semantics<arbitrary>], iteration_bounds = array<i64: 2, 1, 1>, scalar_prefetch = 0 : i64, scratch_operands = 0 : i64, tpu.core_type = #tpu.core_type<tc>, window_params = [{transform_indices = @transform_0, window_bounds = array<i64: 16, 128>}, {transform_indices = @transform_1, window_bounds = array<i64: 128, 128>}, {transform_indices = @transform_2, window_bounds = array<i64: 1, 128>}, {transform_indices = @transform_3, window_bounds = array<i64: 1, 128>}, {transform_indices = @transform_4, window_bounds = array<i64: 16, 128>}, {transform_indices = @transform_5, window_bounds = array<i64: 1, 128>}, {transform_indices = @transform_6, window_bounds = array<i64: 1, 128>}, {transform_indices = @transform_7, window_bounds = array<i64: 16, 128>}]} {
    %c0_i32 = arith.constant 0 : i32
    %0 = arith.cmpi eq, %arg2, %c0_i32 : i32
    %1 = arith.extui %0 : i1 to i32
    %c0_i32_0 = arith.constant 0 : i32
    %2 = arith.cmpi ne, %1, %c0_i32_0 : i32
    scf.if %2 {
      %cst_10 = arith.constant 0.000000e+00 : f32
      %12 = vector.broadcast %cst_10 : f32 to vector<16x128xf32>
      %c0_11 = arith.constant 0 : index
      %c0_12 = arith.constant 0 : index
      %13 = vector.load %arg10[%c0_11, %c0_12] : memref<16x128xf32, #tpu.memory_space<vmem>>, vector<16x128xf32>
      tpu.vector_store %arg10[%c0_11, %c0_12], %12 {strides = array<i32>} : memref<16x128xf32, #tpu.memory_space<vmem>>, vector<16x128xf32>,
    } else {
    }
    %c0 = arith.constant 0 : index
    %c0_1 = arith.constant 0 : index
    %3 = vector.load %arg10[%c0, %c0_1] : memref<16x128xf32, #tpu.memory_space<vmem>>, vector<16x128xf32>
    %c0_2 = arith.constant 0 : index
    %c0_3 = arith.constant 0 : index
    %4 = vector.load %arg3[%c0_2, %c0_3] : memref<16x128xbf16, #tpu.memory_space<vmem>>, vector<16x128xbf16>
    %c0_4 = arith.constant 0 : index
    %c0_5 = arith.constant 0 : index
    %5 = vector.load %arg4[%c0_4, %c0_5] : memref<128x128xbf16, #tpu.memory_space<vmem>>, vector<128x128xbf16>
    %cst = arith.constant dense<0.000000e+00> : vector<16x128xf32>
    %6 = tpu.matmul %4, %5, %cst {dimension_numbers = #tpu.dot_dimension_numbers<[1], [0], [0], [1], [0, 0, 1, 1], [], []>} : vector<16x128xbf16>, vector<128x128xbf16>, vector<16x128xf32> -> vector<16x128xf32>
    %7 = arith.addf %3, %6 : vector<16x128xf32>
    %c0_6 = arith.constant 0 : index
    %c0_7 = arith.constant 0 : index
    %8 = vector.load %arg10[%c0_6, %c0_7] : memref<16x128xf32, #tpu.memory_space<vmem>>, vector<16x128xf32>
    tpu.vector_store %arg10[%c0_6, %c0_7], %7 {strides = array<i32>} : memref<16x128xf32, #tpu.memory_space<vmem>>, vector<16x128xf32>,
    %c0_i32_8 = arith.constant 0 : i32
    %9 = arith.cmpi eq, %arg2, %c0_i32_8 : i32
    %10 = arith.extui %9 : i1 to i32
    %c0_i32_9 = arith.constant 0 : i32
    %11 = arith.cmpi ne, %10, %c0_i32_9 : i32
    scf.if %11 {
      %c0_10 = arith.constant 0 : index
      %c0_11 = arith.constant 0 : index
      %12 = vector.load %arg10[%c0_10, %c0_11] : memref<16x128xf32, #tpu.memory_space<vmem>>, vector<16x128xf32>
      %c0_12 = arith.constant 0 : index
      %c0_13 = arith.constant 0 : index
      %13 = vector.load %arg5[%c0_12, %c0_13] : memref<1x128xf32, #tpu.memory_space<vmem>>, vector<1x128xf32>
      %14 = vector.broadcast %13 : vector<1x128xf32> to vector<16x128xf32>
      %15 = arith.mulf %12, %14 : vector<16x128xf32>
      %c0_14 = arith.constant 0 : index
      %c0_15 = arith.constant 0 : index
      %16 = vector.load %arg6[%c0_14, %c0_15] : memref<1x128xf32, #tpu.memory_space<vmem>>, vector<1x128xf32>
      %17 = vector.broadcast %16 : vector<1x128xf32> to vector<16x128xf32>
      %18 = arith.addf %15, %17 : vector<16x128xf32>
      %c0_16 = arith.constant 0 : index
      %c0_17 = arith.constant 0 : index
      %19 = vector.load %arg7[%c0_16, %c0_17] : memref<16x128xf32, #tpu.memory_space<vmem>>, vector<16x128xf32>
      %20 = arith.addf %18, %19 : vector<16x128xf32>
      %cst_18 = arith.constant dense<0.000000e+00> : vector<16xf32>
      %21 = vector.multi_reduction <add>, %20, %cst_18 [1] : vector<16x128xf32> to vector<16xf32>
      %22 = vector.shape_cast %21 : vector<16xf32> to vector<16x1xf32>
      %cst_19 = arith.constant 1.280000e+02 : f32
      %23 = vector.broadcast %cst_19 : f32 to vector<16x1xf32>
      %24 = arith.divf %22, %23 : vector<16x1xf32>
      %25 = vector.broadcast %24 : vector<16x1xf32> to vector<16x128xf32>
      %26 = arith.subf %20, %25 : vector<16x128xf32>
      %27 = arith.mulf %26, %26 : vector<16x128xf32>
      %cst_20 = arith.constant dense<0.000000e+00> : vector<16xf32>
      %28 = vector.multi_reduction <add>, %27, %cst_20 [1] : vector<16x128xf32> to vector<16xf32>
      %29 = vector.shape_cast %28 : vector<16xf32> to vector<16x1xf32>
      %cst_21 = arith.constant 1.280000e+02 : f32
      %30 = vector.broadcast %cst_21 : f32 to vector<16x1xf32>
      %31 = arith.divf %29, %30 : vector<16x1xf32>
      %32 = vector.broadcast %24 : vector<16x1xf32> to vector<16x128xf32>
      %33 = arith.subf %20, %32 : vector<16x128xf32>
      %cst_22 = arith.constant 9.99999974E-6 : f32
      %34 = vector.broadcast %cst_22 : f32 to vector<16x1xf32>
      %35 = arith.addf %31, %34 : vector<16x1xf32>
      %36 = math.rsqrt %35 : vector<16x1xf32>
      %37 = vector.broadcast %36 : vector<16x1xf32> to vector<16x128xf32>
      %38 = arith.mulf %33, %37 : vector<16x128xf32>
      %c0_23 = arith.constant 0 : index
      %c0_24 = arith.constant 0 : index
      %39 = vector.load %arg8[%c0_23, %c0_24] : memref<1x128xf32, #tpu.memory_space<vmem>>, vector<1x128xf32>
      %40 = vector.broadcast %39 : vector<1x128xf32> to vector<16x128xf32>
      %41 = arith.mulf %38, %40 : vector<16x128xf32>
      %c0_25 = arith.constant 0 : index
      %c0_26 = arith.constant 0 : index
      %42 = vector.load %arg9[%c0_25, %c0_26] : memref<1x128xf32, #tpu.memory_space<vmem>>, vector<1x128xf32>
      %43 = vector.broadcast %42 : vector<1x128xf32> to vector<16x128xf32>
      %44 = arith.addf %41, %43 : vector<16x128xf32>
      %c0_27 = arith.constant 0 : index
      %c0_28 = arith.constant 0 : index
      %45 = vector.load %arg10[%c0_27, %c0_28] : memref<16x128xf32, #tpu.memory_space<vmem>>, vector<16x128xf32>
      tpu.vector_store %arg10[%c0_27, %c0_28], %44 {strides = array<i32>} : memref<16x128xf32, #tpu.memory_space<vmem>>, vector<16x128xf32>,
    } else {
    }
    return
  }
  func.func @transform_0(%arg0: i32, %arg1: i32, %arg2: i32) -> (i32, i32) {
    %c0_i32 = arith.constant 0 : i32
    return %arg0, %arg2 : i32, i32
  }
  func.func @transform_1(%arg0: i32, %arg1: i32, %arg2: i32) -> (i32, i32) {
    %c0_i32 = arith.constant 0 : i32
    return %arg2, %arg1 : i32, i32
  }
  func.func @transform_2(%arg0: i32, %arg1: i32, %arg2: i32) -> (i32, i32) {
    %c0_i32 = arith.constant 0 : i32
    %c0_i32_0 = arith.constant 0 : i32
    return %c0_i32, %arg1 : i32, i32
  }
  func.func @transform_3(%arg0: i32, %arg1: i32, %arg2: i32) -> (i32, i32) {
    %c0_i32 = arith.constant 0 : i32
    %c0_i32_0 = arith.constant 0 : i32
    return %c0_i32, %arg1 : i32, i32
  }
  func.func @transform_4(%arg0: i32, %arg1: i32, %arg2: i32) -> (i32, i32) {
    %c0_i32 = arith.constant 0 : i32
    return %arg0, %arg1 : i32, i32
  }
  func.func @transform_5(%arg0: i32, %arg1: i32, %arg2: i32) -> (i32, i32) {
    %c0_i32 = arith.constant 0 : i32
    %c0_i32_0 = arith.constant 0 : i32
    return %c0_i32, %arg1 : i32, i32
  }
  func.func @transform_6(%arg0: i32, %arg1: i32, %arg2: i32) -> (i32, i32) {
    %c0_i32 = arith.constant 0 : i32
    %c0_i32_0 = arith.constant 0 : i32
    return %c0_i32, %arg1 : i32, i32
  }
  func.func @transform_7(%arg0: i32, %arg1: i32, %arg2: i32) -> (i32, i32) {
    %c0_i32 = arith.constant 0 : i32
    return %arg0, %arg1 : i32, i32
  }
}

module attributes {stable_mosaic.version = 11 : i64} {
  func.func @_mm_kernel(%arg0: i32, %arg1: i32, %arg2: i32, %arg3: memref<16x128xbf16, #tpu.memory_space<vmem>>, %arg4: memref<128x64xbf16, #tpu.memory_space<vmem>>, %arg5: memref<1x64xf32, #tpu.memory_space<vmem>>, %arg6: memref<1x64xf32, #tpu.memory_space<vmem>>, %arg7: memref<16x64xbf16, #tpu.memory_space<vmem>>, %arg8: memref<16x64xf32, #tpu.memory_space<vmem>>) attributes {dimension_semantics = [#tpu.dimension_semantics<parallel>, #tpu.dimension_semantics<parallel>, #tpu.dimension_semantics<arbitrary>], iteration_bounds = array<i64: 2, 1, 1>, scalar_prefetch = 0 : i64, scratch_operands = 1 : i64, tpu.core_type = #tpu.core_type<tc>, window_params = [{transform_indices = @transform_0, window_bounds = array<i64: 16, 128>}, {transform_indices = @transform_1, window_bounds = array<i64: 128, 64>}, {transform_indices = @transform_2, window_bounds = array<i64: 1, 64>}, {transform_indices = @transform_3, window_bounds = array<i64: 1, 64>}, {transform_indices = @transform_4, window_bounds = array<i64: 16, 64>}]} {
    %c0_i32 = arith.constant 0 : i32
    %0 = arith.cmpi eq, %arg2, %c0_i32 : i32
    %1 = arith.extui %0 : i1 to i32
    %c0_i32_0 = arith.constant 0 : i32
    %2 = arith.cmpi ne, %1, %c0_i32_0 : i32
    scf.if %2 {
      %cst_10 = arith.constant 0.000000e+00 : f32
      %12 = vector.broadcast %cst_10 : f32 to vector<16x64xf32>
      %c0_11 = arith.constant 0 : index
      %c0_12 = arith.constant 0 : index
      %13 = vector.load %arg8[%c0_11, %c0_12] : memref<16x64xf32, #tpu.memory_space<vmem>>, vector<16x64xf32>
      tpu.vector_store %arg8[%c0_11, %c0_12], %12 {strides = array<i32>} : memref<16x64xf32, #tpu.memory_space<vmem>>, vector<16x64xf32>,
    } else {
    }
    %c0 = arith.constant 0 : index
    %c0_1 = arith.constant 0 : index
    %3 = vector.load %arg8[%c0, %c0_1] : memref<16x64xf32, #tpu.memory_space<vmem>>, vector<16x64xf32>
    %c0_2 = arith.constant 0 : index
    %c0_3 = arith.constant 0 : index
    %4 = vector.load %arg3[%c0_2, %c0_3] : memref<16x128xbf16, #tpu.memory_space<vmem>>, vector<16x128xbf16>
    %c0_4 = arith.constant 0 : index
    %c0_5 = arith.constant 0 : index
    %5 = vector.load %arg4[%c0_4, %c0_5] : memref<128x64xbf16, #tpu.memory_space<vmem>>, vector<128x64xbf16>
    %cst = arith.constant dense<0.000000e+00> : vector<16x64xf32>
    %6 = tpu.matmul %4, %5, %cst {dimension_numbers = #tpu.dot_dimension_numbers<[1], [0], [0], [1], [0, 0, 1, 1], [], []>} : vector<16x128xbf16>, vector<128x64xbf16>, vector<16x64xf32> -> vector<16x64xf32>
    %7 = arith.addf %3, %6 : vector<16x64xf32>
    %c0_6 = arith.constant 0 : index
    %c0_7 = arith.constant 0 : index
    %8 = vector.load %arg8[%c0_6, %c0_7] : memref<16x64xf32, #tpu.memory_space<vmem>>, vector<16x64xf32>
    tpu.vector_store %arg8[%c0_6, %c0_7], %7 {strides = array<i32>} : memref<16x64xf32, #tpu.memory_space<vmem>>, vector<16x64xf32>,
    %c0_i32_8 = arith.constant 0 : i32
    %9 = arith.cmpi eq, %arg2, %c0_i32_8 : i32
    %10 = arith.extui %9 : i1 to i32
    %c0_i32_9 = arith.constant 0 : i32
    %11 = arith.cmpi ne, %10, %c0_i32_9 : i32
    scf.if %11 {
      %c0_10 = arith.constant 0 : index
      %c0_11 = arith.constant 0 : index
      %12 = vector.load %arg8[%c0_10, %c0_11] : memref<16x64xf32, #tpu.memory_space<vmem>>, vector<16x64xf32>
      %c0_12 = arith.constant 0 : index
      %c0_13 = arith.constant 0 : index
      %13 = vector.load %arg5[%c0_12, %c0_13] : memref<1x64xf32, #tpu.memory_space<vmem>>, vector<1x64xf32>
      %14 = vector.broadcast %13 : vector<1x64xf32> to vector<16x64xf32>
      %15 = arith.mulf %12, %14 : vector<16x64xf32>
      %c0_14 = arith.constant 0 : index
      %c0_15 = arith.constant 0 : index
      %16 = vector.load %arg6[%c0_14, %c0_15] : memref<1x64xf32, #tpu.memory_space<vmem>>, vector<1x64xf32>
      %17 = vector.broadcast %16 : vector<1x64xf32> to vector<16x64xf32>
      %18 = arith.addf %15, %17 : vector<16x64xf32>
      %cst_16 = arith.constant 0.000000e+00 : f32
      %19 = vector.broadcast %cst_16 : f32 to vector<16x64xf32>
      %20 = arith.maximumf %18, %19 : vector<16x64xf32>
      %21 = arith.truncf %20 : vector<16x64xf32> to vector<16x64xbf16>
      %c0_17 = arith.constant 0 : index
      %c0_18 = arith.constant 0 : index
      %22 = vector.load %arg7[%c0_17, %c0_18] : memref<16x64xbf16, #tpu.memory_space<vmem>>, vector<16x64xbf16>
      tpu.vector_store %arg7[%c0_17, %c0_18], %21 {strides = array<i32>} : memref<16x64xbf16, #tpu.memory_space<vmem>>, vector<16x64xbf16>,
    } else {
    }
    return
  }
  func.func @transform_0(%arg0: i32, %arg1: i32, %arg2: i32) -> (i32, i32) {
    %c0_i32 = arith.constant 0 : i32
    return %arg0, %arg2 : i32, i32
  }
  func.func @transform_1(%arg0: i32, %arg1: i32, %arg2: i32) -> (i32, i32) {
    %c0_i32 = arith.constant 0 : i32
    return %arg2, %arg1 : i32, i32
  }
  func.func @transform_2(%arg0: i32, %arg1: i32, %arg2: i32) -> (i32, i32) {
    %c0_i32 = arith.constant 0 : i32
    %c0_i32_0 = arith.constant 0 : i32
    return %c0_i32, %arg1 : i32, i32
  }
  func.func @transform_3(%arg0: i32, %arg1: i32, %arg2: i32) -> (i32, i32) {
    %c0_i32 = arith.constant 0 : i32
    %c0_i32_0 = arith.constant 0 : i32
    return %c0_i32, %arg1 : i32, i32
  }
  func.func @transform_4(%arg0: i32, %arg1: i32, %arg2: i32) -> (i32, i32) {
    %c0_i32 = arith.constant 0 : i32
    return %arg0, %arg1 : i32, i32
  }
}

module attributes {stable_mosaic.version = 11 : i64} {
  func.func @_mm_kernel(%arg0: i32, %arg1: i32, %arg2: i32, %arg3: memref<16x64xbf16, #tpu.memory_space<vmem>>, %arg4: memref<64x128xbf16, #tpu.memory_space<vmem>>, %arg5: memref<1x128xf32, #tpu.memory_space<vmem>>, %arg6: memref<1x128xf32, #tpu.memory_space<vmem>>, %arg7: memref<16x128xf32, #tpu.memory_space<vmem>>, %arg8: memref<1x128xf32, #tpu.memory_space<vmem>>, %arg9: memref<1x128xf32, #tpu.memory_space<vmem>>, %arg10: memref<16x128xf32, #tpu.memory_space<vmem>>) attributes {dimension_semantics = [#tpu.dimension_semantics<parallel>, #tpu.dimension_semantics<parallel>, #tpu.dimension_semantics<arbitrary>], iteration_bounds = array<i64: 2, 1, 1>, scalar_prefetch = 0 : i64, scratch_operands = 0 : i64, tpu.core_type = #tpu.core_type<tc>, window_params = [{transform_indices = @transform_0, window_bounds = array<i64: 16, 64>}, {transform_indices = @transform_1, window_bounds = array<i64: 64, 128>}, {transform_indices = @transform_2, window_bounds = array<i64: 1, 128>}, {transform_indices = @transform_3, window_bounds = array<i64: 1, 128>}, {transform_indices = @transform_4, window_bounds = array<i64: 16, 128>}, {transform_indices = @transform_5, window_bounds = array<i64: 1, 128>}, {transform_indices = @transform_6, window_bounds = array<i64: 1, 128>}, {transform_indices = @transform_7, window_bounds = array<i64: 16, 128>}]} {
    %c0_i32 = arith.constant 0 : i32
    %0 = arith.cmpi eq, %arg2, %c0_i32 : i32
    %1 = arith.extui %0 : i1 to i32
    %c0_i32_0 = arith.constant 0 : i32
    %2 = arith.cmpi ne, %1, %c0_i32_0 : i32
    scf.if %2 {
      %cst_10 = arith.constant 0.000000e+00 : f32
      %12 = vector.broadcast %cst_10 : f32 to vector<16x128xf32>
      %c0_11 = arith.constant 0 : index
      %c0_12 = arith.constant 0 : index
      %13 = vector.load %arg10[%c0_11, %c0_12] : memref<16x128xf32, #tpu.memory_space<vmem>>, vector<16x128xf32>
      tpu.vector_store %arg10[%c0_11, %c0_12], %12 {strides = array<i32>} : memref<16x128xf32, #tpu.memory_space<vmem>>, vector<16x128xf32>,
    } else {
    }
    %c0 = arith.constant 0 : index
    %c0_1 = arith.constant 0 : index
    %3 = vector.load %arg10[%c0, %c0_1] : memref<16x128xf32, #tpu.memory_space<vmem>>, vector<16x128xf32>
    %c0_2 = arith.constant 0 : index
    %c0_3 = arith.constant 0 : index
    %4 = vector.load %arg3[%c0_2, %c0_3] : memref<16x64xbf16, #tpu.memory_space<vmem>>, vector<16x64xbf16>
    %c0_4 = arith.constant 0 : index
    %c0_5 = arith.constant 0 : index
    %5 = vector.load %arg4[%c0_4, %c0_5] : memref<64x128xbf16, #tpu.memory_space<vmem>>, vector<64x128xbf16>
    %cst = arith.constant dense<0.000000e+00> : vector<16x128xf32>
    %6 = tpu.matmul %4, %5, %cst {dimension_numbers = #tpu.dot_dimension_numbers<[1], [0], [0], [1], [0, 0, 1, 1], [], []>} : vector<16x64xbf16>, vector<64x128xbf16>, vector<16x128xf32> -> vector<16x128xf32>
    %7 = arith.addf %3, %6 : vector<16x128xf32>
    %c0_6 = arith.constant 0 : index
    %c0_7 = arith.constant 0 : index
    %8 = vector.load %arg10[%c0_6, %c0_7] : memref<16x128xf32, #tpu.memory_space<vmem>>, vector<16x128xf32>
    tpu.vector_store %arg10[%c0_6, %c0_7], %7 {strides = array<i32>} : memref<16x128xf32, #tpu.memory_space<vmem>>, vector<16x128xf32>,
    %c0_i32_8 = arith.constant 0 : i32
    %9 = arith.cmpi eq, %arg2, %c0_i32_8 : i32
    %10 = arith.extui %9 : i1 to i32
    %c0_i32_9 = arith.constant 0 : i32
    %11 = arith.cmpi ne, %10, %c0_i32_9 : i32
    scf.if %11 {
      %c0_10 = arith.constant 0 : index
      %c0_11 = arith.constant 0 : index
      %12 = vector.load %arg10[%c0_10, %c0_11] : memref<16x128xf32, #tpu.memory_space<vmem>>, vector<16x128xf32>
      %c0_12 = arith.constant 0 : index
      %c0_13 = arith.constant 0 : index
      %13 = vector.load %arg5[%c0_12, %c0_13] : memref<1x128xf32, #tpu.memory_space<vmem>>, vector<1x128xf32>
      %14 = vector.broadcast %13 : vector<1x128xf32> to vector<16x128xf32>
      %15 = arith.mulf %12, %14 : vector<16x128xf32>
      %c0_14 = arith.constant 0 : index
      %c0_15 = arith.constant 0 : index
      %16 = vector.load %arg6[%c0_14, %c0_15] : memref<1x128xf32, #tpu.memory_space<vmem>>, vector<1x128xf32>
      %17 = vector.broadcast %16 : vector<1x128xf32> to vector<16x128xf32>
      %18 = arith.addf %15, %17 : vector<16x128xf32>
      %c0_16 = arith.constant 0 : index
      %c0_17 = arith.constant 0 : index
      %19 = vector.load %arg7[%c0_16, %c0_17] : memref<16x128xf32, #tpu.memory_space<vmem>>, vector<16x128xf32>
      %20 = arith.addf %18, %19 : vector<16x128xf32>
      %cst_18 = arith.constant dense<0.000000e+00> : vector<16xf32>
      %21 = vector.multi_reduction <add>, %20, %cst_18 [1] : vector<16x128xf32> to vector<16xf32>
      %22 = vector.shape_cast %21 : vector<16xf32> to vector<16x1xf32>
      %cst_19 = arith.constant 1.280000e+02 : f32
      %23 = vector.broadcast %cst_19 : f32 to vector<16x1xf32>
      %24 = arith.divf %22, %23 : vector<16x1xf32>
      %25 = vector.broadcast %24 : vector<16x1xf32> to vector<16x128xf32>
      %26 = arith.subf %20, %25 : vector<16x128xf32>
      %27 = arith.mulf %26, %26 : vector<16x128xf32>
      %cst_20 = arith.constant dense<0.000000e+00> : vector<16xf32>
      %28 = vector.multi_reduction <add>, %27, %cst_20 [1] : vector<16x128xf32> to vector<16xf32>
      %29 = vector.shape_cast %28 : vector<16xf32> to vector<16x1xf32>
      %cst_21 = arith.constant 1.280000e+02 : f32
      %30 = vector.broadcast %cst_21 : f32 to vector<16x1xf32>
      %31 = arith.divf %29, %30 : vector<16x1xf32>
      %32 = vector.broadcast %24 : vector<16x1xf32> to vector<16x128xf32>
      %33 = arith.subf %20, %32 : vector<16x128xf32>
      %cst_22 = arith.constant 9.99999974E-6 : f32
      %34 = vector.broadcast %cst_22 : f32 to vector<16x1xf32>
      %35 = arith.addf %31, %34 : vector<16x1xf32>
      %36 = math.rsqrt %35 : vector<16x1xf32>
      %37 = vector.broadcast %36 : vector<16x1xf32> to vector<16x128xf32>
      %38 = arith.mulf %33, %37 : vector<16x128xf32>
      %c0_23 = arith.constant 0 : index
      %c0_24 = arith.constant 0 : index
      %39 = vector.load %arg8[%c0_23, %c0_24] : memref<1x128xf32, #tpu.memory_space<vmem>>, vector<1x128xf32>
      %40 = vector.broadcast %39 : vector<1x128xf32> to vector<16x128xf32>
      %41 = arith.mulf %38, %40 : vector<16x128xf32>
      %c0_25 = arith.constant 0 : index
      %c0_26 = arith.constant 0 : index
      %42 = vector.load %arg9[%c0_25, %c0_26] : memref<1x128xf32, #tpu.memory_space<vmem>>, vector<1x128xf32>
      %43 = vector.broadcast %42 : vector<1x128xf32> to vector<16x128xf32>
      %44 = arith.addf %41, %43 : vector<16x128xf32>
      %c0_27 = arith.constant 0 : index
      %c0_28 = arith.constant 0 : index
      %45 = vector.load %arg10[%c0_27, %c0_28] : memref<16x128xf32, #tpu.memory_space<vmem>>, vector<16x128xf32>
      tpu.vector_store %arg10[%c0_27, %c0_28], %44 {strides = array<i32>} : memref<16x128xf32, #tpu.memory_space<vmem>>, vector<16x128xf32>,
    } else {
    }
    return
  }
  func.func @transform_0(%arg0: i32, %arg1: i32, %arg2: i32) -> (i32, i32) {
    %c0_i32 = arith.constant 0 : i32
    return %arg0, %arg2 : i32, i32
  }
  func.func @transform_1(%arg0: i32, %arg1: i32, %arg2: i32) -> (i32, i32) {
    %c0_i32 = arith.constant 0 : i32
    return %arg2, %arg1 : i32, i32
  }
  func.func @transform_2(%arg0: i32, %arg1: i32, %arg2: i32) -> (i32, i32) {
    %c0_i32 = arith.constant 0 : i32
    %c0_i32_0 = arith.constant 0 : i32
    return %c0_i32, %arg1 : i32, i32
  }
  func.func @transform_3(%arg0: i32, %arg1: i32, %arg2: i32) -> (i32, i32) {
    %c0_i32 = arith.constant 0 : i32
    %c0_i32_0 = arith.constant 0 : i32
    return %c0_i32, %arg1 : i32, i32
  }
  func.func @transform_4(%arg0: i32, %arg1: i32, %arg2: i32) -> (i32, i32) {
    %c0_i32 = arith.constant 0 : i32
    return %arg0, %arg1 : i32, i32
  }
  func.func @transform_5(%arg0: i32, %arg1: i32, %arg2: i32) -> (i32, i32) {
    %c0_i32 = arith.constant 0 : i32
    %c0_i32_0 = arith.constant 0 : i32
    return %c0_i32, %arg1 : i32, i32
  }
  func.func @transform_6(%arg0: i32, %arg1: i32, %arg2: i32) -> (i32, i32) {
    %c0_i32 = arith.constant 0 : i32
    %c0_i32_0 = arith.constant 0 : i32
    return %c0_i32, %arg1 : i32, i32
  }
  func.func @transform_7(%arg0: i32, %arg1: i32, %arg2: i32) -> (i32, i32) {
    %c0_i32 = arith.constant 0 : i32
    return %arg0, %arg1 : i32, i32
  }
}

module attributes {stable_mosaic.version = 11 : i64} {
  func.func @_mm_kernel(%arg0: i32, %arg1: i32, %arg2: i32, %arg3: memref<64x72xbf16, #tpu.memory_space<vmem>>, %arg4: memref<72x8xbf16, #tpu.memory_space<vmem>>, %arg5: memref<1x8xf32, #tpu.memory_space<vmem>>, %arg6: memref<1x8xf32, #tpu.memory_space<vmem>>, %arg7: memref<64x8xf32, #tpu.memory_space<vmem>>) attributes {dimension_semantics = [#tpu.dimension_semantics<parallel>, #tpu.dimension_semantics<parallel>, #tpu.dimension_semantics<arbitrary>], iteration_bounds = array<i64: 2, 1, 1>, scalar_prefetch = 0 : i64, scratch_operands = 0 : i64, tpu.core_type = #tpu.core_type<tc>, window_params = [{transform_indices = @transform_0, window_bounds = array<i64: 64, 72>}, {transform_indices = @transform_1, window_bounds = array<i64: 72, 8>}, {transform_indices = @transform_2, window_bounds = array<i64: 1, 8>}, {transform_indices = @transform_3, window_bounds = array<i64: 1, 8>}, {transform_indices = @transform_4, window_bounds = array<i64: 64, 8>}]} {
    %c0_i32 = arith.constant 0 : i32
    %0 = arith.cmpi eq, %arg2, %c0_i32 : i32
    %1 = arith.extui %0 : i1 to i32
    %c0_i32_0 = arith.constant 0 : i32
    %2 = arith.cmpi ne, %1, %c0_i32_0 : i32
    scf.if %2 {
      %cst_10 = arith.constant 0.000000e+00 : f32
      %12 = vector.broadcast %cst_10 : f32 to vector<64x8xf32>
      %c0_11 = arith.constant 0 : index
      %c0_12 = arith.constant 0 : index
      %13 = vector.load %arg7[%c0_11, %c0_12] : memref<64x8xf32, #tpu.memory_space<vmem>>, vector<64x8xf32>
      tpu.vector_store %arg7[%c0_11, %c0_12], %12 {strides = array<i32>} : memref<64x8xf32, #tpu.memory_space<vmem>>, vector<64x8xf32>,
    } else {
    }
    %c0 = arith.constant 0 : index
    %c0_1 = arith.constant 0 : index
    %3 = vector.load %arg7[%c0, %c0_1] : memref<64x8xf32, #tpu.memory_space<vmem>>, vector<64x8xf32>
    %c0_2 = arith.constant 0 : index
    %c0_3 = arith.constant 0 : index
    %4 = vector.load %arg3[%c0_2, %c0_3] : memref<64x72xbf16, #tpu.memory_space<vmem>>, vector<64x72xbf16>
    %c0_4 = arith.constant 0 : index
    %c0_5 = arith.constant 0 : index
    %5 = vector.load %arg4[%c0_4, %c0_5] : memref<72x8xbf16, #tpu.memory_space<vmem>>, vector<72x8xbf16>
    %cst = arith.constant dense<0.000000e+00> : vector<64x8xf32>
    %6 = tpu.matmul %4, %5, %cst {dimension_numbers = #tpu.dot_dimension_numbers<[1], [0], [0], [1], [0, 0, 1, 1], [], []>} : vector<64x72xbf16>, vector<72x8xbf16>, vector<64x8xf32> -> vector<64x8xf32>
    %7 = arith.addf %3, %6 : vector<64x8xf32>
    %c0_6 = arith.constant 0 : index
    %c0_7 = arith.constant 0 : index
    %8 = vector.load %arg7[%c0_6, %c0_7] : memref<64x8xf32, #tpu.memory_space<vmem>>, vector<64x8xf32>
    tpu.vector_store %arg7[%c0_6, %c0_7], %7 {strides = array<i32>} : memref<64x8xf32, #tpu.memory_space<vmem>>, vector<64x8xf32>,
    %c0_i32_8 = arith.constant 0 : i32
    %9 = arith.cmpi eq, %arg2, %c0_i32_8 : i32
    %10 = arith.extui %9 : i1 to i32
    %c0_i32_9 = arith.constant 0 : i32
    %11 = arith.cmpi ne, %10, %c0_i32_9 : i32
    scf.if %11 {
      %c0_10 = arith.constant 0 : index
      %c0_11 = arith.constant 0 : index
      %12 = vector.load %arg7[%c0_10, %c0_11] : memref<64x8xf32, #tpu.memory_space<vmem>>, vector<64x8xf32>
      %c0_12 = arith.constant 0 : index
      %c0_13 = arith.constant 0 : index
      %13 = vector.load %arg5[%c0_12, %c0_13] : memref<1x8xf32, #tpu.memory_space<vmem>>, vector<1x8xf32>
      %14 = vector.broadcast %13 : vector<1x8xf32> to vector<64x8xf32>
      %15 = arith.mulf %12, %14 : vector<64x8xf32>
      %c0_14 = arith.constant 0 : index
      %c0_15 = arith.constant 0 : index
      %16 = vector.load %arg6[%c0_14, %c0_15] : memref<1x8xf32, #tpu.memory_space<vmem>>, vector<1x8xf32>
      %17 = vector.broadcast %16 : vector<1x8xf32> to vector<64x8xf32>
      %18 = arith.addf %15, %17 : vector<64x8xf32>
      %c0_16 = arith.constant 0 : index
      %c0_17 = arith.constant 0 : index
      %19 = vector.load %arg7[%c0_16, %c0_17] : memref<64x8xf32, #tpu.memory_space<vmem>>, vector<64x8xf32>
      tpu.vector_store %arg7[%c0_16, %c0_17], %18 {strides = array<i32>} : memref<64x8xf32, #tpu.memory_space<vmem>>, vector<64x8xf32>,
    } else {
    }
    return
  }
  func.func @transform_0(%arg0: i32, %arg1: i32, %arg2: i32) -> (i32, i32) {
    %c0_i32 = arith.constant 0 : i32
    return %arg0, %arg2 : i32, i32
  }
  func.func @transform_1(%arg0: i32, %arg1: i32, %arg2: i32) -> (i32, i32) {
    %c0_i32 = arith.constant 0 : i32
    return %arg2, %arg1 : i32, i32
  }
  func.func @transform_2(%arg0: i32, %arg1: i32, %arg2: i32) -> (i32, i32) {
    %c0_i32 = arith.constant 0 : i32
    %c0_i32_0 = arith.constant 0 : i32
    return %c0_i32, %arg1 : i32, i32
  }
  func.func @transform_3(%arg0: i32, %arg1: i32, %arg2: i32) -> (i32, i32) {
    %c0_i32 = arith.constant 0 : i32
    %c0_i32_0 = arith.constant 0 : i32
    return %c0_i32, %arg1 : i32, i32
  }
  func.func @transform_4(%arg0: i32, %arg1: i32, %arg2: i32) -> (i32, i32) {
    %c0_i32 = arith.constant 0 : i32
    return %arg0, %arg1 : i32, i32
  }
}

</mosaic_0001>

<bundles_post_ra>
// kernel: forward.7
= control target key start
LH: loop header
LB: loop body
LE: loop exit
PB: predicated region body
PF: predicated region fallthrough
CT: control target
= control target key end

     0   :  { %s1273_s18 = smov 0   ;;  %s1275_s19 = smov 0   ;;  %s1722_s0 = inlined_call_operand.vmem [shape: bf16[512,36], index: 0, kind: input, shape index: {}]   ;;  %s1723_s1 = inlined_call_operand.vmem [shape: bf16[36,16], index: 1, kind: input, shape index: {}]   ;;  %s1724_s2 = inlined_call_operand.vmem [shape: f32[1,16], index: 2, kind: input, shape index: {}]   ;;  %s1725_s3 = inlined_call_operand.vmem [shape: f32[1,16], index: 3, kind: input, shape index: {}]   ;;  %s1726_s4 = inlined_call_operand.vmem [shape: f32[1,16], index: 4, kind: input, shape index: {}]   ;;  %s1727_s5 = inlined_call_operand.vmem [shape: f32[512,16], index: 5, kind: output, shape index: {}]  }
   0x1   :  { %s1277_s20 = smov 0  }
   0x2 LB: > { %s34_s21 = sadd.s32 1, %s1236_s19  ;;  %p1068_p0 = scmp.ge.s32.totalorder %s1240_s20, 1  ;;  %s1240_s20 = sphi %s1277_s20, %s15_s20   ;;  %s1236_s19 = sphi %s1275_s19, %s1729_s19   ;;  %s1232_s18 = sphi %s1273_s18, %s1728_s18  }
   0x3   : > { %p36_p1 = scmp.ge.s32.totalorder %s34_s21, 2  ;;  %p254_p2 = scmp.lt.s32.totalorder %s1240_s20, 3 }
   0x5   : > { %s1731_s21 = smov (%p36_p1, %s34_s21), 0  ;;  %p255_p3 = pnand %p1068_p0, %p254_p2 }
   0x6   : > { %s1069_s24 = sshll.u32 (!%p255_p3), %s1232_s18, 5 }
   0x7   : > { %258 = sbr.rel (%p255_p3) target bundleno = 237 (0xed), region = 40  ;;  %p306_p4 = scmp.lt.s32.totalorder (!%p255_p3), %s1069_s24, 63 }
   0xc   : > { %v447_v0 = vld [vmem:[%s1723_s1 + $0x10] sm:$0x3]  ;;  %vm592_vm0 = vcmask 1041408   ;;  %s1733_s24 = smov (!%p306_p4, %s1069_s24), 63  ;;  %v1180_v4 = vld [vmem:[%s1723_s1 + $0x8] sm:$0xff]  ;;  %v1179_v5 = vld [vmem:[%s1723_s1] sm:$0xff] }
   0xd   : > { %v537_v1 = vunpack.c.l.b16 %v447_v0  ;;  %s1070_s27 = sshll.u32 %s1733_s24, 2  ;;  %vm543_vm1 = vcmask 293888   ;;  %s1072_s8 = sshll.u32 %s1733_s24, 3  ;;  %vm346_vm2 = vcmask 130048   ;;  %v1242_v14 = vmov 0.0  }
   0xe   : > { %s1306_s7 = scalar_lea.vmem %s1722_s0, %s1070_s27  ;;  %s1324_s11 = scalar_lea.vmem %s1727_s5, %s1072_s8  ;;  %v1423_v33 = vld [vmem:[%s1724_s2] ss:$0 sm:$0xff] }
   0xf   : > { %v540_v2 = vpack.c.b16 %v537_v1, %v537_v1  ;;  %v1163_v6 = vld [vmem:[%s1306_s7] sm:$0xff]  ;;  %v1164_v10 = vld [vmem:[%s1306_s7 + $0x8] sm:$0xff]  ;;  %347 = vst.msk [vmem:[%s1324_s11] sm:$0xff] %vm346_vm2, %v1242_v14  ;;  %v1165_v15 = vld [vmem:[%s1306_s7 + $0x10] sm:$0xff] }
  0x10   : > { %v1167_v7 = vld [vmem:[%s1306_s7 + $0x20] sm:$0xff]  ;;  %v1168_v11 = vld [vmem:[%s1306_s7 + $0x28] sm:$0xff]  ;;  %348 = vst.msk [vmem:[%s1324_s11 + $0x8] sm:$0xff] %vm346_vm2, %v1242_v14  ;;  %v1169_v16 = vld [vmem:[%s1306_s7 + $0x30] sm:$0xff] }
  0x11   : > { %v594_v3 = vsel %vm592_vm0, %v540_v2, 0  ;;  %v1171_v8 = vld [vmem:[%s1306_s7 + $0x40] sm:$0xff]  ;;  %v1172_v12 = vld [vmem:[%s1306_s7 + $0x48] sm:$0xff]  ;;  %349 = vst.msk [vmem:[%s1324_s11 + $0x10] sm:$0xff] %vm346_vm2, %v1242_v14  ;;  %v1173_v17 = vld [vmem:[%s1306_s7 + $0x50] sm:$0xff] }
  0x12   : > { %601 = vmatpush.bf16.msra.mxu0 %v594_v3  ;;  %1181 = vmatpush.bf16.msra.mxu1 %v594_v3  ;;  %v1175_v9 = vld [vmem:[%s1306_s7 + $0x60] sm:$0xff]  ;;  %v1176_v13 = vld [vmem:[%s1306_s7 + $0x68] sm:$0xff]  ;;  %350 = vst.msk [vmem:[%s1324_s11 + $0x18] sm:$0xff] %vm346_vm2, %v1242_v14  ;;  %v1177_v18 = vld [vmem:[%s1306_s7 + $0x70] sm:$0xff] }
  0x13   : > { %1182 = vmatpush.bf16.msra.mxu2 %v594_v3  ;;  %1183 = vmatpush.bf16.msra.mxu3 %v594_v3  ;;  %351 = vst.msk [vmem:[%s1324_s11 + $0x20] sm:$0xff] %vm346_vm2, %v1242_v14  ;;  %v1166_v19 = vld [vmem:[%s1306_s7 + $0x18] sm:$0xff]  ;;  %v1428_v40 = vld [vmem:[%s1725_s3] ss:$0 sm:$0xff] }
  0x14   : > { %352 = vst.msk [vmem:[%s1324_s11 + $0x28] sm:$0xff] %vm346_vm2, %v1242_v14  ;;  %v1170_v20 = vld [vmem:[%s1306_s7 + $0x38] sm:$0xff]  ;;  %v1437_v45 = vld [vmem:[%s1726_s4] ss:$0 sm:$0xff] }
  0x15   : > { %353 = vst.msk [vmem:[%s1324_s11 + $0x30] sm:$0xff] %vm346_vm2, %v1242_v14  ;;  %v1174_v21 = vld [vmem:[%s1306_s7 + $0x58] sm:$0xff] }
  0x16   : > { %602 = vmatpush.bf16.msra.mxu0 %v1180_v4  ;;  %1184 = vmatpush.bf16.msra.mxu1 %v1180_v4  ;;  %354 = vst.msk [vmem:[%s1324_s11 + $0x38] sm:$0xff] %vm346_vm2, %v1242_v14  ;;  %v1178_v22 = vld [vmem:[%s1306_s7 + $0x78] sm:$0xff]  ;;  %v379_v23 = vld [vmem:[%s1324_s11] sm:$0xff] }
  0x17   : > { %1185 = vmatpush.bf16.msra.mxu2 %v1180_v4  ;;  %1186 = vmatpush.bf16.msra.mxu3 %v1180_v4  ;;  %355 = vst.msk [vmem:[%s1324_s11 + $0x40] sm:$0xff] %vm346_vm2, %v1242_v14  ;;  %v380_v31 = vld [vmem:[%s1324_s11 + $0x8] sm:$0xff] }
  0x18   : > { %356 = vst.msk [vmem:[%s1324_s11 + $0x48] sm:$0xff] %vm346_vm2, %v1242_v14  ;;  %v381_v52 = vld [vmem:[%s1324_s11 + $0x10] sm:$0xff] }
  0x19   : > { %357 = vst.msk [vmem:[%s1324_s11 + $0x50] sm:$0xff] %vm346_vm2, %v1242_v14 }
  0x1a   : > { %603 = vmatpush.bf16.msra.mxu0 %v1179_v5  ;;  %1187 = vmatpush.bf16.msra.mxu1 %v1179_v5  ;;  %358 = vst.msk [vmem:[%s1324_s11 + $0x58] sm:$0xff] %vm346_vm2, %v1242_v14 }
  0x1b   : > { %1188 = vmatpush.bf16.msra.mxu2 %v1179_v5  ;;  %1189 = vmatpush.bf16.msra.mxu3 %v1179_v5  ;;  %359 = vst.msk [vmem:[%s1324_s11 + $0x60] sm:$0xff] %vm346_vm2, %v1242_v14 }
  0x1c   : > { %360 = vst.msk [vmem:[%s1324_s11 + $0x68] sm:$0xff] %vm346_vm2, %v1242_v14 }
  0x1d   : > { %1145 = vmatmul.msk.bf16.vlgmr.msra.gmra.mxu0 %vm543_vm1, %v1163_v6  ;;  %1149 = vmatmul.msk.bf16.vlgmr.msra.gmra.mxu1 %vm543_vm1, %v1167_v7  ;;  %361 = vst.msk [vmem:[%s1324_s11 + $0x70] sm:$0xff] %vm346_vm2, %v1242_v14 }
  0x1e   : > { %1153 = vmatmul.msk.bf16.vlgmr.msra.gmra.mxu2 %vm543_vm1, %v1171_v8  ;;  %1157 = vmatmul.msk.bf16.vlgmr.msra.gmra.mxu3 %vm543_vm1, %v1175_v9  ;;  %362 = vst.msk [vmem:[%s1324_s11 + $0x78] sm:$0xff] %vm346_vm2, %v1242_v14  ;;  %v387_v24 = vld [vmem:[%s1324_s11 + $0x40] sm:$0xff] }
  0x1f   : > { %363 = vst.msk [vmem:[%s1324_s11 + $0x80] sm:$0xff] %vm346_vm2, %v1242_v14  ;;  %v388_v32 = vld [vmem:[%s1324_s11 + $0x48] sm:$0xff] }
  0x20   : > { %364 = vst.msk [vmem:[%s1324_s11 + $0x88] sm:$0xff] %vm346_vm2, %v1242_v14  ;;  %v389_v56 = vld [vmem:[%s1324_s11 + $0x50] sm:$0xff] }
  0x21   : > { %365 = vst.msk [vmem:[%s1324_s11 + $0x90] sm:$0xff] %vm346_vm2, %v1242_v14 }
  0x22   : > { %366 = vst.msk [vmem:[%s1324_s11 + $0x98] sm:$0xff] %vm346_vm2, %v1242_v14 }
  0x23   : > { %367 = vst.msk [vmem:[%s1324_s11 + $0xa0] sm:$0xff] %vm346_vm2, %v1242_v14 }
  0x24   : > { %368 = vst.msk [vmem:[%s1324_s11 + $0xa8] sm:$0xff] %vm346_vm2, %v1242_v14 }
  0x25   : > { %369 = vst.msk [vmem:[%s1324_s11 + $0xb0] sm:$0xff] %vm346_vm2, %v1242_v14 }
  0x26   : > { %370 = vst.msk [vmem:[%s1324_s11 + $0xb8] sm:$0xff] %vm346_vm2, %v1242_v14  ;;  %v395_v29 = vld [vmem:[%s1324_s11 + $0x80] sm:$0xff] }
  0x27   : > { %371 = vst.msk [vmem:[%s1324_s11 + $0xc0] sm:$0xff] %vm346_vm2, %v1242_v14  ;;  %v396_v49 = vld [vmem:[%s1324_s11 + $0x88] sm:$0xff] }
  0x28   : > { %372 = vst.msk [vmem:[%s1324_s11 + $0xc8] sm:$0xff] %vm346_vm2, %v1242_v14 }
  0x29   : > { %373 = vst.msk [vmem:[%s1324_s11 + $0xd0] sm:$0xff] %vm346_vm2, %v1242_v14 }
  0x2a   : > { %374 = vst.msk [vmem:[%s1324_s11 + $0xd8] sm:$0xff] %vm346_vm2, %v1242_v14 }
  0x2b   : > { %375 = vst.msk [vmem:[%s1324_s11 + $0xe0] sm:$0xff] %vm346_vm2, %v1242_v14 }
  0x2c   : > { %376 = vst.msk [vmem:[%s1324_s11 + $0xe8] sm:$0xff] %vm346_vm2, %v1242_v14 }
  0x2d   : > { %1146 = vmatmul.msk.bf16.gmra.mxu0 %vm543_vm1, %v1164_v10  ;;  %1150 = vmatmul.msk.bf16.gmra.mxu1 %vm543_vm1, %v1168_v11  ;;  %377 = vst.msk [vmem:[%s1324_s11 + $0xf0] sm:$0xff] %vm346_vm2, %v1242_v14  ;;  %v397_v10 = vld [vmem:[%s1324_s11 + $0x90] sm:$0xff] }
  0x2e   : > { %1154 = vmatmul.msk.bf16.gmra.mxu2 %vm543_vm1, %v1172_v12  ;;  %1158 = vmatmul.msk.bf16.gmra.mxu3 %vm543_vm1, %v1176_v13  ;;  %378 = vst.msk [vmem:[%s1324_s11 + $0xf8] sm:$0xff] %vm346_vm2, %v1242_v14  ;;  %v403_v30 = vld [vmem:[%s1324_s11 + $0xc0] sm:$0xff] }
  0x2f   : > { %v404_v50 = vld [vmem:[%s1324_s11 + $0xc8] sm:$0xff] }
  0x30   : > { %v405_v13 = vld [vmem:[%s1324_s11 + $0xd0] sm:$0xff] }
  0x3d   : > { %1147 = vmatmul.msk.bf16.gmra.mxu0 %vm543_vm1, %v1165_v15  ;;  %1151 = vmatmul.msk.bf16.gmra.mxu1 %vm543_vm1, %v1169_v16 }
  0x3e   : > { %1155 = vmatmul.msk.bf16.gmra.mxu2 %vm543_vm1, %v1173_v17  ;;  %1159 = vmatmul.msk.bf16.gmra.mxu3 %vm543_vm1, %v1177_v18  ;;  %v382_v18 = vld [vmem:[%s1324_s11 + $0x18] sm:$0xff] }
  0x4d   : > { %1148 = vmatmul.msk.bf16.gmra.mxu0 %vm543_vm1, %v1166_v19  ;;  %1152 = vmatmul.msk.bf16.gmra.mxu1 %vm543_vm1, %v1170_v20 }
  0x4e   : > { %1156 = vmatmul.msk.bf16.gmra.mxu2 %vm543_vm1, %v1174_v21  ;;  %1160 = vmatmul.msk.bf16.gmra.mxu3 %vm543_vm1, %v1178_v22  ;;  %v390_v22 = vld [vmem:[%s1324_s11 + $0x58] sm:$0xff] }
  0x9a   : > { %v605_v25 = vpop.f32.mrf.mxu0  ;;  %v625_v26 = vpop.f32.mrf.mxu1 }
  0x9b   : > { %v685_v27 = vadd.f32 %v605_v25, %v379_v23  ;;  %v693_v28 = vadd.f32 %v625_v26, %v387_v24 }
  0x9d   : > { %718 = vst.msk [vmem:[%s1324_s11] sm:$0xff] %vm346_vm2, %v685_v27 }
  0x9e   : > { %726 = vst.msk [vmem:[%s1324_s11 + $0x40] sm:$0xff] %vm346_vm2, %v693_v28 }
  0xa1   : > { %v645_v34 = vpop.f32.mrf.mxu2  ;;  %v665_v35 = vpop.f32.mrf.mxu3 }
  0xa2   : > { %v701_v36 = vadd.f32 %v645_v34, %v395_v29  ;;  %v709_v37 = vadd.f32 %v665_v35, %v403_v30  ;;  %v607_v38 = vpop.f32.mrf.mxu0  ;;  %v627_v39 = vpop.f32.mrf.mxu1 }
  0xa3   : > { %v686_v41 = vadd.f32 %v607_v38, %v380_v31  ;;  %v694_v42 = vadd.f32 %v627_v39, %v388_v32  ;;  %v398_v39 = vld [vmem:[%s1324_s11 + $0x98] sm:$0xff] }
  0xa4   : > { %v753_v43 = vld [vmem:[%s1324_s11] sm:$0xff]  ;;  %734 = vst.msk [vmem:[%s1324_s11 + $0x80] sm:$0xff] %vm346_vm2, %v701_v36 }
  0xa5   : > { %v789_v44 = vmul.f32 %v1423_v33, %v753_v43  ;;  %v761_v46 = vld [vmem:[%s1324_s11 + $0x40] sm:$0xff]  ;;  %742 = vst.msk [vmem:[%s1324_s11 + $0xc0] sm:$0xff] %vm346_vm2, %v709_v37 }
  0xa6   : > { %v797_v47 = vmul.f32 %v1423_v33, %v761_v46  ;;  %719 = vst.msk [vmem:[%s1324_s11 + $0x8] sm:$0xff] %vm346_vm2, %v686_v41 }
  0xa7   : > { %v825_v48 = vadd.f32 %v1428_v40, %v789_v44  ;;  %727 = vst.msk [vmem:[%s1324_s11 + $0x48] sm:$0xff] %vm346_vm2, %v694_v42  ;;  %v406_v44 = vld [vmem:[%s1324_s11 + $0xd8] sm:$0xff] }
  0xa8   : > { %v833_v51 = vadd.f32 %v1428_v40, %v797_v47 }
  0xa9   : > { %v861_v53 = vmax.f32 %v825_v48, %v1437_v45  ;;  %v647_v54 = vpop.f32.mrf.mxu2  ;;  %v667_v55 = vpop.f32.mrf.mxu3 }
  0xaa   : > { %v869_v57 = vmax.f32 %v833_v51, %v1437_v45  ;;  %v702_v58 = vadd.f32 %v647_v54, %v396_v49  ;;  %v710_v59 = vadd.f32 %v667_v55, %v404_v50  ;;  %v610_v60 = vpop.f32.mrf.mxu0  ;;  %v630_v61 = vpop.f32.mrf.mxu1  ;;  %v383_v49 = vld [vmem:[%s1324_s11 + $0x20] sm:$0xff] }
  0xab   : > { %893 = vst.msk [vmem:[%s1324_s11] sm:$0xff] %vm346_vm2, %v861_v53  ;;  %v769_v62 = vld [vmem:[%s1324_s11 + $0x80] sm:$0xff]  ;;  %v687_v63 = vadd.f32 %v610_v60, %v381_v52  ;;  %v695_v2 = vadd.f32 %v630_v61, %v389_v56 }
  0xac   : > { %901 = vst.msk [vmem:[%s1324_s11 + $0x40] sm:$0xff] %vm346_vm2, %v869_v57  ;;  %v805_v0 = vmul.f32 %v1423_v33, %v769_v62  ;;  %v777_v1 = vld [vmem:[%s1324_s11 + $0xc0] sm:$0xff] }
  0xad   : > { %v813_v3 = vmul.f32 %v1423_v33, %v777_v1  ;;  %v754_v4 = vld [vmem:[%s1324_s11 + $0x8] sm:$0xff]  ;;  %735 = vst.msk [vmem:[%s1324_s11 + $0x88] sm:$0xff] %vm346_vm2, %v702_v58  ;;  %v391_v54 = vld [vmem:[%s1324_s11 + $0x60] sm:$0xff] }
  0xae   : > { %v841_v5 = vadd.f32 %v1428_v40, %v805_v0  ;;  %v790_v6 = vmul.f32 %v1423_v33, %v754_v4  ;;  %v762_v7 = vld [vmem:[%s1324_s11 + $0x48] sm:$0xff]  ;;  %743 = vst.msk [vmem:[%s1324_s11 + $0xc8] sm:$0xff] %vm346_vm2, %v710_v59 }
  0xaf   : > { %v849_v8 = vadd.f32 %v1428_v40, %v813_v3  ;;  %v798_v9 = vmul.f32 %v1423_v33, %v762_v7  ;;  %720 = vst.msk [vmem:[%s1324_s11 + $0x10] sm:$0xff] %vm346_vm2, %v687_v63 }
  0xb0   : > { %v877_v11 = vmax.f32 %v841_v5, %v1437_v45  ;;  %v826_v12 = vadd.f32 %v1428_v40, %v790_v6  ;;  %728 = vst.msk [vmem:[%s1324_s11 + $0x50] sm:$0xff] %vm346_vm2, %v695_v2  ;;  %v399_v5 = vld [vmem:[%s1324_s11 + $0xa0] sm:$0xff] }
  0xb1   : > { %v885_v14 = vmax.f32 %v849_v8, %v1437_v45  ;;  %v834_v15 = vadd.f32 %v1428_v40, %v798_v9  ;;  %v650_v16 = vpop.f32.mrf.mxu2  ;;  %v670_v17 = vpop.f32.mrf.mxu3 }
  0xb2   : > { %909 = vst.msk [vmem:[%s1324_s11 + $0x80] sm:$0xff] %vm346_vm2, %v877_v11  ;;  %v862_v19 = vmax.f32 %v826_v12, %v1437_v45  ;;  %v703_v20 = vadd.f32 %v650_v16, %v397_v10  ;;  %v612_v21 = vpop.f32.mrf.mxu0  ;;  %v632_v23 = vpop.f32.mrf.mxu1  ;;  %v711_v25 = vadd.f32 %v670_v17, %v405_v13  ;;  %v407_v10 = vld [vmem:[%s1324_s11 + $0xe0] sm:$0xff] }
  0xb3   : > { %917 = vst.msk [vmem:[%s1324_s11 + $0xc0] sm:$0xff] %vm346_vm2, %v885_v14  ;;  %v870_v24 = vmax.f32 %v834_v15, %v1437_v45  ;;  %v688_v27 = vadd.f32 %v612_v21, %v382_v18  ;;  %v696_v30 = vadd.f32 %v632_v23, %v390_v22  ;;  %v384_v15 = vld [vmem:[%s1324_s11 + $0x28] sm:$0xff] }
  0xb4   : > { %894 = vst.msk [vmem:[%s1324_s11 + $0x8] sm:$0xff] %vm346_vm2, %v862_v19  ;;  %v770_v26 = vld [vmem:[%s1324_s11 + $0x88] sm:$0xff] }
  0xb5   : > { %902 = vst.msk [vmem:[%s1324_s11 + $0x48] sm:$0xff] %vm346_vm2, %v870_v24  ;;  %v806_v28 = vmul.f32 %v1423_v33, %v770_v26  ;;  %v778_v29 = vld [vmem:[%s1324_s11 + $0xc8] sm:$0xff] }
  0xb6   : > { %v814_v31 = vmul.f32 %v1423_v33, %v778_v29  ;;  %v755_v32 = vld [vmem:[%s1324_s11 + $0x10] sm:$0xff]  ;;  %736 = vst.msk [vmem:[%s1324_s11 + $0x90] sm:$0xff] %vm346_vm2, %v703_v20  ;;  %v392_v18 = vld [vmem:[%s1324_s11 + $0x68] sm:$0xff] }
  0xb7   : > { %v842_v34 = vadd.f32 %v1428_v40, %v806_v28  ;;  %v791_v35 = vmul.f32 %v1423_v33, %v755_v32  ;;  %v763_v36 = vld [vmem:[%s1324_s11 + $0x50] sm:$0xff]  ;;  %744 = vst.msk [vmem:[%s1324_s11 + $0xd0] sm:$0xff] %vm346_vm2, %v711_v25  ;;  %v400_v26 = vld [vmem:[%s1324_s11 + $0xa8] sm:$0xff] }
  0xb8   : > { %v850_v37 = vadd.f32 %v1428_v40, %v814_v31  ;;  %v799_v38 = vmul.f32 %v1423_v33, %v763_v36  ;;  %721 = vst.msk [vmem:[%s1324_s11 + $0x18] sm:$0xff] %vm346_vm2, %v688_v27 }
  0xb9   : > { %v878_v41 = vmax.f32 %v842_v34, %v1437_v45  ;;  %v827_v42 = vadd.f32 %v1428_v40, %v791_v35  ;;  %729 = vst.msk [vmem:[%s1324_s11 + $0x58] sm:$0xff] %vm346_vm2, %v696_v30  ;;  %v652_v43 = vpop.f32.mrf.mxu2  ;;  %v672_v46 = vpop.f32.mrf.mxu3 }
  0xba   : > { %v886_v47 = vmax.f32 %v850_v37, %v1437_v45  ;;  %v835_v48 = vadd.f32 %v1428_v40, %v799_v38  ;;  %v615_v50 = vpop.f32.mrf.mxu0  ;;  %v635_v51 = vpop.f32.mrf.mxu1  ;;  %v704_v53 = vadd.f32 %v652_v43, %v398_v39  ;;  %v712_v56 = vadd.f32 %v672_v46, %v406_v44  ;;  %v408_v38 = vld [vmem:[%s1324_s11 + $0xe8] sm:$0xff]  ;;  %v385_v43 = vld [vmem:[%s1324_s11 + $0x30] sm:$0xff] }
  0xbb   : > { %910 = vst.msk [vmem:[%s1324_s11 + $0x88] sm:$0xff] %vm346_vm2, %v878_v41  ;;  %v863_v52 = vmax.f32 %v827_v42, %v1437_v45  ;;  %v689_v58 = vadd.f32 %v615_v50, %v383_v49  ;;  %v697_v61 = vadd.f32 %v635_v51, %v391_v54 }
  0xbc   : > { %918 = vst.msk [vmem:[%s1324_s11 + $0xc8] sm:$0xff] %vm346_vm2, %v886_v47  ;;  %v871_v55 = vmax.f32 %v835_v48, %v1437_v45  ;;  %v393_v48 = vld [vmem:[%s1324_s11 + $0x70] sm:$0xff] }
  0xbd   : > { %895 = vst.msk [vmem:[%s1324_s11 + $0x10] sm:$0xff] %vm346_vm2, %v863_v52  ;;  %v771_v57 = vld [vmem:[%s1324_s11 + $0x90] sm:$0xff] }
  0xbe   : > { %903 = vst.msk [vmem:[%s1324_s11 + $0x50] sm:$0xff] %vm346_vm2, %v871_v55  ;;  %v807_v59 = vmul.f32 %v1423_v33, %v771_v57  ;;  %v779_v60 = vld [vmem:[%s1324_s11 + $0xd0] sm:$0xff] }
  0xbf   : > { %v815_v62 = vmul.f32 %v1423_v33, %v779_v60  ;;  %v756_v63 = vld [vmem:[%s1324_s11 + $0x18] sm:$0xff]  ;;  %737 = vst.msk [vmem:[%s1324_s11 + $0x98] sm:$0xff] %vm346_vm2, %v704_v53  ;;  %v401_v55 = vld [vmem:[%s1324_s11 + $0xb0] sm:$0xff] }
  0xc0   : > { %v843_v0 = vadd.f32 %v1428_v40, %v807_v59  ;;  %v792_v1 = vmul.f32 %v1423_v33, %v756_v63  ;;  %v764_v2 = vld [vmem:[%s1324_s11 + $0x58] sm:$0xff]  ;;  %745 = vst.msk [vmem:[%s1324_s11 + $0xd8] sm:$0xff] %vm346_vm2, %v712_v56  ;;  %v409_v56 = vld [vmem:[%s1324_s11 + $0xf0] sm:$0xff] }
  0xc1   : > { %v851_v3 = vadd.f32 %v1428_v40, %v815_v62  ;;  %v800_v4 = vmul.f32 %v1423_v33, %v764_v2  ;;  %722 = vst.msk [vmem:[%s1324_s11 + $0x20] sm:$0xff] %vm346_vm2, %v689_v58  ;;  %v655_v6 = vpop.f32.mrf.mxu2  ;;  %v675_v7 = vpop.f32.mrf.mxu3 }
  0xc2   : > { %v879_v8 = vmax.f32 %v843_v0, %v1437_v45  ;;  %v828_v9 = vadd.f32 %v1428_v40, %v792_v1  ;;  %730 = vst.msk [vmem:[%s1324_s11 + $0x60] sm:$0xff] %vm346_vm2, %v697_v61  ;;  %v617_v11 = vpop.f32.mrf.mxu0  ;;  %v637_v12 = vpop.f32.mrf.mxu1  ;;  %v705_v17 = vadd.f32 %v655_v6, %v399_v5  ;;  %v713_v20 = vadd.f32 %v675_v7, %v407_v10  ;;  %v386_v10 = vld [vmem:[%s1324_s11 + $0x38] sm:$0xff] }
  0xc3   : > { %v887_v13 = vmax.f32 %v851_v3, %v1437_v45  ;;  %v836_v14 = vadd.f32 %v1428_v40, %v800_v4  ;;  %v690_v22 = vadd.f32 %v617_v11, %v384_v15  ;;  %v698_v25 = vadd.f32 %v637_v12, %v392_v18 }
  0xc4   : > { %911 = vst.msk [vmem:[%s1324_s11 + $0x90] sm:$0xff] %vm346_vm2, %v879_v8  ;;  %v864_v16 = vmax.f32 %v828_v9, %v1437_v45 }
  0xc5   : > { %919 = vst.msk [vmem:[%s1324_s11 + $0xd0] sm:$0xff] %vm346_vm2, %v887_v13  ;;  %v872_v19 = vmax.f32 %v836_v14, %v1437_v45  ;;  %v394_v14 = vld [vmem:[%s1324_s11 + $0x78] sm:$0xff] }
  0xc6   : > { %896 = vst.msk [vmem:[%s1324_s11 + $0x18] sm:$0xff] %vm346_vm2, %v864_v16  ;;  %v772_v21 = vld [vmem:[%s1324_s11 + $0x98] sm:$0xff] }
  0xc7   : > { %904 = vst.msk [vmem:[%s1324_s11 + $0x58] sm:$0xff] %vm346_vm2, %v872_v19  ;;  %v808_v23 = vmul.f32 %v1423_v33, %v772_v21  ;;  %v780_v24 = vld [vmem:[%s1324_s11 + $0xd8] sm:$0xff] }
  0xc8   : > { %v816_v27 = vmul.f32 %v1423_v33, %v780_v24  ;;  %v757_v28 = vld [vmem:[%s1324_s11 + $0x20] sm:$0xff]  ;;  %738 = vst.msk [vmem:[%s1324_s11 + $0xa0] sm:$0xff] %vm346_vm2, %v705_v17  ;;  %v410_v21 = vld [vmem:[%s1324_s11 + $0xf8] sm:$0xff] }
  0xc9   : > { %v844_v29 = vadd.f32 %v1428_v40, %v808_v23  ;;  %v793_v30 = vmul.f32 %v1423_v33, %v757_v28  ;;  %v765_v31 = vld [vmem:[%s1324_s11 + $0x60] sm:$0xff]  ;;  %746 = vst.msk [vmem:[%s1324_s11 + $0xe0] sm:$0xff] %vm346_vm2, %v713_v20  ;;  %v657_v32 = vpop.f32.mrf.mxu2  ;;  %v677_v34 = vpop.f32.mrf.mxu3  ;;  %v402_v20 = vld [vmem:[%s1324_s11 + $0xb8] sm:$0xff] }
  0xca   : > { %v852_v35 = vadd.f32 %v1428_v40, %v816_v27  ;;  %v801_v36 = vmul.f32 %v1423_v33, %v765_v31  ;;  %723 = vst.msk [vmem:[%s1324_s11 + $0x28] sm:$0xff] %vm346_vm2, %v690_v22  ;;  %v706_v37 = vadd.f32 %v657_v32, %v400_v26  ;;  %v620_v39 = vpop.f32.mrf.mxu0  ;;  %v640_v44 = vpop.f32.mrf.mxu1  ;;  %v714_v50 = vadd.f32 %v677_v34, %v408_v38 }
  0xcb   : > { %v880_v41 = vmax.f32 %v844_v29, %v1437_v45  ;;  %v829_v42 = vadd.f32 %v1428_v40, %v793_v30  ;;  %731 = vst.msk [vmem:[%s1324_s11 + $0x68] sm:$0xff] %vm346_vm2, %v698_v25  ;;  %v691_v52 = vadd.f32 %v620_v39, %v385_v43  ;;  %v699_v54 = vadd.f32 %v640_v44, %v393_v48 }
  0xcc   : > { %v888_v46 = vmax.f32 %v852_v35, %v1437_v45  ;;  %v837_v47 = vadd.f32 %v1428_v40, %v801_v36  ;;  %739 = vst.msk [vmem:[%s1324_s11 + $0xa8] sm:$0xff] %vm346_vm2, %v706_v37 }
  0xcd   : > { %912 = vst.msk [vmem:[%s1324_s11 + $0x98] sm:$0xff] %vm346_vm2, %v880_v41  ;;  %v865_v49 = vmax.f32 %v829_v42, %v1437_v45 }
  0xce   : > { %920 = vst.msk [vmem:[%s1324_s11 + $0xd8] sm:$0xff] %vm346_vm2, %v888_v46  ;;  %v873_v51 = vmax.f32 %v837_v47, %v1437_v45 }
  0xcf   : > { %897 = vst.msk [vmem:[%s1324_s11 + $0x20] sm:$0xff] %vm346_vm2, %v865_v49  ;;  %v773_v53 = vld [vmem:[%s1324_s11 + $0xa0] sm:$0xff] }
  0xd0   : > { %905 = vst.msk [vmem:[%s1324_s11 + $0x60] sm:$0xff] %vm346_vm2, %v873_v51  ;;  %v809_v57 = vmul.f32 %v1423_v33, %v773_v53  ;;  %v781_v58 = vld [vmem:[%s1324_s11 + $0xe0] sm:$0xff] }
  0xd1   : > { %v817_v59 = vmul.f32 %v1423_v33, %v781_v58  ;;  %v758_v60 = vld [vmem:[%s1324_s11 + $0x28] sm:$0xff]  ;;  %747 = vst.msk [vmem:[%s1324_s11 + $0xe8] sm:$0xff] %vm346_vm2, %v714_v50  ;;  %v660_v61 = vpop.f32.mrf.mxu2  ;;  %v680_v62 = vpop.f32.mrf.mxu3 }
  0xd2   : > { %v845_v63 = vadd.f32 %v1428_v40, %v809_v57  ;;  %v794_v0 = vmul.f32 %v1423_v33, %v758_v60  ;;  %v766_v1 = vld [vmem:[%s1324_s11 + $0x68] sm:$0xff]  ;;  %724 = vst.msk [vmem:[%s1324_s11 + $0x30] sm:$0xff] %vm346_vm2, %v691_v52  ;;  %v707_v2 = vadd.f32 %v660_v61, %v401_v55  ;;  %v715_v3 = vadd.f32 %v680_v62, %v409_v56  ;;  %v622_v11 = vpop.f32.mrf.mxu0  ;;  %v642_v15 = vpop.f32.mrf.mxu1 }
  0xd3   : > { %v853_v4 = vadd.f32 %v1428_v40, %v817_v59  ;;  %v802_v5 = vmul.f32 %v1423_v33, %v766_v1  ;;  %v774_v6 = vld [vmem:[%s1324_s11 + $0xa8] sm:$0xff]  ;;  %732 = vst.msk [vmem:[%s1324_s11 + $0x70] sm:$0xff] %vm346_vm2, %v699_v54  ;;  %v692_v19 = vadd.f32 %v622_v11, %v386_v10  ;;  %v700_v24 = vadd.f32 %v642_v15, %v394_v14 }
  0xd4   : > { %v881_v7 = vmax.f32 %v845_v63, %v1437_v45  ;;  %v830_v8 = vadd.f32 %v1428_v40, %v794_v0  ;;  %v810_v9 = vmul.f32 %v1423_v33, %v774_v6  ;;  %740 = vst.msk [vmem:[%s1324_s11 + $0xb0] sm:$0xff] %vm346_vm2, %v707_v2 }
  0xd5   : > { %v889_v12 = vmax.f32 %v853_v4, %v1437_v45  ;;  %v838_v13 = vadd.f32 %v1428_v40, %v802_v5  ;;  %748 = vst.msk [vmem:[%s1324_s11 + $0xf0] sm:$0xff] %vm346_vm2, %v715_v3 }
  0xd6   : > { %913 = vst.msk [vmem:[%s1324_s11 + $0xa0] sm:$0xff] %vm346_vm2, %v881_v7  ;;  %v866_v16 = vmax.f32 %v830_v8, %v1437_v45  ;;  %v846_v17 = vadd.f32 %v1428_v40, %v810_v9 }
  0xd7   : > { %921 = vst.msk [vmem:[%s1324_s11 + $0xe0] sm:$0xff] %vm346_vm2, %v889_v12  ;;  %v874_v18 = vmax.f32 %v838_v13, %v1437_v45 }
  0xd8   : > { %898 = vst.msk [vmem:[%s1324_s11 + $0x28] sm:$0xff] %vm346_vm2, %v866_v16  ;;  %v882_v22 = vmax.f32 %v846_v17, %v1437_v45  ;;  %v782_v23 = vld [vmem:[%s1324_s11 + $0xe8] sm:$0xff] }
  0xd9   : > { %906 = vst.msk [vmem:[%s1324_s11 + $0x68] sm:$0xff] %vm346_vm2, %v874_v18  ;;  %v818_v25 = vmul.f32 %v1423_v33, %v782_v23  ;;  %v759_v26 = vld [vmem:[%s1324_s11 + $0x30] sm:$0xff]  ;;  %v662_v27 = vpop.f32.mrf.mxu2  ;;  %v682_v28 = vpop.f32.mrf.mxu3 }
  0xda   : > { %914 = vst.msk [vmem:[%s1324_s11 + $0xa8] sm:$0xff] %vm346_vm2, %v882_v22  ;;  %v795_v29 = vmul.f32 %v1423_v33, %v759_v26  ;;  %v767_v30 = vld [vmem:[%s1324_s11 + $0x70] sm:$0xff]  ;;  %v708_v31 = vadd.f32 %v662_v27, %v402_v20  ;;  %v716_v32 = vadd.f32 %v682_v28, %v410_v21 }
  0xdb   : > { %v854_v34 = vadd.f32 %v1428_v40, %v818_v25  ;;  %v803_v35 = vmul.f32 %v1423_v33, %v767_v30  ;;  %v775_v36 = vld [vmem:[%s1324_s11 + $0xb0] sm:$0xff]  ;;  %725 = vst.msk [vmem:[%s1324_s11 + $0x38] sm:$0xff] %vm346_vm2, %v692_v19 }
  0xdc   : > { %v831_v37 = vadd.f32 %v1428_v40, %v795_v29  ;;  %v811_v38 = vmul.f32 %v1423_v33, %v775_v36  ;;  %v783_v39 = vld [vmem:[%s1324_s11 + $0xf0] sm:$0xff]  ;;  %733 = vst.msk [vmem:[%s1324_s11 + $0x78] sm:$0xff] %vm346_vm2, %v700_v24 }
  0xdd   : > { %v890_v41 = vmax.f32 %v854_v34, %v1437_v45  ;;  %v839_v42 = vadd.f32 %v1428_v40, %v803_v35  ;;  %v819_v43 = vmul.f32 %v1423_v33, %v783_v39  ;;  %741 = vst.msk [vmem:[%s1324_s11 + $0xb8] sm:$0xff] %vm346_vm2, %v708_v31 }
  0xde   : > { %v867_v44 = vmax.f32 %v831_v37, %v1437_v45  ;;  %v847_v46 = vadd.f32 %v1428_v40, %v811_v38  ;;  %749 = vst.msk [vmem:[%s1324_s11 + $0xf8] sm:$0xff] %vm346_vm2, %v716_v32 }
  0xdf   : > { %922 = vst.msk [vmem:[%s1324_s11 + $0xe8] sm:$0xff] %vm346_vm2, %v890_v41  ;;  %v875_v47 = vmax.f32 %v839_v42, %v1437_v45  ;;  %v855_v48 = vadd.f32 %v1428_v40, %v819_v43 }
  0xe0   : > { %899 = vst.msk [vmem:[%s1324_s11 + $0x30] sm:$0xff] %vm346_vm2, %v867_v44  ;;  %v883_v49 = vmax.f32 %v847_v46, %v1437_v45 }
  0xe1   : > { %907 = vst.msk [vmem:[%s1324_s11 + $0x70] sm:$0xff] %vm346_vm2, %v875_v47  ;;  %v891_v50 = vmax.f32 %v855_v48, %v1437_v45 }
  0xe2   : > { %915 = vst.msk [vmem:[%s1324_s11 + $0xb0] sm:$0xff] %vm346_vm2, %v883_v49  ;;  %v760_v51 = vld [vmem:[%s1324_s11 + $0x38] sm:$0xff] }
  0xe3   : > { %923 = vst.msk [vmem:[%s1324_s11 + $0xf0] sm:$0xff] %vm346_vm2, %v891_v50  ;;  %v796_v52 = vmul.f32 %v1423_v33, %v760_v51  ;;  %v768_v53 = vld [vmem:[%s1324_s11 + $0x78] sm:$0xff] }
  0xe4   : > { %v804_v54 = vmul.f32 %v1423_v33, %v768_v53  ;;  %v776_v55 = vld [vmem:[%s1324_s11 + $0xb8] sm:$0xff] }
  0xe5   : > { %v832_v56 = vadd.f32 %v1428_v40, %v796_v52  ;;  %v812_v57 = vmul.f32 %v1423_v33, %v776_v55  ;;  %v784_v58 = vld [vmem:[%s1324_s11 + $0xf8] sm:$0xff] }
  0xe6   : > { %v840_v59 = vadd.f32 %v1428_v40, %v804_v54  ;;  %v820_v60 = vmul.f32 %v1423_v33, %v784_v58 }
  0xe7   : > { %v868_v61 = vmax.f32 %v832_v56, %v1437_v45  ;;  %v848_v62 = vadd.f32 %v1428_v40, %v812_v57 }
  0xe8   : > { %v876_v63 = vmax.f32 %v840_v59, %v1437_v45  ;;  %v856_v0 = vadd.f32 %v1428_v40, %v820_v60 }
  0xe9   : > { %900 = vst.msk [vmem:[%s1324_s11 + $0x38] sm:$0xff] %vm346_vm2, %v868_v61  ;;  %v884_v1 = vmax.f32 %v848_v62, %v1437_v45 }
  0xea   : > { %908 = vst.msk [vmem:[%s1324_s11 + $0x78] sm:$0xff] %vm346_vm2, %v876_v63  ;;  %v892_v2 = vmax.f32 %v856_v0, %v1437_v45 }
  0xeb   : > { %916 = vst.msk [vmem:[%s1324_s11 + $0xb8] sm:$0xff] %vm346_vm2, %v884_v1 }
  0xec   : > { %924 = vst.msk [vmem:[%s1324_s11 + $0xf8] sm:$0xff] %vm346_vm2, %v892_v2 }
  0xed PF: > { %s15_s20 = sadd.s32 1, %s1240_s20   ;;  %s1728_s18 = smov %s1236_s19 }
  0xee   : > { %p12_p5 = scmp.ge.s32.totalorder %s15_s20, 4   ;;  %s1729_s19 = smov %s1731_s21 }
  0xf0   :  { %14 = sbr.rel (!%p12_p5) target bundleno = 2 (0x2), region = 90 }

// kernel: forward.8
= control target key start
LH: loop header
LB: loop body
LE: loop exit
PB: predicated region body
PF: predicated region fallthrough
CT: control target
= control target key end

     0   :  { %s1387_s18 = smov 0   ;;  %s1389_s19 = smov 0   ;;  %s1846_s0 = inlined_call_operand.vmem [shape: bf16[512,72], index: 0, kind: input, shape index: {}]   ;;  %s1847_s1 = inlined_call_operand.vmem [shape: bf16[72,8], index: 1, kind: input, shape index: {}]   ;;  %s1848_s2 = inlined_call_operand.vmem [shape: f32[1,8], index: 2, kind: input, shape index: {}]   ;;  %s1849_s3 = inlined_call_operand.vmem [shape: f32[1,8], index: 3, kind: input, shape index: {}]   ;;  %s1850_s4 = inlined_call_operand.vmem [shape: f32[512,8], index: 4, kind: input, shape index: {}]   ;;  %s1851_s5 = inlined_call_operand.vmem [shape: f32[512,8], index: 5, kind: output, shape index: {}]  }
   0x1   :  { %s1391_s20 = smov 0  }
   0x2 LB: > { %s34_s21 = sadd.s32 1, %s1350_s19  ;;  %p1165_p0 = scmp.ge.s32.totalorder %s1354_s20, 1  ;;  %s1354_s20 = sphi %s1391_s20, %s15_s20   ;;  %s1350_s19 = sphi %s1389_s19, %s1853_s19   ;;  %s1346_s18 = sphi %s1387_s18, %s1852_s18  }
   0x3   : > { %p36_p1 = scmp.ge.s32.totalorder %s34_s21, 2  ;;  %p262_p2 = scmp.lt.s32.totalorder %s1354_s20, 3 }
   0x5   : > { %s1855_s21 = smov (%p36_p1, %s34_s21), 0  ;;  %p263_p3 = pnand %p1165_p0, %p262_p2 }
   0x6   : > { %s1166_s24 = sshll.u32 (!%p263_p3), %s1346_s18, 5 }
   0x7   : > { %266 = sbr.rel (%p263_p3) target bundleno = 247 (0xf7), region = 40  ;;  %p319_p4 = scmp.lt.s32.totalorder (!%p263_p3), %s1166_s24, 63 }
   0xc   : > { %v470_v0 = vld [vmem:[%s1847_s1 + $0x20] sm:$0xf]  ;;  %vm627_vm0 = vcmask 1043456   ;;  %v1289_v4 = vld [vmem:[%s1847_s1 + $0x18] sm:$0xff]  ;;  %v1288_v5 = vld [vmem:[%s1847_s1 + $0x10] sm:$0xff]  ;;  %s1857_s24 = smov (!%p319_p4, %s1166_s24), 63 }
   0xd   : > { %v568_v1 = vunpack.c.l.b16 %v470_v0  ;;  %v1287_v6 = vld [vmem:[%s1847_s1 + $0x8] sm:$0xff]  ;;  %s1167_s6 = sshll.u32 %s1857_s24, 2  ;;  %v1286_v7 = vld [vmem:[%s1847_s1] sm:$0xff]  ;;  %vm578_vm1 = vcmask 588800   ;;  %s1169_s12 = sshll.u32 %s1857_s24, 3  ;;  %vm365_vm2 = vcmask 64512  }
   0xe   : > { %s1426_s11 = scalar_lea.vmem %s1846_s0, %s1167_s6  ;;  %s1446_s15 = scalar_lea.vmem %s1851_s5, %s1169_s12  ;;  %v1356_v16 = vmov 0.0   ;;  %v1545_v35 = vld [vmem:[%s1848_s2] ss:$0 sm:$0xff] }
   0xf   : > { %v573_v2 = vpack.c.b16 %v568_v1, %v568_v1  ;;  %v1270_v8 = vld [vmem:[%s1426_s11] sm:$0xff]  ;;  %v1271_v12 = vld [vmem:[%s1426_s11 + $0x8] sm:$0xff]  ;;  %366 = vst.msk [vmem:[%s1446_s15] sm:$0xff] %vm365_vm2, %v1356_v16  ;;  %v1272_v17 = vld [vmem:[%s1426_s11 + $0x10] sm:$0xff]  ;;  %s1552_s23 = scalar_lea.vmem %s1850_s4, %s1169_s12 }
  0x10   : > { %v1274_v9 = vld [vmem:[%s1426_s11 + $0x20] sm:$0xff]  ;;  %v1275_v13 = vld [vmem:[%s1426_s11 + $0x28] sm:$0xff]  ;;  %367 = vst.msk [vmem:[%s1446_s15 + $0x8] sm:$0xff] %vm365_vm2, %v1356_v16  ;;  %v1276_v18 = vld [vmem:[%s1426_s11 + $0x30] sm:$0xff] }
  0x11   : > { %v629_v3 = vsel %vm627_vm0, %v573_v2, 0  ;;  %v1278_v10 = vld [vmem:[%s1426_s11 + $0x40] sm:$0xff]  ;;  %v1279_v14 = vld [vmem:[%s1426_s11 + $0x48] sm:$0xff]  ;;  %368 = vst.msk [vmem:[%s1446_s15 + $0x10] sm:$0xff] %vm365_vm2, %v1356_v16  ;;  %v1280_v19 = vld [vmem:[%s1426_s11 + $0x50] sm:$0xff] }
  0x12   : > { %634 = vmatpush.bf16.msra.mxu0 %v629_v3  ;;  %1290 = vmatpush.bf16.msra.mxu1 %v629_v3  ;;  %v1282_v11 = vld [vmem:[%s1426_s11 + $0x60] sm:$0xff]  ;;  %v1283_v15 = vld [vmem:[%s1426_s11 + $0x68] sm:$0xff]  ;;  %369 = vst.msk [vmem:[%s1446_s15 + $0x18] sm:$0xff] %vm365_vm2, %v1356_v16  ;;  %v1284_v20 = vld [vmem:[%s1426_s11 + $0x70] sm:$0xff] }
  0x13   : > { %1291 = vmatpush.bf16.msra.mxu2 %v629_v3  ;;  %1292 = vmatpush.bf16.msra.mxu3 %v629_v3  ;;  %370 = vst.msk [vmem:[%s1446_s15 + $0x20] sm:$0xff] %vm365_vm2, %v1356_v16  ;;  %v1273_v21 = vld [vmem:[%s1426_s11 + $0x18] sm:$0xff]  ;;  %v1557_v42 = vld [vmem:[%s1849_s3] ss:$0 sm:$0xff] }
  0x14   : > { %371 = vst.msk [vmem:[%s1446_s15 + $0x28] sm:$0xff] %vm365_vm2, %v1356_v16  ;;  %v1277_v22 = vld [vmem:[%s1426_s11 + $0x38] sm:$0xff]  ;;  %v892_v48 = vld [vmem:[%s1552_s23] sm:$0xff] }
  0x15   : > { %372 = vst.msk [vmem:[%s1446_s15 + $0x30] sm:$0xff] %vm365_vm2, %v1356_v16  ;;  %v1281_v23 = vld [vmem:[%s1426_s11 + $0x58] sm:$0xff]  ;;  %v900_v51 = vld [vmem:[%s1552_s23 + $0x40] sm:$0xff] }
  0x16   : > { %635 = vmatpush.bf16.msra.mxu0 %v1289_v4  ;;  %1293 = vmatpush.bf16.msra.mxu1 %v1289_v4  ;;  %373 = vst.msk [vmem:[%s1446_s15 + $0x38] sm:$0xff] %vm365_vm2, %v1356_v16  ;;  %v1285_v24 = vld [vmem:[%s1426_s11 + $0x78] sm:$0xff]  ;;  %v398_v25 = vld [vmem:[%s1446_s15] sm:$0xff] }
  0x17   : > { %1294 = vmatpush.bf16.msra.mxu2 %v1289_v4  ;;  %1295 = vmatpush.bf16.msra.mxu3 %v1289_v4  ;;  %374 = vst.msk [vmem:[%s1446_s15 + $0x40] sm:$0xff] %vm365_vm2, %v1356_v16  ;;  %v399_v33 = vld [vmem:[%s1446_s15 + $0x8] sm:$0xff] }
  0x18   : > { %375 = vst.msk [vmem:[%s1446_s15 + $0x48] sm:$0xff] %vm365_vm2, %v1356_v16  ;;  %v400_v58 = vld [vmem:[%s1446_s15 + $0x10] sm:$0xff] }
  0x19   : > { %376 = vst.msk [vmem:[%s1446_s15 + $0x50] sm:$0xff] %vm365_vm2, %v1356_v16 }
  0x1a   : > { %636 = vmatpush.bf16.msra.mxu0 %v1288_v5  ;;  %1296 = vmatpush.bf16.msra.mxu1 %v1288_v5  ;;  %377 = vst.msk [vmem:[%s1446_s15 + $0x58] sm:$0xff] %vm365_vm2, %v1356_v16 }
  0x1b   : > { %1297 = vmatpush.bf16.msra.mxu2 %v1288_v5  ;;  %1298 = vmatpush.bf16.msra.mxu3 %v1288_v5  ;;  %378 = vst.msk [vmem:[%s1446_s15 + $0x60] sm:$0xff] %vm365_vm2, %v1356_v16 }
  0x1c   : > { %379 = vst.msk [vmem:[%s1446_s15 + $0x68] sm:$0xff] %vm365_vm2, %v1356_v16 }
  0x1d   : > { %380 = vst.msk [vmem:[%s1446_s15 + $0x70] sm:$0xff] %vm365_vm2, %v1356_v16 }
  0x1e   : > { %637 = vmatpush.bf16.msra.mxu0 %v1287_v6  ;;  %1299 = vmatpush.bf16.msra.mxu1 %v1287_v6  ;;  %381 = vst.msk [vmem:[%s1446_s15 + $0x78] sm:$0xff] %vm365_vm2, %v1356_v16  ;;  %v406_v26 = vld [vmem:[%s1446_s15 + $0x40] sm:$0xff] }
  0x1f   : > { %1300 = vmatpush.bf16.msra.mxu2 %v1287_v6  ;;  %1301 = vmatpush.bf16.msra.mxu3 %v1287_v6  ;;  %382 = vst.msk [vmem:[%s1446_s15 + $0x80] sm:$0xff] %vm365_vm2, %v1356_v16  ;;  %v407_v34 = vld [vmem:[%s1446_s15 + $0x48] sm:$0xff] }
  0x20   : > { %383 = vst.msk [vmem:[%s1446_s15 + $0x88] sm:$0xff] %vm365_vm2, %v1356_v16  ;;  %v408_v62 = vld [vmem:[%s1446_s15 + $0x50] sm:$0xff] }
  0x21   : > { %384 = vst.msk [vmem:[%s1446_s15 + $0x90] sm:$0xff] %vm365_vm2, %v1356_v16 }
  0x22   : > { %638 = vmatpush.bf16.msra.mxu0 %v1286_v7  ;;  %1302 = vmatpush.bf16.msra.mxu1 %v1286_v7  ;;  %385 = vst.msk [vmem:[%s1446_s15 + $0x98] sm:$0xff] %vm365_vm2, %v1356_v16 }
  0x23   : > { %1303 = vmatpush.bf16.msra.mxu2 %v1286_v7  ;;  %1304 = vmatpush.bf16.msra.mxu3 %v1286_v7  ;;  %386 = vst.msk [vmem:[%s1446_s15 + $0xa0] sm:$0xff] %vm365_vm2, %v1356_v16  ;;  %v908_v7 = vld [vmem:[%s1552_s23 + $0x80] sm:$0xff] }
  0x24   : > { %387 = vst.msk [vmem:[%s1446_s15 + $0xa8] sm:$0xff] %vm365_vm2, %v1356_v16 }
  0x25   : > { %1252 = vmatmul.msk.bf16.vlgmr.msra.gmra.mxu0 %vm578_vm1, %v1270_v8  ;;  %1256 = vmatmul.msk.bf16.vlgmr.msra.gmra.mxu1 %vm578_vm1, %v1274_v9  ;;  %388 = vst.msk [vmem:[%s1446_s15 + $0xb0] sm:$0xff] %vm365_vm2, %v1356_v16 }
  0x26   : > { %1260 = vmatmul.msk.bf16.vlgmr.msra.gmra.mxu2 %vm578_vm1, %v1278_v10  ;;  %1264 = vmatmul.msk.bf16.vlgmr.msra.gmra.mxu3 %vm578_vm1, %v1282_v11  ;;  %389 = vst.msk [vmem:[%s1446_s15 + $0xb8] sm:$0xff] %vm365_vm2, %v1356_v16  ;;  %v414_v31 = vld [vmem:[%s1446_s15 + $0x80] sm:$0xff] }
  0x27   : > { %390 = vst.msk [vmem:[%s1446_s15 + $0xc0] sm:$0xff] %vm365_vm2, %v1356_v16  ;;  %v415_v52 = vld [vmem:[%s1446_s15 + $0x88] sm:$0xff] }
  0x28   : > { %391 = vst.msk [vmem:[%s1446_s15 + $0xc8] sm:$0xff] %vm365_vm2, %v1356_v16 }
  0x29   : > { %392 = vst.msk [vmem:[%s1446_s15 + $0xd0] sm:$0xff] %vm365_vm2, %v1356_v16 }
  0x2a   : > { %393 = vst.msk [vmem:[%s1446_s15 + $0xd8] sm:$0xff] %vm365_vm2, %v1356_v16 }
  0x2b   : > { %394 = vst.msk [vmem:[%s1446_s15 + $0xe0] sm:$0xff] %vm365_vm2, %v1356_v16 }
  0x2c   : > { %395 = vst.msk [vmem:[%s1446_s15 + $0xe8] sm:$0xff] %vm365_vm2, %v1356_v16 }
  0x2d   : > { %396 = vst.msk [vmem:[%s1446_s15 + $0xf0] sm:$0xff] %vm365_vm2, %v1356_v16 }
  0x2e   : > { %397 = vst.msk [vmem:[%s1446_s15 + $0xf8] sm:$0xff] %vm365_vm2, %v1356_v16  ;;  %v422_v32 = vld [vmem:[%s1446_s15 + $0xc0] sm:$0xff]  ;;  %v893_v16 = vld [vmem:[%s1552_s23 + $0x8] sm:$0xff] }
  0x2f   : > { %v423_v54 = vld [vmem:[%s1446_s15 + $0xc8] sm:$0xff] }
  0x35   : > { %1253 = vmatmul.msk.bf16.gmra.mxu0 %vm578_vm1, %v1271_v12  ;;  %1257 = vmatmul.msk.bf16.gmra.mxu1 %vm578_vm1, %v1275_v13  ;;  %v916_v12 = vld [vmem:[%s1552_s23 + $0xc0] sm:$0xff] }
  0x36   : > { %1261 = vmatmul.msk.bf16.gmra.mxu2 %vm578_vm1, %v1279_v14  ;;  %1265 = vmatmul.msk.bf16.gmra.mxu3 %vm578_vm1, %v1283_v15 }
  0x45   : > { %1254 = vmatmul.msk.bf16.gmra.mxu0 %vm578_vm1, %v1272_v17  ;;  %1258 = vmatmul.msk.bf16.gmra.mxu1 %vm578_vm1, %v1276_v18 }
  0x46   : > { %1262 = vmatmul.msk.bf16.gmra.mxu2 %vm578_vm1, %v1280_v19  ;;  %1266 = vmatmul.msk.bf16.gmra.mxu3 %vm578_vm1, %v1284_v20  ;;  %v901_v20 = vld [vmem:[%s1552_s23 + $0x48] sm:$0xff] }
  0x55   : > { %1255 = vmatmul.msk.bf16.gmra.mxu0 %vm578_vm1, %v1273_v21  ;;  %1259 = vmatmul.msk.bf16.gmra.mxu1 %vm578_vm1, %v1277_v22 }
  0x56   : > { %1263 = vmatmul.msk.bf16.gmra.mxu2 %vm578_vm1, %v1281_v23  ;;  %1267 = vmatmul.msk.bf16.gmra.mxu3 %vm578_vm1, %v1285_v24  ;;  %v416_v23 = vld [vmem:[%s1446_s15 + $0x90] sm:$0xff] }
  0xa2   : > { %v640_v27 = vpop.f32.mrf.mxu0  ;;  %v660_v28 = vpop.f32.mrf.mxu1 }
  0xa3   : > { %v720_v29 = vadd.f32 %v640_v27, %v398_v25  ;;  %v728_v30 = vadd.f32 %v660_v28, %v406_v26  ;;  %v424_v28 = vld [vmem:[%s1446_s15 + $0xd0] sm:$0xff] }
  0xa5   : > { %753 = vst.msk [vmem:[%s1446_s15] sm:$0xff] %vm365_vm2, %v720_v29 }
  0xa6   : > { %761 = vst.msk [vmem:[%s1446_s15 + $0x40] sm:$0xff] %vm365_vm2, %v728_v30 }
  0xa9   : > { %v680_v36 = vpop.f32.mrf.mxu2  ;;  %v700_v37 = vpop.f32.mrf.mxu3 }
  0xaa   : > { %v736_v38 = vadd.f32 %v680_v36, %v414_v31  ;;  %v744_v39 = vadd.f32 %v700_v37, %v422_v32  ;;  %v642_v40 = vpop.f32.mrf.mxu0  ;;  %v662_v41 = vpop.f32.mrf.mxu1 }
  0xab   : > { %v721_v43 = vadd.f32 %v642_v40, %v399_v33  ;;  %v729_v44 = vadd.f32 %v662_v41, %v407_v34  ;;  %v401_v34 = vld [vmem:[%s1446_s15 + $0x18] sm:$0xff]  ;;  %v909_v41 = vld [vmem:[%s1552_s23 + $0x88] sm:$0xff] }
  0xac   : > { %v788_v45 = vld [vmem:[%s1446_s15] sm:$0xff]  ;;  %769 = vst.msk [vmem:[%s1446_s15 + $0x80] sm:$0xff] %vm365_vm2, %v736_v38 }
  0xad   : > { %v824_v46 = vmul.f32 %v1545_v35, %v788_v45  ;;  %v796_v47 = vld [vmem:[%s1446_s15 + $0x40] sm:$0xff]  ;;  %777 = vst.msk [vmem:[%s1446_s15 + $0xc0] sm:$0xff] %vm365_vm2, %v744_v39  ;;  %v409_v39 = vld [vmem:[%s1446_s15 + $0x58] sm:$0xff] }
  0xae   : > { %v832_v49 = vmul.f32 %v1545_v35, %v796_v47  ;;  %754 = vst.msk [vmem:[%s1446_s15 + $0x8] sm:$0xff] %vm365_vm2, %v721_v43 }
  0xaf   : > { %v860_v50 = vadd.f32 %v1557_v42, %v824_v46  ;;  %762 = vst.msk [vmem:[%s1446_s15 + $0x48] sm:$0xff] %vm365_vm2, %v729_v44 }
  0xb0   : > { %v868_v53 = vadd.f32 %v1557_v42, %v832_v49 }
  0xb1   : > { %v924_v55 = vadd.f32 %v892_v48, %v860_v50  ;;  %v682_v56 = vpop.f32.mrf.mxu2  ;;  %v702_v57 = vpop.f32.mrf.mxu3  ;;  %v417_v50 = vld [vmem:[%s1446_s15 + $0x98] sm:$0xff] }
  0xb2   : > { %v932_v59 = vadd.f32 %v900_v51, %v868_v53  ;;  %v737_v60 = vadd.f32 %v682_v56, %v415_v52  ;;  %v645_v61 = vpop.f32.mrf.mxu0  ;;  %v665_v63 = vpop.f32.mrf.mxu1  ;;  %v745_v2 = vadd.f32 %v702_v57, %v423_v54  ;;  %v425_v51 = vld [vmem:[%s1446_s15 + $0xd8] sm:$0xff]  ;;  %v917_v53 = vld [vmem:[%s1552_s23 + $0xc8] sm:$0xff]  ;;  %v894_v57 = vld [vmem:[%s1552_s23 + $0x10] sm:$0xff] }
  0xb3   : > { %v956_v0 = vmax.f32 %v924_v55, 0.0  ;;  %v804_v1 = vld [vmem:[%s1446_s15 + $0x80] sm:$0xff]  ;;  %v722_v6 = vadd.f32 %v645_v61, %v400_v58  ;;  %v730_v10 = vadd.f32 %v665_v63, %v408_v62  ;;  %v902_v63 = vld [vmem:[%s1552_s23 + $0x50] sm:$0xff] }
  0xb4   : > { %v964_v3 = vmax.f32 %v932_v59, 0.0  ;;  %v840_v4 = vmul.f32 %v1545_v35, %v804_v1  ;;  %v812_v5 = vld [vmem:[%s1446_s15 + $0xc0] sm:$0xff]  ;;  %770 = vst.msk [vmem:[%s1446_s15 + $0x88] sm:$0xff] %vm365_vm2, %v737_v60 }
  0xb5   : > { %988 = vst.msk [vmem:[%s1446_s15] sm:$0xff] %vm365_vm2, %v956_v0  ;;  %v848_v8 = vmul.f32 %v1545_v35, %v812_v5  ;;  %v789_v9 = vld [vmem:[%s1446_s15 + $0x8] sm:$0xff] }
  0xb6   : > { %996 = vst.msk [vmem:[%s1446_s15 + $0x40] sm:$0xff] %vm365_vm2, %v964_v3  ;;  %v876_v11 = vadd.f32 %v1557_v42, %v840_v4  ;;  %v825_v13 = vmul.f32 %v1545_v35, %v789_v9  ;;  %v797_v14 = vld [vmem:[%s1446_s15 + $0x48] sm:$0xff] }
  0xb7   : > { %v884_v15 = vadd.f32 %v1557_v42, %v848_v8  ;;  %v833_v17 = vmul.f32 %v1545_v35, %v797_v14  ;;  %778 = vst.msk [vmem:[%s1446_s15 + $0xc8] sm:$0xff] %vm365_vm2, %v745_v2  ;;  %v410_v8 = vld [vmem:[%s1446_s15 + $0x60] sm:$0xff] }
  0xb8   : > { %v940_v18 = vadd.f32 %v908_v7, %v876_v11  ;;  %v861_v19 = vadd.f32 %v1557_v42, %v825_v13  ;;  %755 = vst.msk [vmem:[%s1446_s15 + $0x10] sm:$0xff] %vm365_vm2, %v722_v6  ;;  %v402_v6 = vld [vmem:[%s1446_s15 + $0x20] sm:$0xff] }
  0xb9   : > { %v948_v21 = vadd.f32 %v916_v12, %v884_v15  ;;  %v869_v22 = vadd.f32 %v1557_v42, %v833_v17  ;;  %763 = vst.msk [vmem:[%s1446_s15 + $0x50] sm:$0xff] %vm365_vm2, %v730_v10  ;;  %v685_v24 = vpop.f32.mrf.mxu2  ;;  %v705_v25 = vpop.f32.mrf.mxu3  ;;  %v426_v17 = vld [vmem:[%s1446_s15 + $0xe0] sm:$0xff] }
  0xba   : > { %v972_v26 = vmax.f32 %v940_v18, 0.0  ;;  %v925_v27 = vadd.f32 %v893_v16, %v861_v19  ;;  %v647_v29 = vpop.f32.mrf.mxu0  ;;  %v667_v30 = vpop.f32.mrf.mxu1  ;;  %v738_v38 = vadd.f32 %v685_v24, %v416_v23  ;;  %v746_v43 = vadd.f32 %v705_v25, %v424_v28  ;;  %v418_v16 = vld [vmem:[%s1446_s15 + $0xa0] sm:$0xff]  ;;  %v918_v28 = vld [vmem:[%s1552_s23 + $0xd0] sm:$0xff] }
  0xbb   : > { %v980_v31 = vmax.f32 %v948_v21, 0.0  ;;  %v933_v32 = vadd.f32 %v901_v20, %v869_v22  ;;  %v805_v33 = vld [vmem:[%s1446_s15 + $0x88] sm:$0xff]  ;;  %v723_v46 = vadd.f32 %v647_v29, %v401_v34  ;;  %v731_v49 = vadd.f32 %v667_v30, %v409_v39  ;;  %v910_v22 = vld [vmem:[%s1552_s23 + $0x90] sm:$0xff] }
  0xbc   : > { %1004 = vst.msk [vmem:[%s1446_s15 + $0x80] sm:$0xff] %vm365_vm2, %v972_v26  ;;  %v957_v36 = vmax.f32 %v925_v27, 0.0  ;;  %v841_v37 = vmul.f32 %v1545_v35, %v805_v33  ;;  %v403_v20 = vld [vmem:[%s1446_s15 + $0x28] sm:$0xff] }
  0xbd   : > { %1012 = vst.msk [vmem:[%s1446_s15 + $0xc0] sm:$0xff] %vm365_vm2, %v980_v31  ;;  %v965_v40 = vmax.f32 %v933_v32, 0.0  ;;  %v411_v21 = vld [vmem:[%s1446_s15 + $0x68] sm:$0xff] }
  0xbe   : > { %989 = vst.msk [vmem:[%s1446_s15 + $0x8] sm:$0xff] %vm365_vm2, %v957_v36  ;;  %v877_v44 = vadd.f32 %v1557_v42, %v841_v37  ;;  %v813_v45 = vld [vmem:[%s1446_s15 + $0xc8] sm:$0xff]  ;;  %v895_v37 = vld [vmem:[%s1552_s23 + $0x18] sm:$0xff] }
  0xbf   : > { %997 = vst.msk [vmem:[%s1446_s15 + $0x48] sm:$0xff] %vm365_vm2, %v965_v40  ;;  %v849_v47 = vmul.f32 %v1545_v35, %v813_v45  ;;  %v790_v48 = vld [vmem:[%s1446_s15 + $0x10] sm:$0xff] }
  0xc0   : > { %v941_v52 = vadd.f32 %v909_v41, %v877_v44  ;;  %v826_v54 = vmul.f32 %v1545_v35, %v790_v48  ;;  %v798_v55 = vld [vmem:[%s1446_s15 + $0x50] sm:$0xff]  ;;  %771 = vst.msk [vmem:[%s1446_s15 + $0x90] sm:$0xff] %vm365_vm2, %v738_v38  ;;  %v903_v44 = vld [vmem:[%s1552_s23 + $0x58] sm:$0xff] }
  0xc1   : > { %v885_v56 = vadd.f32 %v1557_v42, %v849_v47  ;;  %v834_v58 = vmul.f32 %v1545_v35, %v798_v55  ;;  %779 = vst.msk [vmem:[%s1446_s15 + $0xd0] sm:$0xff] %vm365_vm2, %v746_v43  ;;  %v687_v59 = vpop.f32.mrf.mxu2  ;;  %v707_v60 = vpop.f32.mrf.mxu3 }
  0xc2   : > { %v973_v61 = vmax.f32 %v941_v52, 0.0  ;;  %v862_v62 = vadd.f32 %v1557_v42, %v826_v54  ;;  %756 = vst.msk [vmem:[%s1446_s15 + $0x18] sm:$0xff] %vm365_vm2, %v723_v46  ;;  %v739_v0 = vadd.f32 %v687_v59, %v417_v50  ;;  %v747_v1 = vadd.f32 %v707_v60, %v425_v51  ;;  %v650_v2 = vpop.f32.mrf.mxu0  ;;  %v670_v3 = vpop.f32.mrf.mxu1  ;;  %v911_v52 = vld [vmem:[%s1552_s23 + $0x98] sm:$0xff] }
  0xc3   : > { %v949_v4 = vadd.f32 %v917_v53, %v885_v56  ;;  %v870_v5 = vadd.f32 %v1557_v42, %v834_v58  ;;  %764 = vst.msk [vmem:[%s1446_s15 + $0x58] sm:$0xff] %vm365_vm2, %v731_v49  ;;  %v724_v12 = vadd.f32 %v650_v2, %v402_v6  ;;  %v732_v15 = vadd.f32 %v670_v3, %v410_v8  ;;  %v419_v58 = vld [vmem:[%s1446_s15 + $0xa8] sm:$0xff]  ;;  %v404_v3 = vld [vmem:[%s1446_s15 + $0x30] sm:$0xff] }
  0xc4   : > { %1005 = vst.msk [vmem:[%s1446_s15 + $0x88] sm:$0xff] %vm365_vm2, %v973_v61  ;;  %v926_v7 = vadd.f32 %v894_v57, %v862_v62  ;;  %v919_v57 = vld [vmem:[%s1552_s23 + $0xd8] sm:$0xff]  ;;  %v427_v61 = vld [vmem:[%s1446_s15 + $0xe8] sm:$0xff] }
  0xc5   : > { %v981_v9 = vmax.f32 %v949_v4, 0.0  ;;  %v934_v10 = vadd.f32 %v902_v63, %v870_v5  ;;  %772 = vst.msk [vmem:[%s1446_s15 + $0x98] sm:$0xff] %vm365_vm2, %v739_v0 }
  0xc6   : > { %v958_v11 = vmax.f32 %v926_v7, 0.0  ;;  %780 = vst.msk [vmem:[%s1446_s15 + $0xd8] sm:$0xff] %vm365_vm2, %v747_v1 }
  0xc7   : > { %1013 = vst.msk [vmem:[%s1446_s15 + $0xc8] sm:$0xff] %vm365_vm2, %v981_v9  ;;  %v966_v13 = vmax.f32 %v934_v10, 0.0  ;;  %v806_v14 = vld [vmem:[%s1446_s15 + $0x90] sm:$0xff] }
  0xc8   : > { %990 = vst.msk [vmem:[%s1446_s15 + $0x10] sm:$0xff] %vm365_vm2, %v958_v11  ;;  %v842_v18 = vmul.f32 %v1545_v35, %v806_v14  ;;  %v814_v19 = vld [vmem:[%s1446_s15 + $0xd0] sm:$0xff] }
  0xc9   : > { %998 = vst.msk [vmem:[%s1446_s15 + $0x50] sm:$0xff] %vm365_vm2, %v966_v13  ;;  %v850_v23 = vmul.f32 %v1545_v35, %v814_v19  ;;  %v791_v24 = vld [vmem:[%s1446_s15 + $0x18] sm:$0xff]  ;;  %v690_v25 = vpop.f32.mrf.mxu2  ;;  %v710_v26 = vpop.f32.mrf.mxu3  ;;  %v412_v9 = vld [vmem:[%s1446_s15 + $0x70] sm:$0xff] }
  0xca   : > { %v878_v27 = vadd.f32 %v1557_v42, %v842_v18  ;;  %v827_v29 = vmul.f32 %v1545_v35, %v791_v24  ;;  %v799_v30 = vld [vmem:[%s1446_s15 + $0x58] sm:$0xff]  ;;  %757 = vst.msk [vmem:[%s1446_s15 + $0x20] sm:$0xff] %vm365_vm2, %v724_v12  ;;  %v740_v31 = vadd.f32 %v690_v25, %v418_v16  ;;  %v748_v32 = vadd.f32 %v710_v26, %v426_v17  ;;  %v652_v33 = vpop.f32.mrf.mxu0  ;;  %v672_v34 = vpop.f32.mrf.mxu1  ;;  %v896_v12 = vld [vmem:[%s1552_s23 + $0x20] sm:$0xff] }
  0xcb   : > { %v886_v36 = vadd.f32 %v1557_v42, %v850_v23  ;;  %v835_v38 = vmul.f32 %v1545_v35, %v799_v30  ;;  %765 = vst.msk [vmem:[%s1446_s15 + $0x60] sm:$0xff] %vm365_vm2, %v732_v15  ;;  %v725_v39 = vadd.f32 %v652_v33, %v403_v20  ;;  %v733_v40 = vadd.f32 %v672_v34, %v411_v21  ;;  %v904_v18 = vld [vmem:[%s1552_s23 + $0x60] sm:$0xff]  ;;  %v897_v34 = vld [vmem:[%s1552_s23 + $0x28] sm:$0xff] }
  0xcc   : > { %v942_v41 = vadd.f32 %v910_v22, %v878_v27  ;;  %v863_v43 = vadd.f32 %v1557_v42, %v827_v29  ;;  %v807_v45 = vld [vmem:[%s1446_s15 + $0x98] sm:$0xff]  ;;  %773 = vst.msk [vmem:[%s1446_s15 + $0xa0] sm:$0xff] %vm365_vm2, %v740_v31  ;;  %v912_v23 = vld [vmem:[%s1552_s23 + $0xa0] sm:$0xff] }
  0xcd   : > { %v950_v46 = vadd.f32 %v918_v28, %v886_v36  ;;  %v871_v47 = vadd.f32 %v1557_v42, %v835_v38  ;;  %v843_v48 = vmul.f32 %v1545_v35, %v807_v45  ;;  %v815_v49 = vld [vmem:[%s1446_s15 + $0xd8] sm:$0xff]  ;;  %781 = vst.msk [vmem:[%s1446_s15 + $0xe0] sm:$0xff] %vm365_vm2, %v748_v32  ;;  %v920_v29 = vld [vmem:[%s1552_s23 + $0xe0] sm:$0xff]  ;;  %v420_v45 = vld [vmem:[%s1446_s15 + $0xb0] sm:$0xff] }
  0xce   : > { %v974_v50 = vmax.f32 %v942_v41, 0.0  ;;  %v927_v51 = vadd.f32 %v895_v37, %v863_v43  ;;  %v851_v53 = vmul.f32 %v1545_v35, %v815_v49  ;;  %758 = vst.msk [vmem:[%s1446_s15 + $0x28] sm:$0xff] %vm365_vm2, %v725_v39 }
  0xcf   : > { %v982_v54 = vmax.f32 %v950_v46, 0.0  ;;  %v935_v55 = vadd.f32 %v903_v44, %v871_v47  ;;  %v879_v56 = vadd.f32 %v1557_v42, %v843_v48  ;;  %766 = vst.msk [vmem:[%s1446_s15 + $0x68] sm:$0xff] %vm365_vm2, %v733_v40  ;;  %v905_v40 = vld [vmem:[%s1552_s23 + $0x68] sm:$0xff] }
  0xd0   : > { %1006 = vst.msk [vmem:[%s1446_s15 + $0x90] sm:$0xff] %vm365_vm2, %v974_v50  ;;  %v959_v59 = vmax.f32 %v927_v51, 0.0  ;;  %v887_v60 = vadd.f32 %v1557_v42, %v851_v53  ;;  %v428_v50 = vld [vmem:[%s1446_s15 + $0xf0] sm:$0xff] }
  0xd1   : > { %1014 = vst.msk [vmem:[%s1446_s15 + $0xd0] sm:$0xff] %vm365_vm2, %v982_v54  ;;  %v967_v62 = vmax.f32 %v935_v55, 0.0  ;;  %v943_v63 = vadd.f32 %v911_v52, %v879_v56  ;;  %v792_v0 = vld [vmem:[%s1446_s15 + $0x20] sm:$0xff]  ;;  %v692_v1 = vpop.f32.mrf.mxu2  ;;  %v712_v2 = vpop.f32.mrf.mxu3  ;;  %v405_v54 = vld [vmem:[%s1446_s15 + $0x38] sm:$0xff] }
  0xd2   : > { %991 = vst.msk [vmem:[%s1446_s15 + $0x18] sm:$0xff] %vm365_vm2, %v959_v59  ;;  %v951_v4 = vadd.f32 %v919_v57, %v887_v60  ;;  %v828_v5 = vmul.f32 %v1545_v35, %v792_v0  ;;  %v800_v6 = vld [vmem:[%s1446_s15 + $0x60] sm:$0xff]  ;;  %v741_v7 = vadd.f32 %v692_v1, %v419_v58  ;;  %v655_v8 = vpop.f32.mrf.mxu0  ;;  %v675_v10 = vpop.f32.mrf.mxu1  ;;  %v749_v15 = vadd.f32 %v712_v2, %v427_v61  ;;  %v413_v59 = vld [vmem:[%s1446_s15 + $0x78] sm:$0xff] }
  0xd3   : > { %999 = vst.msk [vmem:[%s1446_s15 + $0x58] sm:$0xff] %vm365_vm2, %v967_v62  ;;  %v975_v11 = vmax.f32 %v943_v63, 0.0  ;;  %v836_v13 = vmul.f32 %v1545_v35, %v800_v6  ;;  %v808_v14 = vld [vmem:[%s1446_s15 + $0xa0] sm:$0xff]  ;;  %v726_v21 = vadd.f32 %v655_v8, %v404_v3  ;;  %v734_v26 = vadd.f32 %v675_v10, %v412_v9  ;;  %v913_v62 = vld [vmem:[%s1552_s23 + $0xa8] sm:$0xff]  ;;  %v421_v6 = vld [vmem:[%s1446_s15 + $0xb8] sm:$0xff] }
  0xd4   : > { %v983_v16 = vmax.f32 %v951_v4, 0.0  ;;  %v864_v17 = vadd.f32 %v1557_v42, %v828_v5  ;;  %v844_v19 = vmul.f32 %v1545_v35, %v808_v14  ;;  %v816_v20 = vld [vmem:[%s1446_s15 + $0xe0] sm:$0xff]  ;;  %774 = vst.msk [vmem:[%s1446_s15 + $0xa8] sm:$0xff] %vm365_vm2, %v741_v7  ;;  %v429_v7 = vld [vmem:[%s1446_s15 + $0xf8] sm:$0xff]  ;;  %v921_v9 = vld [vmem:[%s1552_s23 + $0xe8] sm:$0xff] }
  0xd5   : > { %1007 = vst.msk [vmem:[%s1446_s15 + $0x98] sm:$0xff] %vm365_vm2, %v975_v11  ;;  %v872_v22 = vadd.f32 %v1557_v42, %v836_v13  ;;  %v852_v24 = vmul.f32 %v1545_v35, %v816_v20  ;;  %v793_v25 = vld [vmem:[%s1446_s15 + $0x28] sm:$0xff]  ;;  %v898_v13 = vld [vmem:[%s1552_s23 + $0x30] sm:$0xff] }
  0xd6   : > { %1015 = vst.msk [vmem:[%s1446_s15 + $0xd8] sm:$0xff] %vm365_vm2, %v983_v16  ;;  %v928_v27 = vadd.f32 %v896_v12, %v864_v17  ;;  %v880_v28 = vadd.f32 %v1557_v42, %v844_v19  ;;  %v829_v30 = vmul.f32 %v1545_v35, %v793_v25  ;;  %v801_v31 = vld [vmem:[%s1446_s15 + $0x68] sm:$0xff]  ;;  %v906_v19 = vld [vmem:[%s1552_s23 + $0x70] sm:$0xff] }
  0xd7   : > { %v936_v32 = vadd.f32 %v904_v18, %v872_v22  ;;  %v888_v33 = vadd.f32 %v1557_v42, %v852_v24  ;;  %v837_v36 = vmul.f32 %v1545_v35, %v801_v31  ;;  %782 = vst.msk [vmem:[%s1446_s15 + $0xe8] sm:$0xff] %vm365_vm2, %v749_v15 }
  0xd8   : > { %v960_v37 = vmax.f32 %v928_v27, 0.0  ;;  %v944_v38 = vadd.f32 %v912_v23, %v880_v28  ;;  %v865_v39 = vadd.f32 %v1557_v42, %v829_v30  ;;  %759 = vst.msk [vmem:[%s1446_s15 + $0x30] sm:$0xff] %vm365_vm2, %v726_v21 }
  0xd9   : > { %v968_v41 = vmax.f32 %v936_v32, 0.0  ;;  %v952_v43 = vadd.f32 %v920_v29, %v888_v33  ;;  %v873_v44 = vadd.f32 %v1557_v42, %v837_v36  ;;  %767 = vst.msk [vmem:[%s1446_s15 + $0x70] sm:$0xff] %vm365_vm2, %v734_v26  ;;  %v695_v46 = vpop.f32.mrf.mxu2  ;;  %v715_v47 = vpop.f32.mrf.mxu3  ;;  %v914_v32 = vld [vmem:[%s1552_s23 + $0xb0] sm:$0xff] }
  0xda   : > { %992 = vst.msk [vmem:[%s1446_s15 + $0x20] sm:$0xff] %vm365_vm2, %v960_v37  ;;  %v976_v48 = vmax.f32 %v944_v38, 0.0  ;;  %v929_v49 = vadd.f32 %v897_v34, %v865_v39  ;;  %v657_v55 = vpop.f32.mrf.mxu0  ;;  %v742_v58 = vadd.f32 %v695_v46, %v420_v45  ;;  %v677_v60 = vpop.f32.mrf.mxu1  ;;  %v750_v63 = vadd.f32 %v715_v47, %v428_v50  ;;  %v922_v37 = vld [vmem:[%s1552_s23 + $0xf0] sm:$0xff]  ;;  %v907_v46 = vld [vmem:[%s1552_s23 + $0x78] sm:$0xff] }
  0xdb   : > { %1000 = vst.msk [vmem:[%s1446_s15 + $0x60] sm:$0xff] %vm365_vm2, %v968_v41  ;;  %v984_v51 = vmax.f32 %v952_v43, 0.0  ;;  %v937_v52 = vadd.f32 %v905_v40, %v873_v44  ;;  %v809_v53 = vld [vmem:[%s1446_s15 + $0xa8] sm:$0xff]  ;;  %v727_v2 = vadd.f32 %v657_v55, %v405_v54  ;;  %v735_v5 = vadd.f32 %v677_v60, %v413_v59  ;;  %v899_v41 = vld [vmem:[%s1552_s23 + $0x38] sm:$0xff] }
  0xdc   : > { %1008 = vst.msk [vmem:[%s1446_s15 + $0xa0] sm:$0xff] %vm365_vm2, %v976_v48  ;;  %v961_v56 = vmax.f32 %v929_v49, 0.0  ;;  %v845_v57 = vmul.f32 %v1545_v35, %v809_v53  ;;  %v915_v54 = vld [vmem:[%s1552_s23 + $0xb8] sm:$0xff] }
  0xdd   : > { %1016 = vst.msk [vmem:[%s1446_s15 + $0xe0] sm:$0xff] %vm365_vm2, %v984_v51  ;;  %v969_v61 = vmax.f32 %v937_v52, 0.0  ;;  %v923_v59 = vld [vmem:[%s1552_s23 + $0xf8] sm:$0xff] }
  0xde   : > { %993 = vst.msk [vmem:[%s1446_s15 + $0x28] sm:$0xff] %vm365_vm2, %v961_v56  ;;  %v881_v0 = vadd.f32 %v1557_v42, %v845_v57  ;;  %v817_v1 = vld [vmem:[%s1446_s15 + $0xe8] sm:$0xff] }
  0xdf   : > { %1001 = vst.msk [vmem:[%s1446_s15 + $0x68] sm:$0xff] %vm365_vm2, %v969_v61  ;;  %v853_v3 = vmul.f32 %v1545_v35, %v817_v1  ;;  %v794_v4 = vld [vmem:[%s1446_s15 + $0x30] sm:$0xff] }
  0xe0   : > { %v945_v8 = vadd.f32 %v913_v62, %v881_v0  ;;  %v830_v10 = vmul.f32 %v1545_v35, %v794_v4  ;;  %v802_v11 = vld [vmem:[%s1446_s15 + $0x70] sm:$0xff]  ;;  %775 = vst.msk [vmem:[%s1446_s15 + $0xb0] sm:$0xff] %vm365_vm2, %v742_v58 }
  0xe1   : > { %v889_v12 = vadd.f32 %v1557_v42, %v853_v3  ;;  %v838_v14 = vmul.f32 %v1545_v35, %v802_v11  ;;  %783 = vst.msk [vmem:[%s1446_s15 + $0xf0] sm:$0xff] %vm365_vm2, %v750_v63  ;;  %v697_v15 = vpop.f32.mrf.mxu2  ;;  %v717_v16 = vpop.f32.mrf.mxu3 }
  0xe2   : > { %v977_v17 = vmax.f32 %v945_v8, 0.0  ;;  %v866_v18 = vadd.f32 %v1557_v42, %v830_v10  ;;  %760 = vst.msk [vmem:[%s1446_s15 + $0x38] sm:$0xff] %vm365_vm2, %v727_v2  ;;  %v743_v20 = vadd.f32 %v697_v15, %v421_v6  ;;  %v751_v21 = vadd.f32 %v717_v16, %v429_v7 }
  0xe3   : > { %v953_v22 = vadd.f32 %v921_v9, %v889_v12  ;;  %v874_v23 = vadd.f32 %v1557_v42, %v838_v14  ;;  %768 = vst.msk [vmem:[%s1446_s15 + $0x78] sm:$0xff] %vm365_vm2, %v735_v5 }
  0xe4   : > { %1009 = vst.msk [vmem:[%s1446_s15 + $0xa8] sm:$0xff] %vm365_vm2, %v977_v17  ;;  %v930_v24 = vadd.f32 %v898_v13, %v866_v18 }
  0xe5   : > { %v985_v25 = vmax.f32 %v953_v22, 0.0  ;;  %v938_v26 = vadd.f32 %v906_v19, %v874_v23  ;;  %776 = vst.msk [vmem:[%s1446_s15 + $0xb8] sm:$0xff] %vm365_vm2, %v743_v20 }
  0xe6   : > { %v962_v27 = vmax.f32 %v930_v24, 0.0  ;;  %784 = vst.msk [vmem:[%s1446_s15 + $0xf8] sm:$0xff] %vm365_vm2, %v751_v21 }
  0xe7   : > { %1017 = vst.msk [vmem:[%s1446_s15 + $0xe8] sm:$0xff] %vm365_vm2, %v985_v25  ;;  %v970_v28 = vmax.f32 %v938_v26, 0.0  ;;  %v810_v29 = vld [vmem:[%s1446_s15 + $0xb0] sm:$0xff] }
  0xe8   : > { %994 = vst.msk [vmem:[%s1446_s15 + $0x30] sm:$0xff] %vm365_vm2, %v962_v27  ;;  %v846_v30 = vmul.f32 %v1545_v35, %v810_v29  ;;  %v818_v31 = vld [vmem:[%s1446_s15 + $0xf0] sm:$0xff] }
  0xe9   : > { %1002 = vst.msk [vmem:[%s1446_s15 + $0x70] sm:$0xff] %vm365_vm2, %v970_v28  ;;  %v854_v33 = vmul.f32 %v1545_v35, %v818_v31  ;;  %v795_v34 = vld [vmem:[%s1446_s15 + $0x38] sm:$0xff] }
  0xea   : > { %v882_v36 = vadd.f32 %v1557_v42, %v846_v30  ;;  %v831_v38 = vmul.f32 %v1545_v35, %v795_v34  ;;  %v803_v39 = vld [vmem:[%s1446_s15 + $0x78] sm:$0xff] }
  0xeb   : > { %v890_v40 = vadd.f32 %v1557_v42, %v854_v33  ;;  %v839_v43 = vmul.f32 %v1545_v35, %v803_v39 }
  0xec   : > { %v946_v44 = vadd.f32 %v914_v32, %v882_v36  ;;  %v867_v45 = vadd.f32 %v1557_v42, %v831_v38  ;;  %v811_v47 = vld [vmem:[%s1446_s15 + $0xb8] sm:$0xff] }
  0xed   : > { %v954_v48 = vadd.f32 %v922_v37, %v890_v40  ;;  %v875_v49 = vadd.f32 %v1557_v42, %v839_v43  ;;  %v847_v50 = vmul.f32 %v1545_v35, %v811_v47  ;;  %v819_v51 = vld [vmem:[%s1446_s15 + $0xf8] sm:$0xff] }
  0xee   : > { %v978_v52 = vmax.f32 %v946_v44, 0.0  ;;  %v931_v53 = vadd.f32 %v899_v41, %v867_v45  ;;  %v855_v55 = vmul.f32 %v1545_v35, %v819_v51 }
  0xef   : > { %v986_v56 = vmax.f32 %v954_v48, 0.0  ;;  %v939_v57 = vadd.f32 %v907_v46, %v875_v49  ;;  %v883_v58 = vadd.f32 %v1557_v42, %v847_v50 }
  0xf0   : > { %1010 = vst.msk [vmem:[%s1446_s15 + $0xb0] sm:$0xff] %vm365_vm2, %v978_v52  ;;  %v963_v60 = vmax.f32 %v931_v53, 0.0  ;;  %v891_v61 = vadd.f32 %v1557_v42, %v855_v55 }
  0xf1   : > { %1018 = vst.msk [vmem:[%s1446_s15 + $0xf0] sm:$0xff] %vm365_vm2, %v986_v56  ;;  %v971_v62 = vmax.f32 %v939_v57, 0.0  ;;  %v947_v63 = vadd.f32 %v915_v54, %v883_v58 }
  0xf2   : > { %995 = vst.msk [vmem:[%s1446_s15 + $0x38] sm:$0xff] %vm365_vm2, %v963_v60  ;;  %v955_v0 = vadd.f32 %v923_v59, %v891_v61 }
  0xf3   : > { %1003 = vst.msk [vmem:[%s1446_s15 + $0x78] sm:$0xff] %vm365_vm2, %v971_v62  ;;  %v979_v35 = vmax.f32 %v947_v63, 0.0 }
  0xf4   : > { %v987_v1 = vmax.f32 %v955_v0, 0.0 }
  0xf5   : > { %1011 = vst.msk [vmem:[%s1446_s15 + $0xb8] sm:$0xff] %vm365_vm2, %v979_v35 }
  0xf6   : > { %1019 = vst.msk [vmem:[%s1446_s15 + $0xf8] sm:$0xff] %vm365_vm2, %v987_v1 }
  0xf7 PF: > { %s15_s20 = sadd.s32 1, %s1354_s20   ;;  %s1852_s18 = smov %s1350_s19 }
  0xf8   : > { %p12_p5 = scmp.ge.s32.totalorder %s15_s20, 4   ;;  %s1853_s19 = smov %s1855_s21 }
  0xfa   :  { %14 = sbr.rel (!%p12_p5) target bundleno = 2 (0x2), region = 90 }

// kernel: forward.9
= control target key start
LH: loop header
LB: loop body
LE: loop exit
PB: predicated region body
PF: predicated region fallthrough
CT: control target
= control target key end

     0   :  { %s1004_s12 = smov 0   ;;  %s1243_s0 = inlined_call_operand.vmem [shape: f32[2,16,128], index: 0, kind: input, shape index: {}]   ;;  %s1244_s1 = inlined_call_operand.vmem [shape: bf16[128,384], index: 1, kind: input, shape index: {}]   ;;  %s1245_s2 = inlined_call_operand.vmem [shape: f32[1,384], index: 2, kind: input, shape index: {}]   ;;  %s1246_s3 = inlined_call_operand.vmem [shape: bf16[2,16,128], index: 3, kind: output, shape index: {}]  }
   0x1 LB: > { %s789_s13 = sadd.s32 4294967295, %s979_s12   ;;  %p793_p0 = scmp.ge.s32.totalorder %s979_s12, 1  ;;  %s979_s12 = sphi %s1004_s12, %s13_s12  }
   0x2   : > { %p137_p1 = scmp.lt.s32.totalorder %s979_s12, 3 }
   0x4   : > { %p138_p2 = pnand %p793_p0, %p137_p1 }
   0x5   : > { %p161_p3 = scmp.lt.s32.totalorder (!%p138_p2), %s789_s13, 1  ;;  %s981_s16 = smov (!%p138_p2), 64  }
   0x6   : > { %141 = sbr.rel (%p138_p2) target bundleno = 1029 (0x405), region = 32  ;;  %s982_s17 = smov (!%p138_p2), 96  }
   0x7   : > { %s983_s18 = smov (!%p138_p2), 32  }
   0xb   : > { %v884_v0 = vld [vmem:[%s1244_s1 + $0xa8] sm:$0xf]  ;;  %v928_v1 = vld [vmem:[%s1244_s1 + $0xb0] sm:$0xf0]  ;;  %v927_v2 = vld [vmem:[%s1244_s1 + $0xac] sm:$0xf] }
   0xc   : > { %v885_v3 = vor.u32 %v928_v1, %v884_v0  ;;  %v886_v4 = vld [vmem:[%s1244_s1 + $0xb4] sm:$0xf0]  ;;  %v872_v5 = vld [vmem:[%s1244_s1 + $0x90] sm:$0xf]  ;;  %v925_v6 = vld [vmem:[%s1244_s1 + $0x98] sm:$0xf0] }
   0xd   : > { %v889_v7 = vor.u32 %v927_v2, %v886_v4  ;;  %v924_v8 = vld [vmem:[%s1244_s1 + $0x94] sm:$0xf]  ;;  %v874_v9 = vld [vmem:[%s1244_s1 + $0x9c] sm:$0xf0]  ;;  %v873_v10 = vor.u32 %v925_v6, %v872_v5  ;;  %v860_v12 = vld [vmem:[%s1244_s1 + $0x78] sm:$0xf] }
   0xe   : > { %343 = vmatpush.bf16.msra.mxu0 %v885_v3  ;;  %v877_v11 = vor.u32 %v924_v8, %v874_v9  ;;  %v922_v13 = vld [vmem:[%s1244_s1 + $0x80] sm:$0xf0]  ;;  %v921_v14 = vld [vmem:[%s1244_s1 + $0x7c] sm:$0xf]  ;;  %v862_v15 = vld [vmem:[%s1244_s1 + $0x84] sm:$0xf0] }
   0xf   : > { %357 = vmatpush.bf16.msra.mxu1 %v889_v7  ;;  %v861_v16 = vor.u32 %v922_v13, %v860_v12  ;;  %v865_v17 = vor.u32 %v921_v14, %v862_v15  ;;  %v848_v18 = vld [vmem:[%s1244_s1 + $0x60] sm:$0xf]  ;;  %v919_v19 = vld [vmem:[%s1244_s1 + $0x68] sm:$0xf0]  ;;  %v918_v20 = vld [vmem:[%s1244_s1 + $0x64] sm:$0xf] }
  0x10   : > { %v850_v21 = vld [vmem:[%s1244_s1 + $0x6c] sm:$0xf0]  ;;  %v849_v22 = vor.u32 %v919_v19, %v848_v18  ;;  %v929_v24 = vld [vmem:[%s1244_s1 + $0xb8] sm:$0xf0]  ;;  %v880_v25 = vld [vmem:[%s1244_s1 + $0x98] sm:$0xf] }
  0x11   : > { %v892_v23 = vld [vmem:[%s1244_s1 + $0xb0] sm:$0xf]  ;;  %v853_v26 = vor.u32 %v918_v20, %v850_v21  ;;  %v836_v27 = vld [vmem:[%s1244_s1 + $0x48] sm:$0xf]  ;;  %v916_v28 = vld [vmem:[%s1244_s1 + $0x50] sm:$0xf0] }
  0x12   : > { %344 = vmatpush.bf16.msra.mxu0 %v873_v10  ;;  %v893_v29 = vor.u32 %v929_v24, %v892_v23  ;;  %v926_v30 = vld [vmem:[%s1244_s1 + $0xa0] sm:$0xf0]  ;;  %v915_v31 = vld [vmem:[%s1244_s1 + $0x4c] sm:$0xf]  ;;  %v838_v32 = vld [vmem:[%s1244_s1 + $0x54] sm:$0xf0]  ;;  %v837_v34 = vor.u32 %v916_v28, %v836_v27 }
  0x13   : > { %358 = vmatpush.bf16.msra.mxu1 %v877_v11  ;;  %v881_v33 = vor.u32 %v926_v30, %v880_v25  ;;  %v868_v35 = vld [vmem:[%s1244_s1 + $0x80] sm:$0xf]  ;;  %v923_v36 = vld [vmem:[%s1244_s1 + $0x88] sm:$0xf0]  ;;  %v841_v37 = vor.u32 %v915_v31, %v838_v32  ;;  %v824_v38 = vld [vmem:[%s1244_s1 + $0x30] sm:$0xf] }
  0x14   : > { %371 = vmatpush.bf16.msra.mxu2 %v893_v29  ;;  %v913_v39 = vld [vmem:[%s1244_s1 + $0x38] sm:$0xf0]  ;;  %v912_v40 = vld [vmem:[%s1244_s1 + $0x34] sm:$0xf]  ;;  %v826_v41 = vld [vmem:[%s1244_s1 + $0x3c] sm:$0xf0]  ;;  %v869_v42 = vor.u32 %v923_v36, %v868_v35 }
  0x15   : > { %s1248_s13 = smov (!%p161_p3, %s789_s13), 1  ;;  %v825_v43 = vor.u32 %v913_v39, %v824_v38  ;;  %v856_v44 = vld [vmem:[%s1244_s1 + $0x68] sm:$0xf]  ;;  %v920_v45 = vld [vmem:[%s1244_s1 + $0x70] sm:$0xf0]  ;;  %v829_v46 = vor.u32 %v912_v40, %v826_v41  ;;  %vm397_vm0 = vcmask 261120  }
  0x16   : > { %345 = vmatpush.bf16.msra.mxu0 %v861_v16  ;;  %v812_v47 = vld [vmem:[%s1244_s1 + $0x18] sm:$0xf]  ;;  %v910_v48 = vld [vmem:[%s1244_s1 + $0x20] sm:$0xf0]  ;;  %v909_v49 = vld [vmem:[%s1244_s1 + $0x1c] sm:$0xf]  ;;  %v857_v51 = vor.u32 %v920_v45, %v856_v44 }
  0x17   : > { %359 = vmatpush.bf16.msra.mxu1 %v865_v17  ;;  %v814_v50 = vld [vmem:[%s1244_s1 + $0x24] sm:$0xf0]  ;;  %s904_s9 = sshll.u32 %s1248_s13, 4  ;;  %v813_v52 = vor.u32 %v910_v48, %v812_v47  ;;  %v844_v53 = vld [vmem:[%s1244_s1 + $0x50] sm:$0xf]  ;;  %vm418_vm1 = vcmask 130048  }
  0x18   : > { %372 = vmatpush.bf16.msra.mxu2 %v881_v33  ;;  %v917_v54 = vld [vmem:[%s1244_s1 + $0x58] sm:$0xf0]  ;;  %v817_v55 = vor.u32 %v909_v49, %v814_v50  ;;  %v800_v56 = vld [vmem:[%s1244_s1] sm:$0xf]  ;;  %v907_v57 = vld [vmem:[%s1244_s1 + $0x8] sm:$0xf0]  ;;  %s165_s22 = scalar_lea.vmem %s1243_s0, %s904_s9 }
  0x19   : > { %v906_v58 = vld [vmem:[%s1244_s1 + $0x4] sm:$0xf]  ;;  %v802_v59 = vld [vmem:[%s1244_s1 + $0xc] sm:$0xf0]  ;;  %v845_v60 = vor.u32 %v917_v54, %v844_v53  ;;  %v832_v61 = vld [vmem:[%s1244_s1 + $0x38] sm:$0xf]  ;;  %v801_v62 = vor.u32 %v907_v57, %v800_v56 }
  0x1a   : > { %346 = vmatpush.bf16.msra.mxu0 %v849_v22  ;;  %v172_v63 = vld [vmem:[%s165_s22] sm:$0xff]  ;;  %v173_v0 = vld [vmem:[%s165_s22 + $0x8] sm:$0xff]  ;;  %v805_v2 = vor.u32 %v906_v58, %v802_v59  ;;  %v908_v9 = vld [vmem:[%s1244_s1 + $0x10] sm:$0xf0]  ;;  %s905_s19 = sshll.u32 %s1248_s13, 3  ;;  %vm473_vm2 = vcmask 257024  }
  0x1b   : > { %360 = vmatpush.bf16.msra.mxu1 %v853_v26  ;;  %v914_v1 = vld [vmem:[%s1244_s1 + $0x40] sm:$0xf0]  ;;  %v174_v3 = vpack.c.bf16 %v173_v0, %v172_v63  ;;  %v820_v5 = vld [vmem:[%s1244_s1 + $0x20] sm:$0xf]  ;;  %v911_v6 = vld [vmem:[%s1244_s1 + $0x28] sm:$0xf0]  ;;  %s1227_s22 = scalar_lea.vmem %s1246_s3, %s905_s19 }
  0x1c   : > { %373 = vmatpush.bf16.msra.mxu2 %v869_v42  ;;  %v833_v4 = vor.u32 %v914_v1, %v832_v61  ;;  %v821_v7 = vor.u32 %v911_v6, %v820_v5  ;;  %v808_v8 = vld [vmem:[%s1244_s1 + $0x8] sm:$0xf]  ;;  %v207_v11 = vld [vmem:[%s1245_s2] sm:$0x7]  ;;  %vm559_vm3 = vcmask 519424   ;;  %vm645_vm4 = vcmask 781824  }
  0x1d   : > { %v809_v10 = vor.u32 %v908_v9, %v808_v8  ;;  %v209_v14 = vperm.slane %v207_v11, 0  ;;  %v210_v15 = vperm.slane %v207_v11, 1  ;;  %v211_v31 = vperm.slane %v207_v11, 2 }
  0x1e   : > { %347 = vmatpush.bf16.msra.mxu0 %v837_v34  ;;  %vm731_vm5 = vcmask 1044224  }
  0x1f   : > { %361 = vmatpush.bf16.msra.mxu1 %v841_v37 }
  0x20   : > { %374 = vmatpush.bf16.msra.mxu2 %v857_v51 }
  0x22   : > { %348 = vmatpush.bf16.msra.mxu0 %v825_v43 }
  0x23   : > { %362 = vmatpush.bf16.msra.mxu1 %v829_v46 }
  0x24   : > { %375 = vmatpush.bf16.msra.mxu2 %v845_v60 }
  0x26   : > { %349 = vmatpush.bf16.msra.mxu0 %v813_v52 }
  0x27   : > { %363 = vmatpush.bf16.msra.mxu1 %v817_v55 }
  0x28   : > { %376 = vmatpush.bf16.msra.mxu2 %v833_v4 }
  0x2a   : > { %350 = vmatpush.bf16.msra.mxu0 %v801_v62 }
  0x2b   : > { %364 = vmatpush.bf16.msra.mxu1 %v805_v2 }
  0x2c   : > { %377 = vmatpush.bf16.msra.mxu2 %v821_v7 }
  0x2d   : > { %351 = vmatmul.bf16.vlgmr.msra.gmra.mxu0 %v174_v3 }
  0x2e   : > { %365 = vmatmul.bf16.vlgmr.msra.gmra.mxu1 %v174_v3 }
  0x30   : > { %378 = vmatpush.bf16.msra.mxu2 %v809_v10 }
  0x33   : > { %379 = vmatmul.bf16.vlgmr.msra.gmra.mxu2 %v174_v3 }
  0xaa   : > { %v352_v12 = vpop.f32.mrf.mxu0 }
  0xab   : > { %v366_v13 = vpop.f32.mrf.mxu1  ;;  %v353_v16 = vadd.f32 %v352_v12, %v209_v14 }
  0xac   : > { %v367_v17 = vadd.f32 %v366_v13, %v210_v15 }
  0xae   : > { %v385_v21 = vpack.c.bf16 %v367_v17, %v353_v16 }
  0xb0   : > { %v394_v24 = vunpack.c.h.b16 %v385_v21  ;;  %v391_v29 = vunpack.c.l.b16 %v385_v21 }
  0xb2   : > { %v354_v18 = vpop.f32.mrf.mxu0 }
  0xb3   : > { %v355_v19 = vadd.f32 %v354_v18, %v209_v14  ;;  %v368_v20 = vpop.f32.mrf.mxu1 }
  0xb4   : > { %v369_v22 = vadd.f32 %v368_v20, %v210_v15 }
  0xb6   : > { %v387_v23 = vpack.c.bf16 %v369_v22, %v355_v19  ;;  %v380_v32 = vpop.f32.mrf.mxu2 }
  0xb7   : > { %v381_v33 = vadd.f32 %v380_v32, %v211_v31 }
  0xb8   : > { %v395_v25 = vunpack.c.h.b16 %v387_v23  ;;  %v392_v28 = vunpack.c.l.b16 %v387_v23 }
  0xb9   : > { %v386_v34 = vpack.c.bf16 %v381_v33, %v381_v33 }
  0xba   : > { %v396_v26 = vpack.c.b16 %v395_v25, %v394_v24  ;;  %v393_v30 = vpack.c.b16 %v392_v28, %v391_v29 }
  0xbb   : > { %v440_v37 = vunpack.c.l.b16 %v386_v34 }
  0xbc   : > { %564 = vrot.lane.b32.xlu2 %v396_v26, %s981_s16  ;;  %478 = vrot.lane.b32.xlu1 %v396_v26, %s982_s17  ;;  %v402_v27 = vsel %vm397_vm0, %v396_v26, 0 }
  0xbd   : > { %411 = vmatpush.bf16.xpose.msra.mxu3 %v402_v27 }
  0xbe   : > { %v382_v35 = vpop.f32.mrf.mxu2 }
  0xbf   : > { %v383_v36 = vadd.f32 %v382_v35, %v211_v31 }
  0xc1   : > { %v388_v38 = vpack.c.bf16 %v383_v36, %v383_v36 }
  0xc3   : > { %v441_v39 = vunpack.c.l.b16 %v388_v38 }
  0xc4   : > { %650 = vrot.lane.b32.xlu2 %v396_v26, %s983_s18  ;;  %476 = vrot.lane.b32.xlu1 %v393_v30, %s982_s17 }
  0xc5   : > { %894 = vmatmul.msk.bf16.vlgmr.msra.gmra.mxu3 %vm397_vm0, %v393_v30  ;;  %v442_v40 = vpack.c.b16 %v441_v39, %v440_v37 }
  0xc7   : > { %454 = vmatpush.bf16.msrb.mxu3 %v442_v40 }
  0xcc   : > { %648 = vrot.lane.b32.xlu1 %v393_v30, %s983_s18 }
 0x116   : > { %v565_v41 = vpop.permute.xlu2 %564 }
 0x117   : > { %v570_v42 = vsel %vm397_vm0, %v565_v41, 0 }
 0x118   : > { %579 = vmatpush.bf16.xpose.msrb.mxu1 %v570_v42 }
 0x11e   : > { %v651_v57 = vpop.permute.xlu2 %650 }
 0x11f   : > { %v656_v59 = vsel %vm397_vm0, %v651_v57, 0 }
 0x12e   : > { %v479_v43 = vpop.permute.xlu1 %478 }
 0x12f   : > { %v484_v44 = vsel %vm397_vm0, %v479_v43, 0 }
 0x130   : > { %493 = vmatpush.bf16.xpose.msra.mxu3 %v484_v44 }
 0x136   : > { %v477_v61 = vpop.permute.xlu1 %476 }
 0x13e   : > { %v649_v62 = vpop.permute.xlu1 %648 }
 0x148   : > { %v413_v45 = vpop.f32.mrf.mxu3 }
 0x149   : > { %v419_v46 = vsel %vm418_vm1, %v413_v45, -inf }
 0x14a   : > { %420 = vmax.xlane.f32.xlu0 %v419_v46 }
 0x150   : > { %v415_v47 = vpop.f32.mrf.mxu3 }
 0x151   : > { %v422_v48 = vsel %vm418_vm1, %v415_v47, -inf }
 0x152   : > { %423 = vmax.xlane.f32.xlu0 %v422_v48 }
 0x166   : > { %562 = vrot.lane.b32.xlu0 %v393_v30, %s981_s16 }
 0x1bd   : > { %v421_v49 = vpop.xlane.xlu0 %420 }
 0x1be   : > { %v425_v50 = vsub.f32 %v413_v45, %v421_v49 }
 0x1c0   : > { %v427_v51 = vmul.f32 1.442695, %v425_v50 }
 0x1c2   : > { %941 = vpow2.f32 %v427_v51 }
 0x1c5   : > { %v424_v52 = vpop.xlane.xlu0 %423 }
 0x1c6   : > { %v426_v53 = vsub.f32 %v415_v47, %v424_v52 }
 0x1c8   : > { %v429_v54 = vmul.f32 1.442695, %v426_v53  ;;  %v1181_v55 = vpop.eup %941 }
 0x1c9   : > { %v431_v47 = vsel %vm418_vm1, %v1181_v55, 0.0 }
 0x1ca   : > { %943 = vpow2.f32 %v429_v54 }
 0x1d0   : > { %v1183_v56 = vpop.eup %943 }
 0x1d1   : > { %v437_v58 = vpack.c.bf16 %v1183_v56, %v1181_v55  ;;  %v434_v48 = vsel %vm418_vm1, %v1183_v56, 0.0 }
 0x1d3   : > { %895 = vmatmul.msk.bf16.vlgmr.msrb.gmra.mxu3 %vm418_vm1, %v437_v58 }
 0x1d4   : > { %665 = vmatpush.bf16.xpose.msrb.mxu3 %v656_v59 }
 0x1d8   : > { %v563_v60 = vpop.permute.xlu0 %562 }
 0x1d9   : > { %898 = vmatmul.msk.bf16.vlgmr.msrb.gmra.mxu1 %vm397_vm0, %v563_v60 }
 0x1e3   : > { %896 = vmatmul.msk.bf16.vlgmr.msra.gmra.mxu3 %vm397_vm0, %v477_v61 }
 0x1f3   : > { %900 = vmatmul.msk.bf16.vlgmr.msrb.gmra.mxu3 %vm397_vm0, %v649_v62 }
 0x256   : > { %v1192_v63 = vpop.f32.mrf.mxu3  ;;  %v581_v0 = vpop.f32.mrf.mxu1 }
 0x257   : > { %v586_v1 = vsel %vm418_vm1, %v581_v0, -inf }
 0x258   : > { %587 = vmax.xlane.f32.xlu0 %v586_v1 }
 0x25e   : > { %v1195_v2 = vpop.f32.mrf.mxu3  ;;  %v583_v3 = vpop.f32.mrf.mxu1 }
 0x25f   : > { %v589_v4 = vsel %vm418_vm1, %v583_v3, -inf }
 0x260   : > { %590 = vmax.xlane.f32.xlu2 %v589_v4 }
 0x266   : > { %v495_v5 = vpop.f32.mrf.mxu3 }
 0x267   : > { %v500_v6 = vsel %vm418_vm1, %v495_v5, -inf }
 0x268   : > { %501 = vmax.xlane.f32.xlu2 %v500_v6 }
 0x26c   : > { %605 = vrot.lane.b32.xlu0 %v442_v40, %s981_s16 }
 0x26e   : > { %v497_v7 = vpop.f32.mrf.mxu3 }
 0x26f   : > { %v503_v8 = vsel %vm418_vm1, %v497_v7, -inf }
 0x270   : > { %504 = vmax.xlane.f32.xlu1 %v503_v8 }
 0x276   : > { %v667_v9 = vpop.f32.mrf.mxu3 }
 0x277   : > { %v672_v10 = vsel %vm418_vm1, %v667_v9, -inf }
 0x278   : > { %673 = vmax.xlane.f32.xlu1 %v672_v10 }
 0x27e   : > { %v669_v11 = vpop.f32.mrf.mxu3 }
 0x27f   : > { %v675_v12 = vsel %vm418_vm1, %v669_v11, -inf }
 0x280   : > { %676 = vmax.xlane.f32.xlu1 %v675_v12  ;;  %519 = vrot.lane.b32.xlu2 %v442_v40, %s982_s17 }
 0x299   : > { %691 = vrot.lane.b32.xlu1 %v442_v40, %s983_s18 }
 0x2cb   : > { %v588_v13 = vpop.xlane.xlu0 %587 }
 0x2cc   : > { %v592_v14 = vsub.f32 %v581_v0, %v588_v13 }
 0x2ce   : > { %v594_v15 = vmul.f32 1.442695, %v592_v14 }
 0x2d0   : > { %945 = vpow2.f32 %v594_v15 }
 0x2d3   : > { %v591_v16 = vpop.xlane.xlu2 %590 }
 0x2d4   : > { %v593_v17 = vsub.f32 %v583_v3, %v591_v16 }
 0x2d6   : > { %v946_v18 = vpop.eup %945  ;;  %v596_v19 = vmul.f32 1.442695, %v593_v17 }
 0x2d7   : > { %v598_v20 = vsel %vm418_vm1, %v946_v18, 0.0 }
 0x2d8   : > { %947 = vpow2.f32 %v596_v19  ;;  %599 = vadd.xlane.f32.xlu1 %v598_v20 }
 0x2db   : > { %v502_v21 = vpop.xlane.xlu2 %501 }
 0x2dc   : > { %v506_v22 = vsub.f32 %v495_v5, %v502_v21 }
 0x2de   : > { %v948_v23 = vpop.eup %947  ;;  %v508_v24 = vmul.f32 1.442695, %v506_v22  ;;  %v606_v25 = vpop.permute.xlu0 %605 }
 0x2df   : > { %618 = vmatpush.bf16.msrb.mxu2 %v606_v25  ;;  %v601_v26 = vsel %vm418_vm1, %v948_v23, 0.0  ;;  %v604_v27 = vpack.c.bf16 %v948_v23, %v946_v18 }
 0x2e0   : > { %949 = vpow2.f32 %v508_v24  ;;  %602 = vadd.xlane.f32.xlu2 %v601_v26 }
 0x2e2   : > { %899 = vmatmul.msk.bf16.vlgmr.msrb.gmra.mxu2 %vm418_vm1, %v604_v27 }
 0x2e3   : > { %v505_v28 = vpop.xlane.xlu1 %504  ;;  %v520_v29 = vpop.permute.xlu2 %519 }
 0x2e4   : > { %v507_v30 = vsub.f32 %v497_v7, %v505_v28  ;;  %532 = vmatpush.bf16.msrb.mxu0 %v520_v29 }
 0x2e6   : > { %v950_v31 = vpop.eup %949  ;;  %v510_v32 = vmul.f32 1.442695, %v507_v30 }
 0x2e7   : > { %v512_v33 = vsel %vm418_vm1, %v950_v31, 0.0 }
 0x2e8   : > { %951 = vpow2.f32 %v510_v32  ;;  %513 = vadd.xlane.f32.xlu2 %v512_v33 }
 0x2eb   : > { %v674_v34 = vpop.xlane.xlu1 %673 }
 0x2ec   : > { %v678_v35 = vsub.f32 %v667_v9, %v674_v34 }
 0x2ee   : > { %v952_v36 = vpop.eup %951  ;;  %v680_v37 = vmul.f32 1.442695, %v678_v35 }
 0x2ef   : > { %v515_v38 = vsel %vm418_vm1, %v952_v36, 0.0  ;;  %v518_v39 = vpack.c.bf16 %v952_v36, %v950_v31 }
 0x2f0   : > { %953 = vpow2.f32 %v680_v37  ;;  %516 = vadd.xlane.f32.xlu0 %v515_v38 }
 0x2f1   : > { %897 = vmatmul.msk.bf16.vlgmr.msrb.gmra.mxu0 %vm418_vm1, %v518_v39 }
 0x2f3   : > { %v677_v40 = vpop.xlane.xlu1 %676 }
 0x2f4   : > { %v679_v41 = vsub.f32 %v669_v11, %v677_v40 }
 0x2f6   : > { %v954_v42 = vpop.eup %953  ;;  %v682_v43 = vmul.f32 1.442695, %v679_v41 }
 0x2f7   : > { %v684_v44 = vsel %vm418_vm1, %v954_v42, 0.0 }
 0x2f8   : > { %955 = vpow2.f32 %v682_v43  ;;  %685 = vadd.xlane.f32.xlu2 %v684_v44 }
 0x2fe   : > { %v956_v45 = vpop.eup %955 }
 0x2ff   : > { %v687_v46 = vsel %vm418_vm1, %v956_v45, 0.0  ;;  %v690_v50 = vpack.c.bf16 %v956_v45, %v954_v42 }
 0x300   : > { %688 = vadd.xlane.f32.xlu0 %v687_v46  ;;  %432 = vadd.xlane.f32.xlu2 %v431_v47 }
 0x308   : > { %435 = vadd.xlane.f32.xlu0 %v434_v48 }
 0x30b   : > { %v692_v49 = vpop.permute.xlu1 %691 }
 0x30c   : > { %704 = vmatpush.bf16.msra.mxu0 %v692_v49 }
 0x30f   : > { %901 = vmatmul.msk.bf16.vlgmr.msra.gmra.mxu0 %vm418_vm1, %v690_v50 }
 0x34b   : > { %v600_v51 = vpop.xlane.xlu1 %599 }
 0x34c   : > { %957 = vrcp.f32 %v600_v51 }
 0x352   : > { %v958_v53 = vpop.eup %957 }
 0x353   : > { %v603_v52 = vpop.xlane.xlu2 %602  ;;  %v627_v57 = vmul.f32 %v958_v53, %v600_v51 }
 0x355   : > { %v629_v58 = vsub.f32 2.0, %v627_v57 }
 0x357   : > { %v631_v60 = vmul.f32 %v958_v53, %v629_v58 }
 0x35b   : > { %v514_v54 = vpop.xlane.xlu2 %513 }
 0x35c   : > { %959 = vrcp.f32 %v514_v54 }
 0x35d   : > { %961 = vrcp.f32 %v603_v52 }
 0x362   : > { %v960_v55 = vpop.eup %959 }
 0x363   : > { %v517_v59 = vpop.xlane.xlu0 %516  ;;  %v541_v56 = vmul.f32 %v960_v55, %v514_v54  ;;  %v962_v0 = vpop.eup %961 }
 0x364   : > { %963 = vrcp.f32 %v517_v59  ;;  %v628_v5 = vmul.f32 %v962_v0, %v603_v52 }
 0x365   : > { %v620_v61 = vpop.f32.mrf.mxu2  ;;  %v543_v3 = vsub.f32 2.0, %v541_v56 }
 0x366   : > { %v633_v62 = vmul.f32 %v631_v60, %v620_v61  ;;  %v630_v10 = vsub.f32 2.0, %v628_v5 }
 0x367   : > { %v545_v8 = vmul.f32 %v960_v55, %v543_v3 }
 0x368   : > { %v635_v1 = vpack.c.bf16 %v633_v62, %v633_v62  ;;  %v632_v15 = vmul.f32 %v962_v0, %v630_v10 }
 0x36a   : > { %v964_v4 = vpop.eup %963  ;;  %639 = vrot.lane.b32.xlu0 %v635_v1, %s981_s16 }
 0x36b   : > { %v686_v6 = vpop.xlane.xlu2 %685  ;;  %v542_v7 = vmul.f32 %v964_v4, %v517_v59 }
 0x36d   : > { %v544_v12 = vsub.f32 2.0, %v542_v7  ;;  %v622_v14 = vpop.f32.mrf.mxu2 }
 0x36e   : > { %v534_v9 = vpop.f32.mrf.mxu0  ;;  %v634_v18 = vmul.f32 %v632_v15, %v622_v14 }
 0x36f   : > { %v547_v11 = vmul.f32 %v545_v8, %v534_v9  ;;  %v546_v19 = vmul.f32 %v964_v4, %v544_v12 }
 0x370   : > { %v636_v22 = vpack.c.bf16 %v634_v18, %v634_v18 }
 0x371   : > { %v549_v13 = vpack.c.bf16 %v547_v11, %v547_v11 }
 0x373   : > { %v689_v16 = vpop.xlane.xlu0 %688  ;;  %553 = vrot.lane.b32.xlu1 %v549_v13, %s983_s18  ;;  %v433_v17 = vpop.xlane.xlu2 %432 }
 0x374   : > { %965 = vrcp.f32 %v433_v17 }
 0x375   : > { %967 = vrcp.f32 %v686_v6 }
 0x376   : > { %v536_v20 = vpop.f32.mrf.mxu0 }
 0x377   : > { %v548_v21 = vmul.f32 %v546_v19, %v536_v20 }
 0x379   : > { %v550_v23 = vpack.c.bf16 %v548_v21, %v548_v21 }
 0x37a   : > { %v966_v24 = vpop.eup %965 }
 0x37b   : > { %v436_v25 = vpop.xlane.xlu0 %435  ;;  %555 = vrot.lane.b32.xlu2 %v550_v23, %s983_s18  ;;  %641 = vrot.lane.b32.xlu1 %v636_v22, %s981_s16  ;;  %v463_v26 = vmul.f32 %v966_v24, %v433_v17  ;;  %v968_v28 = vpop.eup %967 }
 0x37c   : > { %969 = vrcp.f32 %v436_v25  ;;  %v713_v32 = vmul.f32 %v968_v28, %v686_v6 }
 0x37d   : > { %v465_v27 = vsub.f32 2.0, %v463_v26  ;;  %971 = vrcp.f32 %v689_v16 }
 0x37e   : > { %v715_v36 = vsub.f32 2.0, %v713_v32 }
 0x37f   : > { %v467_v29 = vmul.f32 %v966_v24, %v465_v27 }
 0x380   : > { %v717_v41 = vmul.f32 %v968_v28, %v715_v36 }
 0x381   : > { %v469_v31 = vmul.f32 %v467_v29, %v1192_v63 }
 0x382   : > { %v970_v30 = vpop.eup %969 }
 0x383   : > { %v464_v33 = vmul.f32 %v970_v30, %v436_v25  ;;  %v471_v34 = vpack.c.bf16 %v469_v31, %v469_v31  ;;  %v972_v38 = vpop.eup %971 }
 0x384   : > { %v714_v40 = vmul.f32 %v972_v38, %v689_v16 }
 0x385   : > { %v466_v35 = vsub.f32 2.0, %v464_v33  ;;  %474 = vst.msk [vmem:[%s1227_s22] sm:$0xf] %vm473_vm2, %v471_v34 }
 0x386   : > { %v716_v44 = vsub.f32 2.0, %v714_v40 }
 0x387   : > { %v468_v37 = vmul.f32 %v970_v30, %v466_v35 }
 0x388   : > { %v718_v46 = vmul.f32 %v972_v38, %v716_v44 }
 0x389   : > { %v470_v39 = vmul.f32 %v468_v37, %v1195_v2 }
 0x38b   : > { %v472_v63 = vpack.c.bf16 %v470_v39, %v470_v39 }
 0x38c   : > { %v706_v42 = vpop.f32.mrf.mxu0 }
 0x38d   : > { %v719_v43 = vmul.f32 %v717_v41, %v706_v42  ;;  %475 = vst.msk [vmem:[%s1227_s22 + $0x4] sm:$0xf] %vm473_vm2, %v472_v63 }
 0x38f   : > { %v721_v45 = vpack.c.bf16 %v719_v43, %v719_v43 }
 0x391   : > { %725 = vrot.lane.b32.xlu0 %v721_v45, %s982_s17 }
 0x394   : > { %v708_v47 = vpop.f32.mrf.mxu0 }
 0x395   : > { %v720_v48 = vmul.f32 %v718_v46, %v708_v47 }
 0x397   : > { %v722_v49 = vpack.c.bf16 %v720_v48, %v720_v48 }
 0x399   : > { %727 = vrot.lane.b32.xlu2 %v722_v49, %s982_s17 }
 0x3d5   : > { %v556_v2 = vpop.permute.xlu2 %555 }
 0x3d6   : > { %561 = vst.msk [vmem:[%s1227_s22 + $0x4] sm:$0xf] %vm559_vm3, %v556_v2 }
 0x3dc   : > { %v640_v51 = vpop.permute.xlu0 %639 }
 0x3e5   : > { %v554_v50 = vpop.permute.xlu1 %553 }
 0x3e6   : > { %560 = vst.msk [vmem:[%s1227_s22] sm:$0xf] %vm559_vm3, %v554_v50 }
 0x3e7   : > { %646 = vst.msk [vmem:[%s1227_s22] sm:$0xf] %vm645_vm4, %v640_v51 }
 0x3ed   : > { %v642_v52 = vpop.permute.xlu1 %641 }
 0x3ee   : > { %647 = vst.msk [vmem:[%s1227_s22 + $0x4] sm:$0xf] %vm645_vm4, %v642_v52 }
 0x3f3   : > { %v728_v53 = vpop.permute.xlu2 %727 }
 0x3f4   : > { %733 = vst.msk [vmem:[%s1227_s22 + $0x4] sm:$0xf] %vm731_vm5, %v728_v53 }
 0x403   : > { %v726_v54 = vpop.permute.xlu0 %725 }
 0x404   : > { %732 = vst.msk [vmem:[%s1227_s22] sm:$0xf] %vm731_vm5, %v726_v54 }
 0x405 PF: > { %s13_s12 = sadd.s32 1, %s979_s12  }
 0x406   : > { %p10_p4 = scmp.ge.s32.totalorder %s13_s12, 4  }
 0x408   :  { %12 = sbr.rel (!%p10_p4) target bundleno = 1 (0x1), region = 62 }

// kernel: forward.10
= control target key start
LH: loop header
LB: loop body
LE: loop exit
PB: predicated region body
PF: predicated region fallthrough
CT: control target
= control target key end

     0   :  { %s949_s24 = smov 0   ;;  %s951_s25 = smov 0   ;;  %s1039_s0 = inlined_call_operand.vmem [shape: bf16[32,128], index: 0, kind: input, shape index: {}]   ;;  %s1040_s1 = inlined_call_operand.vmem [shape: bf16[128,128], index: 1, kind: input, shape index: {}]   ;;  %s1041_s2 = inlined_call_operand.vmem [shape: f32[1,128], index: 2, kind: input, shape index: {}]   ;;  %s1042_s3 = inlined_call_operand.vmem [shape: f32[1,128], index: 3, kind: input, shape index: {}]   ;;  %s1043_s4 = inlined_call_operand.vmem [shape: f32[32,128], index: 4, kind: input, shape index: {}]   ;;  %s1044_s5 = inlined_call_operand.vmem [shape: f32[1,128], index: 5, kind: input, shape index: {}]   ;;  %s1045_s6 = inlined_call_operand.vmem [shape: f32[1,128], index: 6, kind: input, shape index: {}]   ;;  %s1046_s7 = inlined_call_operand.vmem [shape: f32[32,128], index: 7, kind: output, shape index: {}]  }
   0x1   :  { %s953_s26 = smov 0  }
   0x2 LB: > { %s36_s27 = sadd.s32 1, %s901_s25  ;;  %p793_p0 = scmp.ge.s32.totalorder %s905_s26, 1  ;;  %s905_s26 = sphi %s953_s26, %s17_s26   ;;  %s901_s25 = sphi %s951_s25, %s1048_s25   ;;  %s897_s24 = sphi %s949_s24, %s1047_s24  }
   0x3   : > { %p38_p1 = scmp.ge.s32.totalorder %s36_s27, 2  ;;  %p328_p2 = scmp.lt.s32.totalorder %s905_s26, 3 }
   0x5   : > { %s1050_s27 = smov (%p38_p1, %s36_s27), 0  ;;  %p329_p3 = pnand %p793_p0, %p328_p2 }
   0x6   : > { %s794_s30 = sshll.u32 (!%p329_p3), %s897_s24, 1 }
   0x7   : > { %332 = sbr.rel (%p329_p3) target bundleno = 461 (0x1cd), region = 48  ;;  %p395_p4 = scmp.lt.s32.totalorder (!%p329_p3), %s794_s30, 3 }
   0xc   : > { %v846_v0 = vld [vmem:[%s1040_s1 + $0x38] sm:$0xff]  ;;  %v845_v1 = vld [vmem:[%s1040_s1 + $0x30] sm:$0xff]  ;;  %s1052_s30 = smov (!%p395_p4, %s794_s30), 3  ;;  %v844_v2 = vld [vmem:[%s1040_s1 + $0x28] sm:$0xff]  ;;  %v907_v3 = vmov 0.0   ;;  %v908_v25 = vmov 128.0  }
   0xd   : > { %522 = vmatpush.bf16.msra.mxu0 %v846_v0  ;;  %s797_s10 = sshll.u32 %s1052_s30, 3  ;;  %v843_v4 = vld [vmem:[%s1040_s1 + $0x20] sm:$0xff]  ;;  %v842_v5 = vld [vmem:[%s1040_s1 + $0x18] sm:$0xff]  ;;  %v841_v6 = vld [vmem:[%s1040_s1 + $0x10] sm:$0xff]  ;;  %s795_s24 = sshll.u32 %s1052_s30, 2  ;;  %877 = vrcp.f32 %v908_v25 }
   0xe   : > { %s984_s15 = scalar_lea.vmem %s1046_s7, %s797_s10  ;;  %v840_v7 = vld [vmem:[%s1040_s1 + $0x8] sm:$0xff]  ;;  %v839_v8 = vld [vmem:[%s1040_s1] sm:$0xff]  ;;  %s401_s11 = scalar_lea.vmem %s1039_s0, %s795_s24 }
   0xf   : > { %446 = vst [vmem:[%s984_s15] sm:$0xff] %v907_v3  ;;  %v838_v9 = vld [vmem:[%s401_s11] sm:$0xff]  ;;  %s425_s17 = scalar_lea.vmem %s1043_s4, %s797_s10 }
  0x10   : > { %447 = vst [vmem:[%s984_s15 + $0x8] sm:$0xff] %v907_v3  ;;  %v873_v14 = vld [vmem:[%s1041_s2] ss:$0 sm:$0xff]  ;;  %v558_v23 = vld [vmem:[%s425_s17 + $0x8] sm:$0xff] }
  0x11   : > { %523 = vmatpush.bf16.msra.mxu0 %v845_v1  ;;  %v874_v17 = vld [vmem:[%s1042_s3] ss:$0 sm:$0xff] }
  0x12   : > { %v557_v18 = vld [vmem:[%s425_s17] sm:$0xff] }
  0x13   : > { %v878_v26 = vpop.eup %877  ;;  %v875_v54 = vld [vmem:[%s1044_s5] ss:$0 sm:$0xff] }
  0x14   : > { %v566_v27 = vmul.f32 128.0, %v878_v26  ;;  %vm570_vm0 = vweird.f32 %v878_v26  ;;  %v876_v57 = vld [vmem:[%s1045_s6] ss:$0 sm:$0xff] }
  0x15   : > { %524 = vmatpush.bf16.msra.mxu0 %v844_v2 }
  0x16   : > { %v448_v10 = vld [vmem:[%s984_s15] sm:$0xff]  ;;  %v567_v28 = vsub.f32 1.0, %v566_v27 }
  0x18   : > { %v568_v29 = vmul.f32 %v878_v26, %v567_v28 }
  0x19   : > { %525 = vmatpush.bf16.msra.mxu0 %v843_v4 }
  0x1a   : > { %v569_v30 = vadd.f32 %v878_v26, %v568_v29 }
  0x1c   : > { %v571_v31 = vsel %vm570_vm0, %v878_v26, %v569_v30 }
  0x1d   : > { %526 = vmatpush.bf16.msra.mxu0 %v842_v5 }
  0x21   : > { %527 = vmatpush.bf16.msra.mxu0 %v841_v6 }
  0x25   : > { %528 = vmatpush.bf16.msra.mxu0 %v840_v7 }
  0x29   : > { %529 = vmatpush.bf16.msra.mxu0 %v839_v8 }
  0x2c   : > { %530 = vmatmul.bf16.vlgmr.msra.gmra.mxu0 %v838_v9 }
  0xa9   : > { %v531_v11 = vpop.f32.mrf.mxu0 }
  0xaa   : > { %v536_v12 = vadd.f32 %v531_v11, %v448_v10 }
  0xac   : > { %538 = vst [vmem:[%s984_s15] sm:$0xff] %v536_v12 }
  0xb1   : > { %v533_v13 = vpop.f32.mrf.mxu0 }
  0xb2   : > { %539 = vst [vmem:[%s984_s15 + $0x8] sm:$0xff] %v533_v13  ;;  %v550_v21 = vmul.f32 %v873_v14, %v533_v13 }
  0xb3   : > { %v543_v15 = vld [vmem:[%s984_s15] sm:$0xff] }
  0xb4   : > { %v549_v16 = vmul.f32 %v873_v14, %v543_v15  ;;  %v556_v22 = vadd.f32 %v874_v17, %v550_v21 }
  0xb6   : > { %v555_v19 = vadd.f32 %v874_v17, %v549_v16  ;;  %v560_v24 = vadd.f32 %v558_v23, %v556_v22 }
  0xb8   : > { %v559_v20 = vadd.f32 %v557_v18, %v555_v19 }
  0xba   : > { %561 = vadd.xlane.f32.xlu0 %v559_v20 }
  0xc2   : > { %563 = vadd.xlane.f32.xlu0 %v560_v24 }
 0x12d   : > { %v562_v32 = vpop.xlane.xlu0 %561 }
 0x12e   : > { %v572_v33 = vmul.f32 %v571_v31, %v562_v32 }
 0x130   : > { %v574_v34 = vsub.f32 %v559_v20, %v572_v33 }
 0x132   : > { %v576_v35 = vmul.f32 %v574_v34, %v574_v34 }
 0x134   : > { %578 = vadd.xlane.f32.xlu1 %v576_v35 }
 0x135   : > { %v564_v36 = vpop.xlane.xlu0 %563 }
 0x136   : > { %v573_v37 = vmul.f32 %v571_v31, %v564_v36 }
 0x138   : > { %v575_v38 = vsub.f32 %v560_v24, %v573_v37 }
 0x13a   : > { %v577_v39 = vmul.f32 %v575_v38, %v575_v38 }
 0x13c   : > { %580 = vadd.xlane.f32.xlu1 %v577_v39 }
 0x1a7   : > { %v579_v40 = vpop.xlane.xlu1 %578 }
 0x1a8   : > { %v582_v41 = vmul.f32 %v579_v40, %v571_v31 }
 0x1aa   : > { %v584_v42 = vadd.f32 1e-05, %v582_v41 }
 0x1ac   : > { %879 = vrsqrt.f32 %v584_v42  ;;  %vm592_vm2 = vweird.f32 %v584_v42 }
 0x1af   : > { %v581_v43 = vpop.xlane.xlu1 %580 }
 0x1b0   : > { %v583_v44 = vmul.f32 %v581_v43, %v571_v31 }
 0x1b2   : > { %v880_v45 = vpop.eup %879  ;;  %v585_v46 = vadd.f32 1e-05, %v583_v44 }
 0x1b3   : > { %v587_v47 = vmul.f32 %v880_v45, %v584_v42  ;;  %vm593_vm1 = vweird.f32 %v880_v45 }
 0x1b4   : > { %881 = vrsqrt.f32 %v585_v46  ;;  %vm594_vm3 = vmor %vm592_vm2, %vm593_vm1  ;;  %vm602_vm5 = vweird.f32 %v585_v46 }
 0x1b5   : > { %v588_v48 = vmul.f32 %v880_v45, %v587_v47 }
 0x1b7   : > { %v589_v49 = vmul.f32 0.5, %v588_v48 }
 0x1b9   : > { %v590_v50 = vsub.f32 1.5, %v589_v49 }
 0x1ba   : > { %v882_v51 = vpop.eup %881 }
 0x1bb   : > { %v591_v52 = vmul.f32 %v880_v45, %v590_v50  ;;  %v597_v53 = vmul.f32 %v882_v51, %v585_v46  ;;  %vm603_vm4 = vweird.f32 %v882_v51 }
 0x1bc   : > { %vm604_vm6 = vmor %vm602_vm5, %vm603_vm4 }
 0x1bd   : > { %v595_v55 = vsel %vm594_vm3, %v880_v45, %v591_v52  ;;  %v598_v56 = vmul.f32 %v882_v51, %v597_v53 }
 0x1be   : > { %v606_v58 = vmul.f32 %v595_v55, %v574_v34 }
 0x1bf   : > { %v599_v59 = vmul.f32 0.5, %v598_v56 }
 0x1c0   : > { %v612_v60 = vmul.f32 %v875_v54, %v606_v58 }
 0x1c1   : > { %v600_v61 = vsub.f32 1.5, %v599_v59 }
 0x1c2   : > { %v618_v62 = vadd.f32 %v876_v57, %v612_v60 }
 0x1c3   : > { %v601_v63 = vmul.f32 %v882_v51, %v600_v61 }
 0x1c4   : > { %620 = vst [vmem:[%s984_s15] sm:$0xff] %v618_v62 }
 0x1c5   : > { %v605_v0 = vsel %vm604_vm6, %v882_v51, %v601_v63 }
 0x1c6   : > { %v607_v1 = vmul.f32 %v605_v0, %v575_v38 }
 0x1c8   : > { %v613_v2 = vmul.f32 %v875_v54, %v607_v1 }
 0x1ca   : > { %v619_v3 = vadd.f32 %v876_v57, %v613_v2 }
 0x1cc   : > { %621 = vst [vmem:[%s984_s15 + $0x8] sm:$0xff] %v619_v3 }
 0x1cd PF: > { %s17_s26 = sadd.s32 1, %s905_s26   ;;  %s1047_s24 = smov %s901_s25 }
 0x1ce   : > { %p14_p5 = scmp.ge.s32.totalorder %s17_s26, 4   ;;  %s1048_s25 = smov %s1050_s27 }
 0x1d0   :  { %16 = sbr.rel (!%p14_p5) target bundleno = 2 (0x2), region = 104 }

// kernel: forward.11
= control target key start
LH: loop header
LB: loop body
LE: loop exit
PB: predicated region body
PF: predicated region fallthrough
CT: control target
= control target key end

     0   :  { %s683_s15 = smov 0   ;;  %s685_s16 = smov 0   ;;  %s750_s0 = inlined_call_operand.vmem [shape: bf16[32,128], index: 0, kind: input, shape index: {}]   ;;  %s751_s1 = inlined_call_operand.vmem [shape: bf16[128,64], index: 1, kind: input, shape index: {}]   ;;  %s752_s2 = inlined_call_operand.vmem [shape: f32[1,64], index: 2, kind: input, shape index: {}]   ;;  %s753_s3 = inlined_call_operand.vmem [shape: f32[1,64], index: 3, kind: input, shape index: {}]   ;;  %s754_s4 = inlined_call_operand.vmem [shape: bf16[32,64], index: 4, kind: output, shape index: {}]  }
   0x1   :  { %s687_s17 = smov 0  }
   0x2 LB: > { %s33_s18 = sadd.s32 1, %s651_s16  ;;  %p554_p0 = scmp.ge.s32.totalorder %s655_s17, 1  ;;  %s655_s17 = sphi %s687_s17, %s14_s17   ;;  %s651_s16 = sphi %s685_s16, %s756_s16   ;;  %s647_s15 = sphi %s683_s15, %s755_s15  }
   0x3   : > { %p35_p1 = scmp.ge.s32.totalorder %s33_s18, 2  ;;  %p221_p2 = scmp.lt.s32.totalorder %s655_s17, 3 }
   0x5   : > { %s758_s18 = smov (%p35_p1, %s33_s18), 0  ;;  %p222_p3 = pnand %p554_p0, %p221_p2 }
   0x6   : > { %s555_s27 = sshll.u32 (!%p222_p3), %s647_s15, 1 }
   0x7   : > { %225 = sbr.rel (%p222_p3) target bundleno = 197 (0xc5), region = 36  ;;  %p268_p4 = scmp.lt.s32.totalorder (!%p222_p3), %s555_s27, 3 }
   0xc   : > { %v605_v0 = vld [vmem:[%s751_s1 + $0x38] sm:$0xff]  ;;  %vm304_vm0 = vcmask 523264   ;;  %v604_v1 = vld [vmem:[%s751_s1 + $0x30] sm:$0xff]  ;;  %v657_v2 = vmov 0.0   ;;  %v603_v3 = vld [vmem:[%s751_s1 + $0x28] sm:$0xff]  ;;  %s760_s27 = smov (!%p268_p4, %s555_s27), 3 }
   0xd   : > { %381 = vmatpush.bf16.msra.mxu0 %v605_v0  ;;  %305 = vst.msk [vmem:[#allocation2] sm:$0xff] %vm304_vm0, %v657_v2  ;;  %v602_v4 = vld [vmem:[%s751_s1 + $0x20] sm:$0xff]  ;;  %v601_v5 = vld [vmem:[%s751_s1 + $0x18] sm:$0xff]  ;;  %v600_v6 = vld [vmem:[%s751_s1 + $0x10] sm:$0xff]  ;;  %s556_s8 = sshll.u32 %s760_s27, 2  ;;  %vm421_vm1 = vcmask 519168  }
   0xe   : > { %306 = vst.msk [vmem:[#allocation2 + $0x8] sm:$0xff] %vm304_vm0, %v657_v2  ;;  %v599_v7 = vld [vmem:[%s751_s1 + $0x8] sm:$0xff]  ;;  %v598_v8 = vld [vmem:[%s751_s1] sm:$0xff]  ;;  %s274_s13 = scalar_lea.vmem %s750_s0, %s556_s8  ;;  %s298_s23 = scalar_lea.vmem %s754_s4, %s556_s8 }
   0xf   : > { %v597_v9 = vld [vmem:[%s274_s13] sm:$0xff] }
  0x10   : > { %v631_v14 = vld [vmem:[%s752_s2] ss:$0 sm:$0xff] }
  0x11   : > { %382 = vmatpush.bf16.msra.mxu0 %v604_v1  ;;  %v632_v16 = vld [vmem:[%s753_s3] ss:$0 sm:$0xff] }
  0x14   : > { %v307_v10 = vld [vmem:[#allocation2] sm:$0xff] }
  0x15   : > { %383 = vmatpush.bf16.msra.mxu0 %v603_v3  ;;  %v308_v13 = vld [vmem:[#allocation2 + $0x8] sm:$0xff] }
  0x19   : > { %384 = vmatpush.bf16.msra.mxu0 %v602_v4 }
  0x1d   : > { %385 = vmatpush.bf16.msra.mxu0 %v601_v5 }
  0x21   : > { %386 = vmatpush.bf16.msra.mxu0 %v600_v6 }
  0x25   : > { %387 = vmatpush.bf16.msra.mxu0 %v599_v7 }
  0x29   : > { %388 = vmatpush.bf16.msra.mxu0 %v598_v8 }
  0x2c   : > { %389 = vmatmul.bf16.vlgmr.msra.gmra.mxu0 %v597_v9 }
  0xa9   : > { %v390_v11 = vpop.f32.mrf.mxu0 }
  0xaa   : > { %v395_v12 = vadd.f32 %v390_v11, %v307_v10 }
  0xac   : > { %398 = vst.msk [vmem:[#allocation2] sm:$0xff] %vm304_vm0, %v395_v12 }
  0xb1   : > { %v392_v15 = vpop.f32.mrf.mxu0 }
  0xb2   : > { %v396_v17 = vadd.f32 %v392_v15, %v308_v13 }
  0xb3   : > { %v403_v18 = vld [vmem:[#allocation2] sm:$0xff] }
  0xb4   : > { %v409_v19 = vmul.f32 %v631_v14, %v403_v18  ;;  %399 = vst.msk [vmem:[#allocation2 + $0x8] sm:$0xff] %vm304_vm0, %v396_v17 }
  0xb6   : > { %v415_v20 = vadd.f32 %v632_v16, %v409_v19 }
  0xb8   : > { %v417_v21 = vmax.f32 %v415_v20, 0.0 }
  0xba   : > { %v419_v22 = vpack.c.bf16 %v417_v21, %v417_v21 }
  0xbb   : > { %v404_v23 = vld [vmem:[#allocation2 + $0x8] sm:$0xff] }
  0xbc   : > { %422 = vst.msk [vmem:[%s298_s23] sm:$0xf] %vm421_vm1, %v419_v22  ;;  %v410_v24 = vmul.f32 %v631_v14, %v404_v23 }
  0xbe   : > { %v416_v25 = vadd.f32 %v632_v16, %v410_v24 }
  0xc0   : > { %v418_v26 = vmax.f32 %v416_v25, 0.0 }
  0xc2   : > { %v420_v27 = vpack.c.bf16 %v418_v26, %v418_v26 }
  0xc4   : > { %423 = vst.msk [vmem:[%s298_s23 + $0x4] sm:$0xf] %vm421_vm1, %v420_v27 }
  0xc5 PF: > { %s14_s17 = sadd.s32 1, %s655_s17   ;;  %s755_s15 = smov %s651_s16 }
  0xc6   : > { %p11_p5 = scmp.ge.s32.totalorder %s14_s17, 4   ;;  %s756_s16 = smov %s758_s18 }
  0xc8   :  { %13 = sbr.rel (!%p11_p5) target bundleno = 2 (0x2), region = 83 }

// kernel: forward.12
= control target key start
LH: loop header
LB: loop body
LE: loop exit
PB: predicated region body
PF: predicated region fallthrough
CT: control target
= control target key end

     0   :  { %s902_s24 = smov 0   ;;  %s904_s25 = smov 0   ;;  %s972_s0 = inlined_call_operand.vmem [shape: bf16[32,64], index: 0, kind: input, shape index: {}]   ;;  %s973_s1 = inlined_call_operand.vmem [shape: bf16[64,128], index: 1, kind: input, shape index: {}]   ;;  %s974_s2 = inlined_call_operand.vmem [shape: f32[1,128], index: 2, kind: input, shape index: {}]   ;;  %s975_s3 = inlined_call_operand.vmem [shape: f32[1,128], index: 3, kind: input, shape index: {}]   ;;  %s976_s4 = inlined_call_operand.vmem [shape: f32[32,128], index: 4, kind: input, shape index: {}]   ;;  %s977_s5 = inlined_call_operand.vmem [shape: f32[1,128], index: 5, kind: input, shape index: {}]   ;;  %s978_s6 = inlined_call_operand.vmem [shape: f32[1,128], index: 6, kind: input, shape index: {}]   ;;  %s979_s7 = inlined_call_operand.vmem [shape: f32[32,128], index: 7, kind: output, shape index: {}]  }
   0x1   :  { %s906_s26 = smov 0  }
   0x2 LB: > { %s36_s27 = sadd.s32 1, %s854_s25  ;;  %p765_p0 = scmp.ge.s32.totalorder %s858_s26, 1  ;;  %s858_s26 = sphi %s906_s26, %s17_s26   ;;  %s854_s25 = sphi %s904_s25, %s981_s25   ;;  %s850_s24 = sphi %s902_s24, %s980_s24  }
   0x3   : > { %p38_p1 = scmp.ge.s32.totalorder %s36_s27, 2  ;;  %p328_p2 = scmp.lt.s32.totalorder %s858_s26, 3 }
   0x5   : > { %s983_s27 = smov (%p38_p1, %s36_s27), 0  ;;  %p329_p3 = pnand %p765_p0, %p328_p2 }
   0x6   : > { %s766_s30 = sshll.u32 (!%p329_p3), %s850_s24, 1 }
   0x7   : > { %332 = sbr.rel (%p329_p3) target bundleno = 445 (0x1bd), region = 48  ;;  %p395_p4 = scmp.lt.s32.totalorder (!%p329_p3), %s766_s30, 3 }
   0xc   : > { %v799_v0 = vld [vmem:[%s973_s1 + $0x18] sm:$0xff]  ;;  %v798_v1 = vld [vmem:[%s973_s1 + $0x10] sm:$0xff]  ;;  %s985_s30 = smov (!%p395_p4, %s766_s30), 3  ;;  %v797_v2 = vld [vmem:[%s973_s1 + $0x8] sm:$0xff]  ;;  %v860_v3 = vmov 0.0   ;;  %vm490_vm0 = vcmask 523264  }
   0xd   : > { %498 = vmatpush.bf16.msra.mxu0 %v799_v0  ;;  %s769_s10 = sshll.u32 %s985_s30, 3  ;;  %s767_s16 = sshll.u32 %s985_s30, 2  ;;  %v796_v4 = vld [vmem:[%s973_s1] sm:$0xff]  ;;  %v861_v21 = vmov 128.0  }
   0xe   : > { %s932_s15 = scalar_lea.vmem %s979_s7, %s769_s10  ;;  %s401_s21 = scalar_lea.vmem %s972_s0, %s767_s16  ;;  %v826_v10 = vld [vmem:[%s974_s2] ss:$0 sm:$0xff]  ;;  %830 = vrcp.f32 %v861_v21 }
   0xf   : > { %447 = vst [vmem:[%s932_s15] sm:$0xff] %v860_v3  ;;  %v795_v5 = vld [vmem:[%s401_s21] sm:$0xff]  ;;  %s425_s29 = scalar_lea.vmem %s976_s4, %s769_s10 }
  0x10   : > { %448 = vst [vmem:[%s932_s15 + $0x8] sm:$0xff] %v860_v3  ;;  %v827_v13 = vld [vmem:[%s975_s3] ss:$0 sm:$0xff]  ;;  %v530_v19 = vld [vmem:[%s425_s29 + $0x8] sm:$0xff] }
  0x11   : > { %499 = vmatpush.bf16.msra.mxu0 %v798_v1  ;;  %v529_v14 = vld [vmem:[%s425_s29] sm:$0xff] }
  0x12   : > { %v828_v50 = vld [vmem:[%s977_s5] ss:$0 sm:$0xff] }
  0x13   : > { %v829_v53 = vld [vmem:[%s978_s6] ss:$0 sm:$0xff] }
  0x14   : > { %v831_v22 = vpop.eup %830 }
  0x15   : > { %500 = vmatpush.bf16.msra.mxu0 %v797_v2  ;;  %v538_v23 = vmul.f32 128.0, %v831_v22  ;;  %vm542_vm1 = vweird.f32 %v831_v22 }
  0x16   : > { %v449_v6 = vld [vmem:[%s932_s15] sm:$0xff] }
  0x17   : > { %v539_v24 = vsub.f32 1.0, %v538_v23 }
  0x19   : > { %501 = vmatpush.bf16.msra.mxu0 %v796_v4  ;;  %v540_v25 = vmul.f32 %v831_v22, %v539_v24 }
  0x1b   : > { %v541_v26 = vadd.f32 %v831_v22, %v540_v25 }
  0x1c   : > { %792 = vmatmul.msk.bf16.vlgmr.msra.gmra.mxu0 %vm490_vm0, %v795_v5 }
  0x1d   : > { %v543_v27 = vsel %vm542_vm1, %v831_v22, %v541_v26 }
  0x99   : > { %v503_v7 = vpop.f32.mrf.mxu0 }
  0x9a   : > { %v508_v8 = vadd.f32 %v503_v7, %v449_v6 }
  0x9c   : > { %510 = vst [vmem:[%s932_s15] sm:$0xff] %v508_v8 }
  0xa1   : > { %v505_v9 = vpop.f32.mrf.mxu0 }
  0xa2   : > { %511 = vst [vmem:[%s932_s15 + $0x8] sm:$0xff] %v505_v9  ;;  %v522_v17 = vmul.f32 %v826_v10, %v505_v9 }
  0xa3   : > { %v515_v11 = vld [vmem:[%s932_s15] sm:$0xff] }
  0xa4   : > { %v521_v12 = vmul.f32 %v826_v10, %v515_v11  ;;  %v528_v18 = vadd.f32 %v827_v13, %v522_v17 }
  0xa6   : > { %v527_v15 = vadd.f32 %v827_v13, %v521_v12  ;;  %v532_v20 = vadd.f32 %v530_v19, %v528_v18 }
  0xa8   : > { %v531_v16 = vadd.f32 %v529_v14, %v527_v15 }
  0xaa   : > { %533 = vadd.xlane.f32.xlu0 %v531_v16 }
  0xb2   : > { %535 = vadd.xlane.f32.xlu0 %v532_v20 }
 0x11d   : > { %v534_v28 = vpop.xlane.xlu0 %533 }
 0x11e   : > { %v544_v29 = vmul.f32 %v543_v27, %v534_v28 }
 0x120   : > { %v546_v30 = vsub.f32 %v531_v16, %v544_v29 }
 0x122   : > { %v548_v31 = vmul.f32 %v546_v30, %v546_v30 }
 0x124   : > { %550 = vadd.xlane.f32.xlu1 %v548_v31 }
 0x125   : > { %v536_v32 = vpop.xlane.xlu0 %535 }
 0x126   : > { %v545_v33 = vmul.f32 %v543_v27, %v536_v32 }
 0x128   : > { %v547_v34 = vsub.f32 %v532_v20, %v545_v33 }
 0x12a   : > { %v549_v35 = vmul.f32 %v547_v34, %v547_v34 }
 0x12c   : > { %552 = vadd.xlane.f32.xlu1 %v549_v35 }
 0x197   : > { %v551_v36 = vpop.xlane.xlu1 %550 }
 0x198   : > { %v554_v37 = vmul.f32 %v551_v36, %v543_v27 }
 0x19a   : > { %v556_v38 = vadd.f32 1e-05, %v554_v37 }
 0x19c   : > { %832 = vrsqrt.f32 %v556_v38  ;;  %vm564_vm3 = vweird.f32 %v556_v38 }
 0x19f   : > { %v553_v39 = vpop.xlane.xlu1 %552 }
 0x1a0   : > { %v555_v40 = vmul.f32 %v553_v39, %v543_v27 }
 0x1a2   : > { %v833_v41 = vpop.eup %832  ;;  %v557_v42 = vadd.f32 1e-05, %v555_v40 }
 0x1a3   : > { %v559_v43 = vmul.f32 %v833_v41, %v556_v38  ;;  %vm565_vm2 = vweird.f32 %v833_v41 }
 0x1a4   : > { %834 = vrsqrt.f32 %v557_v42  ;;  %vm566_vm4 = vmor %vm564_vm3, %vm565_vm2  ;;  %vm574_vm6 = vweird.f32 %v557_v42 }
 0x1a5   : > { %v560_v44 = vmul.f32 %v833_v41, %v559_v43 }
 0x1a7   : > { %v561_v45 = vmul.f32 0.5, %v560_v44 }
 0x1a9   : > { %v562_v46 = vsub.f32 1.5, %v561_v45 }
 0x1aa   : > { %v835_v47 = vpop.eup %834 }
 0x1ab   : > { %v563_v48 = vmul.f32 %v833_v41, %v562_v46  ;;  %v569_v49 = vmul.f32 %v835_v47, %v557_v42  ;;  %vm575_vm5 = vweird.f32 %v835_v47 }
 0x1ac   : > { %vm576_vm7 = vmor %vm574_vm6, %vm575_vm5 }
 0x1ad   : > { %v567_v51 = vsel %vm566_vm4, %v833_v41, %v563_v48  ;;  %v570_v52 = vmul.f32 %v835_v47, %v569_v49 }
 0x1ae   : > { %v578_v54 = vmul.f32 %v567_v51, %v546_v30 }
 0x1af   : > { %v571_v55 = vmul.f32 0.5, %v570_v52 }
 0x1b0   : > { %v584_v56 = vmul.f32 %v828_v50, %v578_v54 }
 0x1b1   : > { %v572_v57 = vsub.f32 1.5, %v571_v55 }
 0x1b2   : > { %v590_v58 = vadd.f32 %v829_v53, %v584_v56 }
 0x1b3   : > { %v573_v59 = vmul.f32 %v835_v47, %v572_v57 }
 0x1b4   : > { %592 = vst [vmem:[%s932_s15] sm:$0xff] %v590_v58 }
 0x1b5   : > { %v577_v60 = vsel %vm576_vm7, %v835_v47, %v573_v59 }
 0x1b6   : > { %v579_v61 = vmul.f32 %v577_v60, %v547_v34 }
 0x1b8   : > { %v585_v62 = vmul.f32 %v828_v50, %v579_v61 }
 0x1ba   : > { %v591_v63 = vadd.f32 %v829_v53, %v585_v62 }
 0x1bc   : > { %593 = vst [vmem:[%s932_s15 + $0x8] sm:$0xff] %v591_v63 }
 0x1bd PF: > { %s17_s26 = sadd.s32 1, %s858_s26   ;;  %s980_s24 = smov %s854_s25 }
 0x1be   : > { %p14_p5 = scmp.ge.s32.totalorder %s17_s26, 4   ;;  %s981_s25 = smov %s983_s27 }
 0x1c0   :  { %16 = sbr.rel (!%p14_p5) target bundleno = 2 (0x2), region = 104 }

// kernel: forward.13
= control target key start
LH: loop header
LB: loop body
LE: loop exit
PB: predicated region body
PF: predicated region fallthrough
CT: control target
= control target key end

     0   :  { %s765_s15 = smov 0   ;;  %s767_s16 = smov 0   ;;  %s889_s0 = inlined_call_operand.vmem [shape: bf16[128,72], index: 0, kind: input, shape index: {}]   ;;  %s890_s1 = inlined_call_operand.vmem [shape: bf16[72,8], index: 1, kind: input, shape index: {}]   ;;  %s891_s2 = inlined_call_operand.vmem [shape: f32[1,8], index: 2, kind: input, shape index: {}]   ;;  %s892_s3 = inlined_call_operand.vmem [shape: f32[1,8], index: 3, kind: input, shape index: {}]   ;;  %s893_s4 = inlined_call_operand.vmem [shape: f32[128,8], index: 4, kind: output, shape index: {}]  }
   0x1   :  { %s769_s17 = smov 0  }
   0x2 LB: > { %s33_s18 = sadd.s32 1, %s733_s16  ;;  %p622_p0 = scmp.ge.s32.totalorder %s737_s17, 1  ;;  %s737_s17 = sphi %s769_s17, %s14_s17   ;;  %s733_s16 = sphi %s767_s16, %s895_s16   ;;  %s729_s15 = sphi %s765_s15, %s894_s15  }
   0x3   : > { %p35_p1 = scmp.ge.s32.totalorder %s33_s18, 2  ;;  %p221_p2 = scmp.lt.s32.totalorder %s737_s17, 3 }
   0x5   : > { %s897_s18 = smov (%p35_p1, %s33_s18), 0  ;;  %p222_p3 = pnand %p622_p0, %p221_p2 }
   0x6   : > { %s623_s21 = sshll.u32 (!%p222_p3), %s729_s15, 3 }
   0x7   : > { %225 = sbr.rel (%p222_p3) target bundleno = 194 (0xc2), region = 36  ;;  %p268_p4 = scmp.lt.s32.totalorder (!%p222_p3), %s623_s21, 15 }
   0xc   : > { %v338_v0 = vld [vmem:[%s890_s1 + $0x20] sm:$0xf]  ;;  %vm399_vm0 = vcmask 1043456   ;;  %s899_s21 = smov (!%p268_p4, %s623_s21), 15  ;;  %vm305_vm1 = vcmask 64512   ;;  %v672_v4 = vld [vmem:[%s890_s1 + $0x18] sm:$0xff] }
   0xd   : > { %v376_v1 = vunpack.c.l.b16 %v338_v0  ;;  %s626_s22 = sshll.u32 %s899_s21, 3  ;;  %v739_v5 = vmov 0.0   ;;  %v671_v6 = vld [vmem:[%s890_s1 + $0x10] sm:$0xff]  ;;  %v670_v7 = vld [vmem:[%s890_s1 + $0x8] sm:$0xff]  ;;  %s624_s6 = sshll.u32 %s899_s21, 2  ;;  %v669_v8 = vld [vmem:[%s890_s1] sm:$0xff] }
   0xe   : > { %s795_s27 = scalar_lea.vmem %s893_s4, %s626_s22  ;;  %s274_s11 = scalar_lea.vmem %s889_s0, %s624_s6  ;;  %vm386_vm2 = vcmask 588800   ;;  %v713_v23 = vld [vmem:[%s891_s2] ss:$0 sm:$0xff] }
   0xf   : > { %v381_v2 = vpack.c.b16 %v376_v1, %v376_v1  ;;  %306 = vst.msk [vmem:[%s795_s27] sm:$0xff] %vm305_vm1, %v739_v5  ;;  %v665_v9 = vld [vmem:[%s274_s11] sm:$0xff]  ;;  %v666_v10 = vld [vmem:[%s274_s11 + $0x8] sm:$0xff]  ;;  %v667_v11 = vld [vmem:[%s274_s11 + $0x10] sm:$0xff] }
  0x10   : > { %307 = vst.msk [vmem:[%s795_s27 + $0x8] sm:$0xff] %vm305_vm1, %v739_v5  ;;  %v668_v12 = vld [vmem:[%s274_s11 + $0x18] sm:$0xff]  ;;  %v714_v30 = vld [vmem:[%s892_s3] ss:$0 sm:$0xff] }
  0x11   : > { %v401_v3 = vsel %vm399_vm0, %v381_v2, 0  ;;  %308 = vst.msk [vmem:[%s795_s27 + $0x10] sm:$0xff] %vm305_vm1, %v739_v5 }
  0x12   : > { %406 = vmatpush.bf16.msra.mxu0 %v401_v3  ;;  %673 = vmatpush.bf16.msra.mxu1 %v401_v3  ;;  %309 = vst.msk [vmem:[%s795_s27 + $0x18] sm:$0xff] %vm305_vm1, %v739_v5 }
  0x13   : > { %674 = vmatpush.bf16.msra.mxu2 %v401_v3  ;;  %675 = vmatpush.bf16.msra.mxu3 %v401_v3  ;;  %310 = vst.msk [vmem:[%s795_s27 + $0x20] sm:$0xff] %vm305_vm1, %v739_v5 }
  0x14   : > { %311 = vst.msk [vmem:[%s795_s27 + $0x28] sm:$0xff] %vm305_vm1, %v739_v5 }
  0x15   : > { %312 = vst.msk [vmem:[%s795_s27 + $0x30] sm:$0xff] %vm305_vm1, %v739_v5 }
  0x16   : > { %407 = vmatpush.bf16.msra.mxu0 %v672_v4  ;;  %676 = vmatpush.bf16.msra.mxu1 %v672_v4  ;;  %313 = vst.msk [vmem:[%s795_s27 + $0x38] sm:$0xff] %vm305_vm1, %v739_v5  ;;  %v314_v13 = vld [vmem:[%s795_s27] sm:$0xff] }
  0x17   : > { %677 = vmatpush.bf16.msra.mxu2 %v672_v4  ;;  %678 = vmatpush.bf16.msra.mxu3 %v672_v4  ;;  %v315_v21 = vld [vmem:[%s795_s27 + $0x8] sm:$0xff] }
  0x18   : > { %v316_v14 = vld [vmem:[%s795_s27 + $0x10] sm:$0xff] }
  0x19   : > { %v317_v22 = vld [vmem:[%s795_s27 + $0x18] sm:$0xff] }
  0x1a   : > { %408 = vmatpush.bf16.msra.mxu0 %v671_v6  ;;  %679 = vmatpush.bf16.msra.mxu1 %v671_v6  ;;  %v318_v19 = vld [vmem:[%s795_s27 + $0x20] sm:$0xff] }
  0x1b   : > { %680 = vmatpush.bf16.msra.mxu2 %v671_v6  ;;  %681 = vmatpush.bf16.msra.mxu3 %v671_v6  ;;  %v319_v38 = vld [vmem:[%s795_s27 + $0x28] sm:$0xff] }
  0x1c   : > { %v320_v20 = vld [vmem:[%s795_s27 + $0x30] sm:$0xff] }
  0x1d   : > { %v321_v39 = vld [vmem:[%s795_s27 + $0x38] sm:$0xff] }
  0x1e   : > { %409 = vmatpush.bf16.msra.mxu0 %v670_v7  ;;  %682 = vmatpush.bf16.msra.mxu1 %v670_v7 }
  0x1f   : > { %683 = vmatpush.bf16.msra.mxu2 %v670_v7  ;;  %684 = vmatpush.bf16.msra.mxu3 %v670_v7 }
  0x22   : > { %410 = vmatpush.bf16.msra.mxu0 %v669_v8  ;;  %685 = vmatpush.bf16.msra.mxu1 %v669_v8 }
  0x23   : > { %686 = vmatpush.bf16.msra.mxu2 %v669_v8  ;;  %687 = vmatpush.bf16.msra.mxu3 %v669_v8 }
  0x25   : > { %659 = vmatmul.msk.bf16.vlgmr.msra.gmra.mxu0 %vm386_vm2, %v665_v9  ;;  %660 = vmatmul.msk.bf16.vlgmr.msra.gmra.mxu1 %vm386_vm2, %v666_v10 }
  0x26   : > { %661 = vmatmul.msk.bf16.vlgmr.msra.gmra.mxu2 %vm386_vm2, %v667_v11  ;;  %662 = vmatmul.msk.bf16.vlgmr.msra.gmra.mxu3 %vm386_vm2, %v668_v12 }
  0xa2   : > { %v412_v15 = vpop.f32.mrf.mxu0  ;;  %v417_v16 = vpop.f32.mrf.mxu1 }
  0xa3   : > { %v432_v17 = vadd.f32 %v412_v15, %v314_v13  ;;  %v434_v18 = vadd.f32 %v417_v16, %v316_v14 }
  0xa5   : > { %441 = vst.msk [vmem:[%s795_s27] sm:$0xff] %vm305_vm1, %v432_v17 }
  0xa6   : > { %443 = vst.msk [vmem:[%s795_s27 + $0x10] sm:$0xff] %vm305_vm1, %v434_v18 }
  0xa9   : > { %v422_v24 = vpop.f32.mrf.mxu2  ;;  %v427_v25 = vpop.f32.mrf.mxu3 }
  0xaa   : > { %v436_v26 = vadd.f32 %v422_v24, %v318_v19  ;;  %v438_v27 = vadd.f32 %v427_v25, %v320_v20  ;;  %v414_v28 = vpop.f32.mrf.mxu0  ;;  %v419_v29 = vpop.f32.mrf.mxu1 }
  0xab   : > { %v433_v31 = vadd.f32 %v414_v28, %v315_v21  ;;  %v435_v32 = vadd.f32 %v419_v29, %v317_v22 }
  0xac   : > { %v452_v33 = vld [vmem:[%s795_s27] sm:$0xff]  ;;  %445 = vst.msk [vmem:[%s795_s27 + $0x20] sm:$0xff] %vm305_vm1, %v436_v26 }
  0xad   : > { %v464_v34 = vmul.f32 %v713_v23, %v452_v33  ;;  %v454_v35 = vld [vmem:[%s795_s27 + $0x10] sm:$0xff]  ;;  %447 = vst.msk [vmem:[%s795_s27 + $0x30] sm:$0xff] %vm305_vm1, %v438_v27 }
  0xae   : > { %v466_v36 = vmul.f32 %v713_v23, %v454_v35  ;;  %442 = vst.msk [vmem:[%s795_s27 + $0x8] sm:$0xff] %vm305_vm1, %v433_v31 }
  0xaf   : > { %v476_v37 = vadd.f32 %v714_v30, %v464_v34  ;;  %444 = vst.msk [vmem:[%s795_s27 + $0x18] sm:$0xff] %vm305_vm1, %v435_v32 }
  0xb0   : > { %v478_v40 = vadd.f32 %v714_v30, %v466_v36 }
  0xb1   : > { %484 = vst.msk [vmem:[%s795_s27] sm:$0xff] %vm305_vm1, %v476_v37  ;;  %v424_v41 = vpop.f32.mrf.mxu2  ;;  %v429_v42 = vpop.f32.mrf.mxu3 }
  0xb2   : > { %486 = vst.msk [vmem:[%s795_s27 + $0x10] sm:$0xff] %vm305_vm1, %v478_v40  ;;  %v437_v43 = vadd.f32 %v424_v41, %v319_v38  ;;  %v439_v44 = vadd.f32 %v429_v42, %v321_v39 }
  0xb3   : > { %v456_v45 = vld [vmem:[%s795_s27 + $0x20] sm:$0xff] }
  0xb4   : > { %v468_v46 = vmul.f32 %v713_v23, %v456_v45  ;;  %v458_v47 = vld [vmem:[%s795_s27 + $0x30] sm:$0xff]  ;;  %446 = vst.msk [vmem:[%s795_s27 + $0x28] sm:$0xff] %vm305_vm1, %v437_v43 }
  0xb5   : > { %v470_v48 = vmul.f32 %v713_v23, %v458_v47  ;;  %v453_v49 = vld [vmem:[%s795_s27 + $0x8] sm:$0xff]  ;;  %448 = vst.msk [vmem:[%s795_s27 + $0x38] sm:$0xff] %vm305_vm1, %v439_v44 }
  0xb6   : > { %v480_v50 = vadd.f32 %v714_v30, %v468_v46  ;;  %v465_v51 = vmul.f32 %v713_v23, %v453_v49  ;;  %v455_v52 = vld [vmem:[%s795_s27 + $0x18] sm:$0xff] }
  0xb7   : > { %v482_v53 = vadd.f32 %v714_v30, %v470_v48  ;;  %v467_v54 = vmul.f32 %v713_v23, %v455_v52 }
  0xb8   : > { %488 = vst.msk [vmem:[%s795_s27 + $0x20] sm:$0xff] %vm305_vm1, %v480_v50  ;;  %v477_v55 = vadd.f32 %v714_v30, %v465_v51 }
  0xb9   : > { %490 = vst.msk [vmem:[%s795_s27 + $0x30] sm:$0xff] %vm305_vm1, %v482_v53  ;;  %v479_v56 = vadd.f32 %v714_v30, %v467_v54 }
  0xba   : > { %485 = vst.msk [vmem:[%s795_s27 + $0x8] sm:$0xff] %vm305_vm1, %v477_v55 }
  0xbb   : > { %487 = vst.msk [vmem:[%s795_s27 + $0x18] sm:$0xff] %vm305_vm1, %v479_v56  ;;  %v457_v57 = vld [vmem:[%s795_s27 + $0x28] sm:$0xff] }
  0xbc   : > { %v469_v58 = vmul.f32 %v713_v23, %v457_v57  ;;  %v459_v59 = vld [vmem:[%s795_s27 + $0x38] sm:$0xff] }
  0xbd   : > { %v471_v60 = vmul.f32 %v713_v23, %v459_v59 }
  0xbe   : > { %v481_v61 = vadd.f32 %v714_v30, %v469_v58 }
  0xbf   : > { %v483_v62 = vadd.f32 %v714_v30, %v471_v60 }
  0xc0   : > { %489 = vst.msk [vmem:[%s795_s27 + $0x28] sm:$0xff] %vm305_vm1, %v481_v61 }
  0xc1   : > { %491 = vst.msk [vmem:[%s795_s27 + $0x38] sm:$0xff] %vm305_vm1, %v483_v62 }
  0xc2 PF: > { %s14_s17 = sadd.s32 1, %s737_s17   ;;  %s894_s15 = smov %s733_s16 }
  0xc3   : > { %p11_p5 = scmp.ge.s32.totalorder %s14_s17, 4   ;;  %s895_s16 = smov %s897_s18 }
  0xc5   :  { %13 = sbr.rel (!%p11_p5) target bundleno = 2 (0x2), region = 83 }

</bundles_post_ra>
